<compile_context>
chip_gen: v7x
topology: tpu7x:2x2x1
jax: 0.10.0
libtpu: 0.0.40
codegen_flags: <defaults>
</compile_context>

<pallas_src>
import functools
import math

import jax
import jax.numpy as jnp
from jax.experimental import pallas as pl
from jax.experimental.pallas import tpu as pltpu


# ----------------------------------------------------------------------------
# Fused per-(batch, q-tile) MHA kernel.
# ----------------------------------------------------------------------------
def _mha_kernel(x_ref, wqkv_ref, bqkv_ref, wp_ref, bp_ref, o_ref, qkv_ref, *,
                n_head, nc, tq):
    C = n_head * nc
    qi = pl.program_id(1)

    # --- Full-sequence QKV projection, once per batch element (qi == 0). ----
    # Single (T, C) @ (C, 3C) bf16 matmul -> full MXU column fill.  The scale
    # (1/sqrt(nc)) and q-bias are pre-folded into the packed weights/bias.
    @pl.when(qi == 0)
    def _():
        qkv = jnp.dot(x_ref[...], wqkv_ref[...],
                      preferred_element_type=jnp.float32) + bqkv_ref[...]
        qkv_ref[...] = qkv.astype(jnp.bfloat16)

    # --- Per-head attention for this query tile. -----------------------------
    row0 = pl.multiple_of(qi * tq, tq)
    q_tile = qkv_ref[pl.ds(row0, tq), :C]                      # (tq, C) bf16

    head_outs = []
    for h in range(n_head):
        c0 = h * nc
        qh = q_tile[:, c0:c0 + nc]                             # (tq, nc) bf16
        kh = qkv_ref[:, C + c0:C + c0 + nc]                    # (T,  nc) bf16
        vh = qkv_ref[:, 2 * C + c0:2 * C + c0 + nc]            # (T,  nc) bf16

        # Contract the head dim directly (no explicit K transpose / relayout).
        s = jax.lax.dot_general(qh, kh, (((1,), (1,)), ((), ())),
                                preferred_element_type=jnp.float32)  # (tq, T)
        m = jnp.max(s, axis=-1, keepdims=True)                 # stable softmax
        p = jnp.exp(s - m)                                     # (tq, T) f32
        l = jnp.sum(p, axis=-1, keepdims=True)                 # (tq, 1) f32
        oh = jnp.dot(p.astype(jnp.bfloat16), vh,
                     preferred_element_type=jnp.float32)       # (tq, nc) f32
        # Deferred normalization: scale the (tq, nc) output, not the (tq, T)
        # probability tile; reciprocal runs on the EUP slot.
        oh = oh * pl.reciprocal(l, approx=True)
        head_outs.append(oh.astype(jnp.bfloat16))
        # attn_drop is identity (attn_pdrop = 0.0).

    out_heads = jnp.concatenate(head_outs, axis=-1)            # (tq, C) bf16

    # --- Single fused output projection for all heads (one write per step). --
    o = jnp.dot(out_heads, wp_ref[...],
                preferred_element_type=jnp.float32) + bp_ref[...]
    o_ref[...] = o.astype(o_ref.dtype)
    # proj_drop is identity (proj_pdrop = 0.0).


# ----------------------------------------------------------------------------
# Wrapper.  Inputs/outputs in PyTorch NCW layout (B, C, T).
# ----------------------------------------------------------------------------
def mha_forward(params, x, *, n_head, tq=128):
    B, C, T = x.shape
    assert C % n_head == 0
    nc = C // n_head
    tq = min(tq, T)
    assert T % tq == 0, "T must be divisible by the query-tile size"
    nq = T // tq

    # NCW -> NWC (time on sublanes, channels on lanes); bf16 halves x DMA.
    xt = jnp.transpose(x, (0, 2, 1)).astype(jnp.bfloat16)      # (B, T, C)

    flops = 8 * B * T * C * C + 4 * B * T * T * C
    bytes_accessed = (B * T * C * 2 + B * T * C * 4
                      + 4 * C * C * 2 + 4 * C * 4)
    cost = pl.CostEstimate(flops=flops,
                           transcendentals=B * n_head * T * T,
                           bytes_accessed=bytes_accessed)

    # Explicit VMEM budget (double-buffered blocks + scratch + temps headroom).
    vmem_bytes = int(1.5 * (
        2 * T * C * 2                        # x block (bf16, double-buffered)
        + 2 * (3 * C * C * 2 + 3 * C * 4)    # packed Wqkv / bqkv
        + 2 * (C * C * 2 + C * 4)            # Wp / bp
        + 2 * tq * C * 4                     # output block (f32, double-buffered)
        + T * 3 * C * 2                      # QKV scratch (bf16)
        + T * 3 * C * 4                      # f32 QKV temp at qi == 0
        + 2 * tq * T * 4                     # per-head (tq, T) score/exp temps
    )) + (4 << 20)
    vmem_bytes = min(vmem_bytes, 100 << 20)

    kernel = functools.partial(_mha_kernel, n_head=n_head, nc=nc, tq=tq)
    out = pl.pallas_call(
        kernel,
        out_shape=jax.ShapeDtypeStruct((B, T, C), jnp.float32),
        grid=(B, nq),
        in_specs=[
            pl.BlockSpec((None, T, C), lambda b, qi: (b, 0, 0)),   # x (resident over qi)
            pl.BlockSpec((C, 3 * C), lambda b, qi: (0, 0)),        # packed Wqkv (bf16)
            pl.BlockSpec((1, 3 * C), lambda b, qi: (0, 0)),        # packed bqkv (f32)
            pl.BlockSpec((C, C), lambda b, qi: (0, 0)),            # Wp (bf16)
            pl.BlockSpec((1, C), lambda b, qi: (0, 0)),            # bp (f32)
        ],
        out_specs=pl.BlockSpec((None, tq, C), lambda b, qi: (b, qi, 0)),
        scratch_shapes=[pltpu.VMEM((T, 3 * C), jnp.bfloat16)],     # QKV scratch
        compiler_params=pltpu.CompilerParams(
            dimension_semantics=("parallel", "arbitrary"),
            vmem_limit_bytes=vmem_bytes),
        cost_estimate=cost,
    )(xt, params["w_qkv"], params["b_qkv"], params["w_p"], params["b_p"])

    return jnp.transpose(out, (0, 2, 1))                       # (B, C, T)


# ----------------------------------------------------------------------------
# Deterministic parameter init (PyTorch Conv1d(k=1) uniform bounds), packed:
# QKV weights concatenated along the output channels with the attention scale
# folded into the query projection; weights in bf16, biases in f32.
# ----------------------------------------------------------------------------
def init_mha_params(key, n_embd, n_head):
    assert n_embd % n_head == 0
    nc = n_embd // n_head
    scale = 1.0 / math.sqrt(nc)
    bound = 1.0 / math.sqrt(n_embd)
    ks = jax.random.split(key, 8)
    uni = lambda k, shape: jax.random.uniform(k, shape, jnp.float32, -bound, bound)

    wq, wk, wv, wp = (uni(ks[i], (n_embd, n_embd)) for i in range(4))  # (Cin, Cout)
    bq, bk, bv, bp = (uni(ks[4 + i], (n_embd,)) for i in range(4))

    w_qkv = jnp.concatenate([wq * scale, wk, wv], axis=1).astype(jnp.bfloat16)
    b_qkv = jnp.concatenate([bq * scale, bk, bv]).reshape(1, 3 * n_embd)
    return {
        "w_qkv": w_qkv,                        # (C, 3C) bf16 (q pre-scaled)
        "b_qkv": b_qkv,                        # (1, 3C) f32
        "w_p": wp.astype(jnp.bfloat16),        # (C, C)  bf16
        "b_p": bp.reshape(1, n_embd),          # (1, C)  f32
    }


# ----------------------------------------------------------------------------
# Pure-JAX f32 reference (matches the PyTorch module in eval mode).
# ----------------------------------------------------------------------------
def mha_reference(params, x, *, n_head):
    B, C, T = x.shape
    nc = C // n_head
    xt = jnp.transpose(x, (0, 2, 1)).astype(jnp.float32)       # (B, T, C)

    w_qkv = params["w_qkv"].astype(jnp.float32)
    b_qkv = params["b_qkv"].astype(jnp.float32).reshape(3 * C)
    qkv = xt @ w_qkv + b_qkv
    q, k, v = qkv[..., :C], qkv[..., C:2 * C], qkv[..., 2 * C:]

    def heads(y):   # (B, T, C) -> (B, H, T, nc)
        return jnp.transpose(y.reshape(B, T, n_head, nc), (0, 2, 1, 3))

    att = jnp.einsum("bhtd,bhsd->bhts", heads(q), heads(k))    # scale pre-folded
    att = jax.nn.softmax(att, axis=-1)
    out = jnp.einsum("bhts,bhsd->bhtd", att, heads(v))         # (B, H, T, nc)
    out = jnp.transpose(out, (0, 2, 1, 3)).reshape(B, T, C)
    out = out @ params["w_p"].astype(jnp.float32) + params["b_p"].reshape(C)
    return jnp.transpose(out, (0, 2, 1))                       # (B, C, T)


if __name__ == "__main__":
    # Small but tile-aligned stand-ins (multiple q-tiles, lane-full C).
    B, n_embd, n_head, T = 2, 256, 4, 256

    key = jax.random.PRNGKey(0)
    kp, kx = jax.random.split(key)
    params = init_mha_params(kp, n_embd, n_head)
    x = jax.random.normal(kx, (B, n_embd, T), jnp.float32)

    fwd = jax.jit(functools.partial(mha_forward, n_head=n_head, tq=128))
    out = jax.block_until_ready(fwd(params, x))

    assert out.shape == (B, n_embd, T)
    assert bool(jnp.all(jnp.isfinite(out)))

    ref = mha_reference(params, x, n_head=n_head)
    max_err = float(jnp.max(jnp.abs(out - ref)))
    # bf16 MXU inputs + approx reciprocal -> loose tolerance.
    assert max_err < 0.1, f"max abs err {max_err}"

    print("KERNEL_OK")
</pallas_src>

<mosaic_0001>
module attributes {stable_mosaic.version = 11 : i64} {
  func.func @_mha_kernel(%arg0: i32, %arg1: i32, %arg2: memref<1x256x256xbf16, #tpu.memory_space<vmem>>, %arg3: memref<256x768xbf16, #tpu.memory_space<vmem>>, %arg4: memref<1x768xf32, #tpu.memory_space<vmem>>, %arg5: memref<256x256xbf16, #tpu.memory_space<vmem>>, %arg6: memref<1x256xf32, #tpu.memory_space<vmem>>, %arg7: memref<1x128x256xf32, #tpu.memory_space<vmem>>, %arg8: memref<256x768xbf16, #tpu.memory_space<vmem>>) attributes {dimension_semantics = [#tpu.dimension_semantics<parallel>, #tpu.dimension_semantics<arbitrary>], iteration_bounds = array<i64: 2, 2>, scalar_prefetch = 0 : i64, scratch_operands = 1 : i64, tpu.core_type = #tpu.core_type<tc>, window_params = [{transform_indices = @transform_0, window_bounds = array<i64: 1, 256, 256>}, {pipeline_mode = #tpu.pipeline_mode<synchronous>, transform_indices = @transform_1, window_bounds = array<i64: 256, 768>}, {pipeline_mode = #tpu.pipeline_mode<synchronous>, transform_indices = @transform_2, window_bounds = array<i64: 1, 768>}, {pipeline_mode = #tpu.pipeline_mode<synchronous>, transform_indices = @transform_3, window_bounds = array<i64: 256, 256>}, {pipeline_mode = #tpu.pipeline_mode<synchronous>, transform_indices = @transform_4, window_bounds = array<i64: 1, 256>}, {transform_indices = @transform_5, window_bounds = array<i64: 1, 128, 256>}]} {
    %c0_i32 = arith.constant 0 : i32
    %0 = arith.cmpi eq, %arg1, %c0_i32 : i32
    %1 = arith.extui %0 : i1 to i32
    %c0_i32_0 = arith.constant 0 : i32
    %2 = arith.cmpi ne, %1, %c0_i32_0 : i32
    scf.if %2 {
      %c0_32 = arith.constant 0 : index
      %c0_33 = arith.constant 0 : index
      %c0_34 = arith.constant 0 : index
      %84 = vector.load %arg2[%c0_32, %c0_33, %c0_34] : memref<1x256x256xbf16, #tpu.memory_space<vmem>>, vector<1x256x256xbf16>
      %85 = vector.shape_cast %84 : vector<1x256x256xbf16> to vector<256x256xbf16>
      %c0_35 = arith.constant 0 : index
      %c0_36 = arith.constant 0 : index
      %86 = vector.load %arg3[%c0_35, %c0_36] : memref<256x768xbf16, #tpu.memory_space<vmem>>, vector<256x768xbf16>
      %cst_37 = arith.constant dense<0.000000e+00> : vector<256x768xf32>
      %87 = tpu.matmul %85, %86, %cst_37 {dimension_numbers = #tpu.dot_dimension_numbers<[1], [0], [0], [1], [0, 0, 1, 1], [], []>} : vector<256x256xbf16>, vector<256x768xbf16>, vector<256x768xf32> -> vector<256x768xf32>
      %c0_38 = arith.constant 0 : index
      %c0_39 = arith.constant 0 : index
      %88 = vector.load %arg4[%c0_38, %c0_39] : memref<1x768xf32, #tpu.memory_space<vmem>>, vector<1x768xf32>
      %89 = vector.broadcast %88 : vector<1x768xf32> to vector<256x768xf32>
      %90 = arith.addf %87, %89 : vector<256x768xf32>
      %91 = arith.truncf %90 : vector<256x768xf32> to vector<256x768xbf16>
      %c0_40 = arith.constant 0 : index
      %c0_41 = arith.constant 0 : index
      %92 = vector.load %arg8[%c0_40, %c0_41] : memref<256x768xbf16, #tpu.memory_space<vmem>>, vector<256x768xbf16>
      tpu.vector_store %arg8[%c0_40, %c0_41], %91 {strides = array<i32>} : memref<256x768xbf16, #tpu.memory_space<vmem>>, vector<256x768xbf16>,
    } else {
    }
    %c128_i32 = arith.constant 128 : i32
    %3 = arith.muli %arg1, %c128_i32 : i32
    %4 = tpu.assume_multiple %3, 128 : i32
    %5 = arith.index_cast %4 : i32 to index
    %c0 = arith.constant 0 : index
    %6 = vector.load %arg8[%5, %c0] : memref<256x768xbf16, #tpu.memory_space<vmem>>, vector<128x256xbf16>
    %7 = vector.extract_strided_slice %6 {offsets = [0, 0], sizes = [128, 64], strides = [1, 1]} : vector<128x256xbf16> to vector<128x64xbf16>
    %c0_1 = arith.constant 0 : index
    %c256 = arith.constant 256 : index
    %8 = vector.load %arg8[%c0_1, %c256] : memref<256x768xbf16, #tpu.memory_space<vmem>>, vector<256x64xbf16>
    %c0_2 = arith.constant 0 : index
    %c512 = arith.constant 512 : index
    %9 = vector.load %arg8[%c0_2, %c512] : memref<256x768xbf16, #tpu.memory_space<vmem>>, vector<256x64xbf16>
    %cst = arith.constant dense<0.000000e+00> : vector<128x256xf32>
    %10 = tpu.matmul %7, %8, %cst {dimension_numbers = #tpu.dot_dimension_numbers<[1], [1], [0], [0], [0, 0, 1, 0], [], []>} : vector<128x64xbf16>, vector<256x64xbf16>, vector<128x256xf32> -> vector<128x256xf32>
    %cst_3 = arith.constant dense<0xFF800000> : vector<128xf32>
    %11 = vector.multi_reduction <maximumf>, %10, %cst_3 [1] : vector<128x256xf32> to vector<128xf32>
    %12 = vector.shape_cast %11 : vector<128xf32> to vector<128x1xf32>
    %13 = vector.broadcast %12 : vector<128x1xf32> to vector<128x256xf32>
    %14 = arith.subf %10, %13 : vector<128x256xf32>
    %15 = math.exp %14 : vector<128x256xf32>
    %cst_4 = arith.constant dense<0.000000e+00> : vector<128xf32>
    %16 = vector.multi_reduction <add>, %15, %cst_4 [1] : vector<128x256xf32> to vector<128xf32>
    %17 = vector.shape_cast %16 : vector<128xf32> to vector<128x1xf32>
    %18 = arith.truncf %15 : vector<128x256xf32> to vector<128x256xbf16>
    %cst_5 = arith.constant dense<0.000000e+00> : vector<128x64xf32>
    %19 = tpu.matmul %18, %9, %cst_5 {dimension_numbers = #tpu.dot_dimension_numbers<[1], [0], [0], [1], [0, 0, 1, 1], [], []>} : vector<128x256xbf16>, vector<256x64xbf16>, vector<128x64xf32> -> vector<128x64xf32>
    %20 = tpu.reciprocal %17 {approx = true} : vector<128x1xf32> -> vector<128x1xf32>
    %21 = vector.broadcast %20 : vector<128x1xf32> to vector<128x64xf32>
    %22 = arith.mulf %19, %21 : vector<128x64xf32>
    %23 = arith.truncf %22 : vector<128x64xf32> to vector<128x64xbf16>
    %24 = vector.extract_strided_slice %6 {offsets = [0, 64], sizes = [128, 64], strides = [1, 1]} : vector<128x256xbf16> to vector<128x64xbf16>
    %c0_6 = arith.constant 0 : index
    %c320 = arith.constant 320 : index
    %25 = vector.load %arg8[%c0_6, %c320] : memref<256x768xbf16, #tpu.memory_space<vmem>>, vector<256x64xbf16>
    %c0_7 = arith.constant 0 : index
    %c576 = arith.constant 576 : index
    %26 = vector.load %arg8[%c0_7, %c576] : memref<256x768xbf16, #tpu.memory_space<vmem>>, vector<256x64xbf16>
    %cst_8 = arith.constant dense<0.000000e+00> : vector<128x256xf32>
    %27 = tpu.matmul %24, %25, %cst_8 {dimension_numbers = #tpu.dot_dimension_numbers<[1], [1], [0], [0], [0, 0, 1, 0], [], []>} : vector<128x64xbf16>, vector<256x64xbf16>, vector<128x256xf32> -> vector<128x256xf32>
    %cst_9 = arith.constant dense<0xFF800000> : vector<128xf32>
    %28 = vector.multi_reduction <maximumf>, %27, %cst_9 [1] : vector<128x256xf32> to vector<128xf32>
    %29 = vector.shape_cast %28 : vector<128xf32> to vector<128x1xf32>
    %30 = vector.broadcast %29 : vector<128x1xf32> to vector<128x256xf32>
    %31 = arith.subf %27, %30 : vector<128x256xf32>
    %32 = math.exp %31 : vector<128x256xf32>
    %cst_10 = arith.constant dense<0.000000e+00> : vector<128xf32>
    %33 = vector.multi_reduction <add>, %32, %cst_10 [1] : vector<128x256xf32> to vector<128xf32>
    %34 = vector.shape_cast %33 : vector<128xf32> to vector<128x1xf32>
    %35 = arith.truncf %32 : vector<128x256xf32> to vector<128x256xbf16>
    %cst_11 = arith.constant dense<0.000000e+00> : vector<128x64xf32>
    %36 = tpu.matmul %35, %26, %cst_11 {dimension_numbers = #tpu.dot_dimension_numbers<[1], [0], [0], [1], [0, 0, 1, 1], [], []>} : vector<128x256xbf16>, vector<256x64xbf16>, vector<128x64xf32> -> vector<128x64xf32>
    %37 = tpu.reciprocal %34 {approx = true} : vector<128x1xf32> -> vector<128x1xf32>
    %38 = vector.broadcast %37 : vector<128x1xf32> to vector<128x64xf32>
    %39 = arith.mulf %36, %38 : vector<128x64xf32>
    %40 = arith.truncf %39 : vector<128x64xf32> to vector<128x64xbf16>
    %41 = vector.extract_strided_slice %6 {offsets = [0, 128], sizes = [128, 64], strides = [1, 1]} : vector<128x256xbf16> to vector<128x64xbf16>
    %c0_12 = arith.constant 0 : index
    %c384 = arith.constant 384 : index
    %42 = vector.load %arg8[%c0_12, %c384] : memref<256x768xbf16, #tpu.memory_space<vmem>>, vector<256x64xbf16>
    %c0_13 = arith.constant 0 : index
    %c640 = arith.constant 640 : index
    %43 = vector.load %arg8[%c0_13, %c640] : memref<256x768xbf16, #tpu.memory_space<vmem>>, vector<256x64xbf16>
    %cst_14 = arith.constant dense<0.000000e+00> : vector<128x256xf32>
    %44 = tpu.matmul %41, %42, %cst_14 {dimension_numbers = #tpu.dot_dimension_numbers<[1], [1], [0], [0], [0, 0, 1, 0], [], []>} : vector<128x64xbf16>, vector<256x64xbf16>, vector<128x256xf32> -> vector<128x256xf32>
    %cst_15 = arith.constant dense<0xFF800000> : vector<128xf32>
    %45 = vector.multi_reduction <maximumf>, %44, %cst_15 [1] : vector<128x256xf32> to vector<128xf32>
    %46 = vector.shape_cast %45 : vector<128xf32> to vector<128x1xf32>
    %47 = vector.broadcast %46 : vector<128x1xf32> to vector<128x256xf32>
    %48 = arith.subf %44, %47 : vector<128x256xf32>
    %49 = math.exp %48 : vector<128x256xf32>
    %cst_16 = arith.constant dense<0.000000e+00> : vector<128xf32>
    %50 = vector.multi_reduction <add>, %49, %cst_16 [1] : vector<128x256xf32> to vector<128xf32>
    %51 = vector.shape_cast %50 : vector<128xf32> to vector<128x1xf32>
    %52 = arith.truncf %49 : vector<128x256xf32> to vector<128x256xbf16>
    %cst_17 = arith.constant dense<0.000000e+00> : vector<128x64xf32>
    %53 = tpu.matmul %52, %43, %cst_17 {dimension_numbers = #tpu.dot_dimension_numbers<[1], [0], [0], [1], [0, 0, 1, 1], [], []>} : vector<128x256xbf16>, vector<256x64xbf16>, vector<128x64xf32> -> vector<128x64xf32>
    %54 = tpu.reciprocal %51 {approx = true} : vector<128x1xf32> -> vector<128x1xf32>
    %55 = vector.broadcast %54 : vector<128x1xf32> to vector<128x64xf32>
    %56 = arith.mulf %53, %55 : vector<128x64xf32>
    %57 = arith.truncf %56 : vector<128x64xf32> to vector<128x64xbf16>
    %58 = vector.extract_strided_slice %6 {offsets = [0, 192], sizes = [128, 64], strides = [1, 1]} : vector<128x256xbf16> to vector<128x64xbf16>
    %c0_18 = arith.constant 0 : index
    %c448 = arith.constant 448 : index
    %59 = vector.load %arg8[%c0_18, %c448] : memref<256x768xbf16, #tpu.memory_space<vmem>>, vector<256x64xbf16>
    %c0_19 = arith.constant 0 : index
    %c704 = arith.constant 704 : index
    %60 = vector.load %arg8[%c0_19, %c704] : memref<256x768xbf16, #tpu.memory_space<vmem>>, vector<256x64xbf16>
    %cst_20 = arith.constant dense<0.000000e+00> : vector<128x256xf32>
    %61 = tpu.matmul %58, %59, %cst_20 {dimension_numbers = #tpu.dot_dimension_numbers<[1], [1], [0], [0], [0, 0, 1, 0], [], []>} : vector<128x64xbf16>, vector<256x64xbf16>, vector<128x256xf32> -> vector<128x256xf32>
    %cst_21 = arith.constant dense<0xFF800000> : vector<128xf32>
    %62 = vector.multi_reduction <maximumf>, %61, %cst_21 [1] : vector<128x256xf32> to vector<128xf32>
    %63 = vector.shape_cast %62 : vector<128xf32> to vector<128x1xf32>
    %64 = vector.broadcast %63 : vector<128x1xf32> to vector<128x256xf32>
    %65 = arith.subf %61, %64 : vector<128x256xf32>
    %66 = math.exp %65 : vector<128x256xf32>
    %cst_22 = arith.constant dense<0.000000e+00> : vector<128xf32>
    %67 = vector.multi_reduction <add>, %66, %cst_22 [1] : vector<128x256xf32> to vector<128xf32>
    %68 = vector.shape_cast %67 : vector<128xf32> to vector<128x1xf32>
    %69 = arith.truncf %66 : vector<128x256xf32> to vector<128x256xbf16>
    %cst_23 = arith.constant dense<0.000000e+00> : vector<128x64xf32>
    %70 = tpu.matmul %69, %60, %cst_23 {dimension_numbers = #tpu.dot_dimension_numbers<[1], [0], [0], [1], [0, 0, 1, 1], [], []>} : vector<128x256xbf16>, vector<256x64xbf16>, vector<128x64xf32> -> vector<128x64xf32>
    %71 = tpu.reciprocal %68 {approx = true} : vector<128x1xf32> -> vector<128x1xf32>
    %72 = vector.broadcast %71 : vector<128x1xf32> to vector<128x64xf32>
    %73 = arith.mulf %70, %72 : vector<128x64xf32>
    %74 = arith.truncf %73 : vector<128x64xf32> to vector<128x64xbf16>
    %75 = tpu.concatenate %23, %40, %57, %74 in 1 : vector<128x64xbf16>, vector<128x64xbf16>, vector<128x64xbf16>, vector<128x64xbf16> -> vector<128x256xbf16>
    %c0_24 = arith.constant 0 : index
    %c0_25 = arith.constant 0 : index
    %76 = vector.load %arg5[%c0_24, %c0_25] : memref<256x256xbf16, #tpu.memory_space<vmem>>, vector<256x256xbf16>
    %cst_26 = arith.constant dense<0.000000e+00> : vector<128x256xf32>
    %77 = tpu.matmul %75, %76, %cst_26 {dimension_numbers = #tpu.dot_dimension_numbers<[1], [0], [0], [1], [0, 0, 1, 1], [], []>} : vector<128x256xbf16>, vector<256x256xbf16>, vector<128x256xf32> -> vector<128x256xf32>
    %c0_27 = arith.constant 0 : index
    %c0_28 = arith.constant 0 : index
    %78 = vector.load %arg6[%c0_27, %c0_28] : memref<1x256xf32, #tpu.memory_space<vmem>>, vector<1x256xf32>
    %79 = vector.broadcast %78 : vector<1x256xf32> to vector<128x256xf32>
    %80 = arith.addf %77, %79 : vector<128x256xf32>
    %c0_29 = arith.constant 0 : index
    %c0_30 = arith.constant 0 : index
    %c0_31 = arith.constant 0 : index
    %81 = vector.load %arg7[%c0_29, %c0_30, %c0_31] : memref<1x128x256xf32, #tpu.memory_space<vmem>>, vector<1x128x256xf32>
    %82 = vector.shape_cast %81 : vector<1x128x256xf32> to vector<128x256xf32>
    %83 = vector.shape_cast %80 : vector<128x256xf32> to vector<1x128x256xf32>
    tpu.vector_store %arg7[%c0_29, %c0_30, %c0_31], %83 {strides = array<i32>} : memref<1x128x256xf32, #tpu.memory_space<vmem>>, vector<1x128x256xf32>,
    return
  }
  func.func @transform_0(%arg0: i32, %arg1: i32) -> (i32, i32, i32) {
    %c0_i32 = arith.constant 0 : i32
    %c0_i32_0 = arith.constant 0 : i32
    %c0_i32_1 = arith.constant 0 : i32
    return %arg0, %c0_i32, %c0_i32_0 : i32, i32, i32
  }
  func.func @transform_1(%arg0: i32, %arg1: i32) -> (i32, i32) {
    %c0_i32 = arith.constant 0 : i32
    %c0_i32_0 = arith.constant 0 : i32
    %c0_i32_1 = arith.constant 0 : i32
    return %c0_i32, %c0_i32_0 : i32, i32
  }
  func.func @transform_2(%arg0: i32, %arg1: i32) -> (i32, i32) {
    %c0_i32 = arith.constant 0 : i32
    %c0_i32_0 = arith.constant 0 : i32
    %c0_i32_1 = arith.constant 0 : i32
    return %c0_i32, %c0_i32_0 : i32, i32
  }
  func.func @transform_3(%arg0: i32, %arg1: i32) -> (i32, i32) {
    %c0_i32 = arith.constant 0 : i32
    %c0_i32_0 = arith.constant 0 : i32
    %c0_i32_1 = arith.constant 0 : i32
    return %c0_i32, %c0_i32_0 : i32, i32
  }
  func.func @transform_4(%arg0: i32, %arg1: i32) -> (i32, i32) {
    %c0_i32 = arith.constant 0 : i32
    %c0_i32_0 = arith.constant 0 : i32
    %c0_i32_1 = arith.constant 0 : i32
    return %c0_i32, %c0_i32_0 : i32, i32
  }
  func.func @transform_5(%arg0: i32, %arg1: i32) -> (i32, i32, i32) {
    %c0_i32 = arith.constant 0 : i32
    %c0_i32_0 = arith.constant 0 : i32
    return %arg0, %arg1, %c0_i32 : i32, i32, i32
  }
}

</mosaic_0001>

<bundles_post_ra>
// kernel: mha_forward.1
= control target key start
LH: loop header
LB: loop body
LE: loop exit
PB: predicated region body
PF: predicated region fallthrough
CT: control target
= control target key end

     0   :  { %s6284_s18 = smov 0   ;;  %s6286_s19 = smov 0   ;;  %s8904_s0 = inlined_call_operand.vmem [shape: bf16[2,256,256], index: 0, kind: input, shape index: {}]   ;;  %s8905_s1 = inlined_call_operand.vmem [shape: bf16[256,768], index: 1, kind: input, shape index: {}]   ;;  %s8906_s2 = inlined_call_operand.vmem [shape: f32[1,768], index: 2, kind: input, shape index: {}]   ;;  %s8907_s3 = inlined_call_operand.vmem [shape: bf16[256,256], index: 3, kind: input, shape index: {}]   ;;  %s8908_s4 = inlined_call_operand.vmem [shape: f32[1,256], index: 4, kind: input, shape index: {}]   ;;  %s8909_s5 = inlined_call_operand.vmem [shape: f32[2,256,256], index: 5, kind: output, shape index: {}]  }
   0x1   :  { %s6288_s20 = smov 0   ;;  %s6290_s21 = smov 0  }
   0x2   :  { %s6292_s22 = smov 0  }
   0x3 LB: > { %s24_s23 = sadd.s32 1, %s6243_s20  ;;  %s27_s24 = sadd.s32 1, %s6247_s21  ;;  %s6251_s22 = sphi %s6292_s22, %s15_s22   ;;  %s6247_s21 = sphi %s6290_s21, %s9192_s21   ;;  %s6243_s20 = sphi %s6288_s20, %s9191_s20   ;;  %s6239_s19 = sphi %s6286_s19, %s9190_s19   ;;  %s6235_s18 = sphi %s6284_s18, %s9189_s18  }
   0x4   : > { %p25_p0 = scmp.ge.s32.totalorder %s24_s23, 2  ;;  %p4862_p1 = scmp.ge.s32.totalorder %s6251_s22, 1 }
   0x5   : > { %p201_p2 = scmp.lt.s32.totalorder %s6251_s22, 5 }
   0x6   : > { %s9194_s23 = smov (%p25_p0, %s24_s23), 0  ;;  %s9196_s24 = smov (!%p25_p0, %s27_s24), %s6247_s21 }
   0x7   : > { %p202_p3 = pnand %p4862_p1, %p201_p2  ;;  %p29_p4 = scmp.ge.s32.totalorder %s9196_s24, 2 }
   0x9   : > { %s9198_s24 = smov (%p29_p4, %s9196_s24), 0  ;;  %205 = sbr.rel (%p202_p3) target bundleno = 2258 (0x8d2), region = 40 }
  0x10   : > { %p234_p5 = scmp.lt.s32.totalorder %s6239_s19, 1  ;;  %s4865_s25 = sshll.u32 %s6235_s18, 4 }
  0x11   : > { %p242_p6 = scmp.lt.s32.totalorder %s4865_s25, 31  ;;  %p4869_p7 = scmp.ne.s32.totalorder %s6235_s18, 0 }
  0x12   : > { %s9200_s19 = smov (!%p234_p5, %s6239_s19), 1  ;;  %v5589_v0 = vld [vmem:[%s8905_s1 + $0x4] ss:$24 sps:$4 sm:$0xff] (!%p4869_p7)   ;;  %v5591_v1 = vld [vmem:[%s8905_s1] ss:$24 sps:$4 sm:$0xff] (!%p4869_p7)  }
  0x13   : > { %s9202_s25 = smov (!%p242_p6, %s4865_s25), 31  ;;  %s5066_s26 = sshll.u32 %s9200_s19, 8  ;;  %1055 = vmatprep.subr.bf16.mxu0 (!%p4869_p7), %v5589_v0  ;;  %5452 = vmatprep.subr.bf16.mxu1 (!%p4869_p7), %v5589_v0  ;;  %v5592_v2 = vld [vmem:[%s8905_s1 + $0x34] ss:$24 sps:$4 sm:$0xff] (!%p4869_p7)   ;;  %v5594_v3 = vld [vmem:[%s8905_s1 + $0x30] ss:$24 sps:$4 sm:$0xff] (!%p4869_p7)  }
  0x14   : > { %s4867_s27 = sshll.u32 %s9200_s19, 6  ;;  %s6320_s30 = scalar_lea.vmem %s8904_s0, %s5066_s26  ;;  %1056 = vmatpush1.bf16.msra.mxu0 (!%p4869_p7), %v5591_v1  ;;  %5468 = vmatpush1.bf16.msra.mxu1 (!%p4869_p7), %v5591_v1  ;;  %v5595_v4 = vld [vmem:[%s8905_s1 + $0x64] ss:$24 sps:$4 sm:$0xff] (!%p4869_p7)   ;;  %v5597_v5 = vld [vmem:[%s8905_s1 + $0x60] ss:$24 sps:$4 sm:$0xff] (!%p4869_p7)  }
  0x15   : > { %s4866_s6 = sshll.u32 %s9202_s25, 1  ;;  %254 = sbr.rel (%p4869_p7) target bundleno = 487 (0x1e7), region = 44  ;;  %1057 = vmatprep.subr.bf16.mxu0 (!%p4869_p7), %v5592_v2  ;;  %5453 = vmatprep.subr.bf16.mxu1 (!%p4869_p7), %v5592_v2  ;;  %v5598_v6 = vld [vmem:[%s8905_s1 + $0x94] ss:$24 sps:$4 sm:$0xff] (!%p4869_p7)   ;;  %v5600_v7 = vld [vmem:[%s8905_s1 + $0x90] ss:$24 sps:$4 sm:$0xff] (!%p4869_p7)  }
  0x16   : > { %s246_s7 = sadd.s32 %s4867_s27, %s4866_s6  ;;  %v5601_v8 = vld [vmem:[%s8905_s1 + $0xc4] ss:$24 sps:$4 sm:$0xff] (!%p4869_p7)   ;;  %v5603_v9 = vld [vmem:[%s8905_s1 + $0xc0] ss:$24 sps:$4 sm:$0xff] (!%p4869_p7)   ;;  %v5604_v10 = vld [vmem:[%s8905_s1 + $0xf4] ss:$24 sps:$4 sm:$0xff] (!%p4869_p7)  }
  0x17   : > { %s4868_s8 = sshll.u32 %s246_s7, 3  ;;  %v5606_v11 = vld [vmem:[%s8905_s1 + $0xf0] ss:$24 sps:$4 sm:$0xff] (!%p4869_p7)   ;;  %v5607_v12 = vld [vmem:[%s8905_s1 + $0x124] ss:$24 sps:$4 sm:$0xff] (!%p4869_p7)  }
  0x18   : > { %s6325_s11 = scalar_lea.vmem %s8909_s5, %s4868_s8  ;;  %1058 = vmatpush1.bf16.msra.mxu0 (!%p4869_p7), %v5594_v3  ;;  %5469 = vmatpush1.bf16.msra.mxu1 (!%p4869_p7), %v5594_v3  ;;  %v6368_v13 = vld [vmem:[%s6320_s30 + $0x4] ss:$8 sps:$4 sm:$0xff] (!%p4869_p7)   ;;  %v5609_v14 = vld [vmem:[%s8905_s1 + $0x120] ss:$24 sps:$4 sm:$0xff] (!%p4869_p7)   ;;  %v5612_v17 = vld [vmem:[%s8905_s1 + $0x150] ss:$24 sps:$4 sm:$0xff] (!%p4869_p7)  }
  0x19   : > { %1059 = vmatprep.subr.bf16.mxu0 (!%p4869_p7), %v5595_v4  ;;  %5454 = vmatprep.subr.bf16.mxu1 (!%p4869_p7), %v5595_v4  ;;  %v6374_v15 = vld [vmem:[%s6320_s30 + $0x84] ss:$8 sps:$4 sm:$0xff] (!%p4869_p7)   ;;  %v5615_v19 = vld [vmem:[%s8905_s1 + $0x180] ss:$24 sps:$4 sm:$0xff] (!%p4869_p7)   ;;  %v5618_v21 = vld [vmem:[%s8905_s1 + $0x1b0] ss:$24 sps:$4 sm:$0xff] (!%p4869_p7)  }
  0x1a   : > { %v5610_v16 = vld [vmem:[%s8905_s1 + $0x154] ss:$24 sps:$4 sm:$0xff] (!%p4869_p7)   ;;  %1087 = vmatprep.mubr.bf16.mxu0 (!%p4869_p7), %v6368_v13  ;;  %1167 = vmatprep.mubr.bf16.mxu1 (!%p4869_p7), %v6374_v15  ;;  %v5613_v18 = vld [vmem:[%s8905_s1 + $0x184] ss:$24 sps:$4 sm:$0xff] (!%p4869_p7)   ;;  %v5621_v23 = vld [vmem:[%s8905_s1 + $0x1e0] ss:$24 sps:$4 sm:$0xff] (!%p4869_p7)  }
  0x1b   : > { %v5616_v20 = vld [vmem:[%s8905_s1 + $0x1b4] ss:$24 sps:$4 sm:$0xff] (!%p4869_p7)   ;;  %v5619_v22 = vld [vmem:[%s8905_s1 + $0x1e4] ss:$24 sps:$4 sm:$0xff] (!%p4869_p7)   ;;  %v5624_v25 = vld [vmem:[%s8905_s1 + $0x210] ss:$24 sps:$4 sm:$0xff] (!%p4869_p7)  }
  0x1c   : > { %1060 = vmatpush1.bf16.msra.mxu0 %v5597_v5  ;;  %5470 = vmatpush1.bf16.msra.mxu1 %v5597_v5  ;;  %v5622_v24 = vld [vmem:[%s8905_s1 + $0x214] ss:$24 sps:$4 sm:$0xff]   ;;  %v5625_v26 = vld [vmem:[%s8905_s1 + $0x244] ss:$24 sps:$4 sm:$0xff]   ;;  %v5627_v27 = vld [vmem:[%s8905_s1 + $0x240] ss:$24 sps:$4 sm:$0xff]  }
  0x1d   : > { %1061 = vmatprep.subr.bf16.mxu0 %v5598_v6  ;;  %5455 = vmatprep.subr.bf16.mxu1 %v5598_v6  ;;  %v5628_v28 = vld [vmem:[%s8905_s1 + $0x274] ss:$24 sps:$4 sm:$0xff]   ;;  %v5630_v29 = vld [vmem:[%s8905_s1 + $0x270] ss:$24 sps:$4 sm:$0xff]   ;;  %v5631_v30 = vld [vmem:[%s8905_s1 + $0x2a4] ss:$24 sps:$4 sm:$0xff]  }
  0x1e   : > { %v5633_v31 = vld [vmem:[%s8905_s1 + $0x2a0] ss:$24 sps:$4 sm:$0xff]   ;;  %v5634_v32 = vld [vmem:[%s8905_s1 + $0x2d4] ss:$24 sps:$4 sm:$0xff]   ;;  %v5636_v33 = vld [vmem:[%s8905_s1 + $0x2d0] ss:$24 sps:$4 sm:$0xff]  }
  0x1f   : > { %v5645_v34 = vld [vmem:[%s8905_s1 + $0xc] ss:$24 sps:$4 sm:$0xff]   ;;  %v6436_v35 = vld [vmem:[%s6320_s30] ss:$8 sps:$4 sm:$0xff]   ;;  %v5651_v40 = vld [vmem:[%s8905_s1 + $0x3c] ss:$24 sps:$4 sm:$0xff]  }
  0x20   : > { %1062 = vmatpush1.bf16.msra.mxu0 %v5600_v7  ;;  %5471 = vmatpush1.bf16.msra.mxu1 %v5600_v7  ;;  %v5648_v36 = vld [vmem:[%s8905_s1 + $0x14] ss:$24 sps:$4 sm:$0xff]   ;;  %v6442_v37 = vld [vmem:[%s6320_s30 + $0x80] ss:$8 sps:$4 sm:$0xff]   ;;  %v5654_v41 = vld [vmem:[%s8905_s1 + $0x44] ss:$24 sps:$4 sm:$0xff]  }
  0x21   : > { %1063 = vmatprep.subr.bf16.mxu0 %v5601_v8  ;;  %5456 = vmatprep.subr.bf16.mxu1 %v5601_v8  ;;  %v5643_v38 = vld [vmem:[%s8905_s1 + $0x8] ss:$24 sps:$4 sm:$0xff]   ;;  %v6457_v42 = vld [vmem:[%s6320_s30 + $0x14] ss:$8 sps:$4 sm:$0xff]   ;;  %v5649_v44 = vld [vmem:[%s8905_s1 + $0x38] ss:$24 sps:$4 sm:$0xff]  }
  0x22   : > { %v5646_v39 = vld [vmem:[%s8905_s1 + $0x10] ss:$24 sps:$4 sm:$0xff]   ;;  %v6460_v43 = vld [vmem:[%s6320_s30 + $0x94] ss:$8 sps:$4 sm:$0xff]   ;;  %v5652_v45 = vld [vmem:[%s8905_s1 + $0x40] ss:$24 sps:$4 sm:$0xff]  }
  0x23   : > { %v5663_v46 = vld [vmem:[%s8905_s1 + $0x6c] ss:$24 sps:$4 sm:$0xff]   ;;  %v6474_v47 = vld [vmem:[%s6320_s30 + $0x10] ss:$8 sps:$4 sm:$0xff]   ;;  %v5661_v50 = vld [vmem:[%s8905_s1 + $0x68] ss:$24 sps:$4 sm:$0xff]  }
  0x24   : > { %1064 = vmatpush1.bf16.msra.mxu0 %v5603_v9  ;;  %5472 = vmatpush1.bf16.msra.mxu1 %v5603_v9  ;;  %v5666_v48 = vld [vmem:[%s8905_s1 + $0x74] ss:$24 sps:$4 sm:$0xff]   ;;  %v6482_v49 = vld [vmem:[%s6320_s30 + $0x90] ss:$8 sps:$4 sm:$0xff]   ;;  %v5672_v53 = vld [vmem:[%s8905_s1 + $0xa4] ss:$24 sps:$4 sm:$0xff]  }
  0x25   : > { %1065 = vmatprep.subr.bf16.mxu0 %v5604_v10  ;;  %5457 = vmatprep.subr.bf16.mxu1 %v5604_v10  ;;  %v5664_v51 = vld [vmem:[%s8905_s1 + $0x70] ss:$24 sps:$4 sm:$0xff]   ;;  %v5669_v52 = vld [vmem:[%s8905_s1 + $0x9c] ss:$24 sps:$4 sm:$0xff]   ;;  %v6497_v54 = vld [vmem:[%s6320_s30 + $0x24] ss:$8 sps:$4 sm:$0xff]  }
  0x26   : > { %v6500_v55 = vld [vmem:[%s6320_s30 + $0xa4] ss:$8 sps:$4 sm:$0xff]   ;;  %v5667_v56 = vld [vmem:[%s8905_s1 + $0x98] ss:$24 sps:$4 sm:$0xff]   ;;  %v6514_v59 = vld [vmem:[%s6320_s30 + $0x20] ss:$8 sps:$4 sm:$0xff]  }
  0x27   : > { %v5670_v57 = vld [vmem:[%s8905_s1 + $0xa0] ss:$24 sps:$4 sm:$0xff]   ;;  %v5681_v58 = vld [vmem:[%s8905_s1 + $0xcc] ss:$24 sps:$4 sm:$0xff]   ;;  %v5682_v63 = vld [vmem:[%s8905_s1 + $0xd0] ss:$24 sps:$4 sm:$0xff]  }
  0x28   : > { %1066 = vmatpush1.bf16.msra.mxu0 %v5606_v11  ;;  %5473 = vmatpush1.bf16.msra.mxu1 %v5606_v11  ;;  %v5684_v60 = vld [vmem:[%s8905_s1 + $0xd4] ss:$24 sps:$4 sm:$0xff]   ;;  %v6522_v61 = vld [vmem:[%s6320_s30 + $0xa0] ss:$8 sps:$4 sm:$0xff]   ;;  %v5690_v1 = vld [vmem:[%s8905_s1 + $0x104] ss:$24 sps:$4 sm:$0xff]  }
  0x29   : > { %1067 = vmatprep.subr.bf16.mxu0 %v5607_v12  ;;  %5458 = vmatprep.subr.bf16.mxu1 %v5607_v12  ;;  %v5679_v62 = vld [vmem:[%s8905_s1 + $0xc8] ss:$24 sps:$4 sm:$0xff]   ;;  %v5687_v0 = vld [vmem:[%s8905_s1 + $0xfc] ss:$24 sps:$4 sm:$0xff]   ;;  %v5685_v4 = vld [vmem:[%s8905_s1 + $0xf8] ss:$24 sps:$4 sm:$0xff]  }
  0x2a   : > { %v6537_v2 = vld [vmem:[%s6320_s30 + $0x34] ss:$8 sps:$4 sm:$0xff]   ;;  %v5688_v5 = vld [vmem:[%s8905_s1 + $0x100] ss:$24 sps:$4 sm:$0xff]   ;;  %v5699_v6 = vld [vmem:[%s8905_s1 + $0x12c] ss:$24 sps:$4 sm:$0xff]  }
  0x2b   : > { %v6540_v3 = vld [vmem:[%s6320_s30 + $0xb4] ss:$8 sps:$4 sm:$0xff]   ;;  %v6559_v8 = vld [vmem:[%s6320_s30 + $0x30] ss:$8 sps:$4 sm:$0xff]   ;;  %v5697_v10 = vld [vmem:[%s8905_s1 + $0x128] ss:$24 sps:$4 sm:$0xff]  }
  0x2c   : > { %1068 = vmatpush1.bf16.msra.mxu0 %v5609_v14  ;;  %5474 = vmatpush1.bf16.msra.mxu1 %v5609_v14  ;;  %v5702_v7 = vld [vmem:[%s8905_s1 + $0x134] ss:$24 sps:$4 sm:$0xff]   ;;  %v6562_v9 = vld [vmem:[%s6320_s30 + $0xb0] ss:$8 sps:$4 sm:$0xff]   ;;  %v5708_v14 = vld [vmem:[%s8905_s1 + $0x164] ss:$24 sps:$4 sm:$0xff]  }
  0x2d   : > { %1069 = vmatprep.subr.bf16.mxu0 %v5610_v16  ;;  %5459 = vmatprep.subr.bf16.mxu1 %v5610_v16  ;;  %v5700_v11 = vld [vmem:[%s8905_s1 + $0x130] ss:$24 sps:$4 sm:$0xff]   ;;  %v5705_v12 = vld [vmem:[%s8905_s1 + $0x15c] ss:$24 sps:$4 sm:$0xff]   ;;  %v6577_v16 = vld [vmem:[%s6320_s30 + $0x44] ss:$8 sps:$4 sm:$0xff]  }
  0x30   : > { %1070 = vmatpush1.bf16.msra.mxu0 %v5612_v17  ;;  %5475 = vmatpush1.bf16.msra.mxu1 %v5612_v17  ;;  %v6580_v17 = vld [vmem:[%s6320_s30 + $0xc4] ss:$8 sps:$4 sm:$0xff]  }
  0x31   : > { %1071 = vmatprep.subr.bf16.mxu0 %v5613_v18  ;;  %5460 = vmatprep.subr.bf16.mxu1 %v5613_v18  ;;  %v5703_v18 = vld [vmem:[%s8905_s1 + $0x158] ss:$24 sps:$4 sm:$0xff]  }
  0x34   : > { %1072 = vmatpush1.bf16.msra.mxu0 %v5615_v19  ;;  %5476 = vmatpush1.bf16.msra.mxu1 %v5615_v19  ;;  %v5706_v19 = vld [vmem:[%s8905_s1 + $0x160] ss:$24 sps:$4 sm:$0xff]  }
  0x35   : > { %1073 = vmatprep.subr.bf16.mxu0 %v5616_v20  ;;  %5461 = vmatprep.subr.bf16.mxu1 %v5616_v20  ;;  %v5717_v20 = vld [vmem:[%s8905_s1 + $0x18c] ss:$24 sps:$4 sm:$0xff]  }
  0x38   : > { %1074 = vmatpush1.bf16.msra.mxu0 %v5618_v21  ;;  %5477 = vmatpush1.bf16.msra.mxu1 %v5618_v21  ;;  %v5720_v21 = vld [vmem:[%s8905_s1 + $0x194] ss:$24 sps:$4 sm:$0xff]  }
  0x39   : > { %1075 = vmatprep.subr.bf16.mxu0 %v5619_v22  ;;  %5462 = vmatprep.subr.bf16.mxu1 %v5619_v22  ;;  %v6599_v22 = vld [vmem:[%s6320_s30 + $0x40] ss:$8 sps:$4 sm:$0xff]  }
  0x3c   : > { %1076 = vmatpush1.bf16.msra.mxu0 %v5621_v23  ;;  %5478 = vmatpush1.bf16.msra.mxu1 %v5621_v23  ;;  %v6602_v23 = vld [vmem:[%s6320_s30 + $0xc0] ss:$8 sps:$4 sm:$0xff]  }
  0x3d   : > { %1077 = vmatprep.subr.bf16.mxu0 %v5622_v24  ;;  %5463 = vmatprep.subr.bf16.mxu1 %v5622_v24  ;;  %v5715_v24 = vld [vmem:[%s8905_s1 + $0x188] ss:$24 sps:$4 sm:$0xff]  }
  0x40   : > { %1078 = vmatpush1.bf16.msra.mxu0 %v5624_v25  ;;  %5479 = vmatpush1.bf16.msra.mxu1 %v5624_v25  ;;  %v5718_v25 = vld [vmem:[%s8905_s1 + $0x190] ss:$24 sps:$4 sm:$0xff]  }
  0x41   : > { %1079 = vmatprep.subr.bf16.mxu0 %v5625_v26  ;;  %5464 = vmatprep.subr.bf16.mxu1 %v5625_v26  ;;  %v5723_v26 = vld [vmem:[%s8905_s1 + $0x1bc] ss:$24 sps:$4 sm:$0xff]  }
  0x44   : > { %1080 = vmatpush1.bf16.msra.mxu0 %v5627_v27  ;;  %5480 = vmatpush1.bf16.msra.mxu1 %v5627_v27  ;;  %v5726_v27 = vld [vmem:[%s8905_s1 + $0x1c4] ss:$24 sps:$4 sm:$0xff]  }
  0x45   : > { %1081 = vmatprep.subr.bf16.mxu0 %v5628_v28  ;;  %5465 = vmatprep.subr.bf16.mxu1 %v5628_v28  ;;  %v6617_v28 = vld [vmem:[%s6320_s30 + $0x54] ss:$8 sps:$4 sm:$0xff]  }
  0x48   : > { %1082 = vmatpush1.bf16.msra.mxu0 %v5630_v29  ;;  %5481 = vmatpush1.bf16.msra.mxu1 %v5630_v29  ;;  %v6620_v29 = vld [vmem:[%s6320_s30 + $0xd4] ss:$8 sps:$4 sm:$0xff]  }
  0x49   : > { %1083 = vmatprep.subr.bf16.mxu0 %v5631_v30  ;;  %5466 = vmatprep.subr.bf16.mxu1 %v5631_v30  ;;  %v5721_v30 = vld [vmem:[%s8905_s1 + $0x1b8] ss:$24 sps:$4 sm:$0xff]  }
  0x4c   : > { %1084 = vmatpush1.bf16.msra.mxu0 %v5633_v31  ;;  %5482 = vmatpush1.bf16.msra.mxu1 %v5633_v31  ;;  %v5724_v31 = vld [vmem:[%s8905_s1 + $0x1c0] ss:$24 sps:$4 sm:$0xff]  }
  0x4d   : > { %1085 = vmatprep.subr.bf16.mxu0 %v5634_v32  ;;  %5467 = vmatprep.subr.bf16.mxu1 %v5634_v32  ;;  %v5735_v32 = vld [vmem:[%s8905_s1 + $0x1ec] ss:$24 sps:$4 sm:$0xff]  }
  0x50   : > { %1086 = vmatpush1.bf16.msra.mxu0 %v5636_v33  ;;  %5483 = vmatpush1.bf16.msra.mxu1 %v5636_v33  ;;  %v5738_v33 = vld [vmem:[%s8905_s1 + $0x1f4] ss:$24 sps:$4 sm:$0xff]  }
  0x51   : > { %1248 = vmatprep.subr.bf16.mxu1 %v5645_v34  ;;  %1441 = vmatprep.subr.bf16.mxu0 %v5648_v36  ;;  %v6639_v34 = vld [vmem:[%s6320_s30 + $0x50] ss:$8 sps:$4 sm:$0xff]  }
  0x52   : > { %v6642_v36 = vld [vmem:[%s6320_s30 + $0xd0] ss:$8 sps:$4 sm:$0xff]  }
  0x53   : > { %1088 = vmatmul.mubr.bf16.vlgmr.msra.gmra.mrb[0].mxu0 %v6436_v35  ;;  %1168 = vmatmul.mubr.bf16.vlgmr.msra.gmra.mrb[0].mxu1 %v6442_v37 }
  0x54   : > { %1249 = vmatpush1.bf16.msra.mxu1 %v5643_v38  ;;  %1442 = vmatpush1.bf16.msra.mxu0 %v5646_v39  ;;  %v5733_v38 = vld [vmem:[%s8905_s1 + $0x1e8] ss:$24 sps:$4 sm:$0xff]  }
  0x55   : > { %1250 = vmatprep.subr.bf16.mxu1 %v5651_v40  ;;  %1443 = vmatprep.subr.bf16.mxu0 %v5654_v41  ;;  %v5736_v39 = vld [vmem:[%s8905_s1 + $0x1f0] ss:$24 sps:$4 sm:$0xff]   ;;  %v5741_v40 = vld [vmem:[%s8905_s1 + $0x21c] ss:$24 sps:$4 sm:$0xff]  }
  0x56   : > { %1097 = vmatprep.mubr.bf16.mxu0 %v6457_v42  ;;  %1177 = vmatprep.mubr.bf16.mxu1 %v6460_v43  ;;  %v5744_v41 = vld [vmem:[%s8905_s1 + $0x224] ss:$24 sps:$4 sm:$0xff]  }
  0x58   : > { %1251 = vmatpush1.bf16.msra.mxu1 %v5649_v44  ;;  %1444 = vmatpush1.bf16.msra.mxu0 %v5652_v45  ;;  %v6657_v44 = vld [vmem:[%s6320_s30 + $0x64] ss:$8 sps:$4 sm:$0xff]  }
  0x59   : > { %1252 = vmatprep.subr.bf16.mxu1 %v5663_v46  ;;  %1445 = vmatprep.subr.bf16.mxu0 %v5666_v48  ;;  %v6660_v45 = vld [vmem:[%s6320_s30 + $0xe4] ss:$8 sps:$4 sm:$0xff]   ;;  %v5739_v46 = vld [vmem:[%s8905_s1 + $0x218] ss:$24 sps:$4 sm:$0xff]  }
  0x5a   : > { %v5742_v48 = vld [vmem:[%s8905_s1 + $0x220] ss:$24 sps:$4 sm:$0xff]  }
  0x5b   : > { %1098 = vmatmul.mubr.bf16.gmra.mrb[4].mxu0 %v6474_v47  ;;  %1178 = vmatmul.mubr.bf16.gmra.mrb[4].mxu1 %v6482_v49 }
  0x5c   : > { %1253 = vmatpush1.bf16.msra.mxu1 %v5661_v50  ;;  %1446 = vmatpush1.bf16.msra.mxu0 %v5664_v51  ;;  %v5753_v50 = vld [vmem:[%s8905_s1 + $0x24c] ss:$24 sps:$4 sm:$0xff]  }
  0x5d   : > { %1254 = vmatprep.subr.bf16.mxu1 %v5669_v52  ;;  %1447 = vmatprep.subr.bf16.mxu0 %v5672_v53  ;;  %v5756_v51 = vld [vmem:[%s8905_s1 + $0x254] ss:$24 sps:$4 sm:$0xff]   ;;  %v6679_v52 = vld [vmem:[%s6320_s30 + $0x60] ss:$8 sps:$4 sm:$0xff]  }
  0x5e   : > { %1107 = vmatprep.mubr.bf16.mxu0 %v6497_v54  ;;  %1187 = vmatprep.mubr.bf16.mxu1 %v6500_v55  ;;  %v6682_v53 = vld [vmem:[%s6320_s30 + $0xe0] ss:$8 sps:$4 sm:$0xff]  }
  0x60   : > { %1255 = vmatpush1.bf16.msra.mxu1 %v5667_v56  ;;  %1448 = vmatpush1.bf16.msra.mxu0 %v5670_v57  ;;  %v5751_v56 = vld [vmem:[%s8905_s1 + $0x248] ss:$24 sps:$4 sm:$0xff]  }
  0x61   : > { %1256 = vmatprep.subr.bf16.mxu1 %v5681_v58  ;;  %1449 = vmatprep.subr.bf16.mxu0 %v5684_v60  ;;  %v5754_v57 = vld [vmem:[%s8905_s1 + $0x250] ss:$24 sps:$4 sm:$0xff]   ;;  %v5759_v58 = vld [vmem:[%s8905_s1 + $0x27c] ss:$24 sps:$4 sm:$0xff]  }
  0x62   : > { %v5762_v60 = vld [vmem:[%s8905_s1 + $0x284] ss:$24 sps:$4 sm:$0xff]  }
  0x63   : > { %1108 = vmatmul.mubr.bf16.gmra.mrb[8].mxu0 %v6514_v59  ;;  %1188 = vmatmul.mubr.bf16.gmra.mrb[8].mxu1 %v6522_v61 }
  0x64   : > { %1257 = vmatpush1.bf16.msra.mxu1 %v5679_v62  ;;  %1450 = vmatpush1.bf16.msra.mxu0 %v5682_v63  ;;  %v5763_v62 = vld [vmem:[%s6320_s30 + $0x74] ss:$8 sps:$4 sm:$0xff]  }
  0x65   : > { %1258 = vmatprep.subr.bf16.mxu1 %v5687_v0  ;;  %1451 = vmatprep.subr.bf16.mxu0 %v5690_v1  ;;  %v6698_v63 = vld [vmem:[%s6320_s30 + $0xf4] ss:$8 sps:$4 sm:$0xff]   ;;  %v5757_v0 = vld [vmem:[%s8905_s1 + $0x278] ss:$24 sps:$4 sm:$0xff]  }
  0x66   : > { %1117 = vmatprep.mubr.bf16.mxu0 %v6537_v2  ;;  %1197 = vmatprep.mubr.bf16.mxu1 %v6540_v3  ;;  %v5760_v1 = vld [vmem:[%s8905_s1 + $0x280] ss:$24 sps:$4 sm:$0xff]  }
  0x68   : > { %1259 = vmatpush1.bf16.msra.mxu1 %v5685_v4  ;;  %1452 = vmatpush1.bf16.msra.mxu0 %v5688_v5  ;;  %v5771_v4 = vld [vmem:[%s8905_s1 + $0x2ac] ss:$24 sps:$4 sm:$0xff]  }
  0x69   : > { %1260 = vmatprep.subr.bf16.mxu1 %v5699_v6  ;;  %1453 = vmatprep.subr.bf16.mxu0 %v5702_v7  ;;  %v5774_v5 = vld [vmem:[%s8905_s1 + $0x2b4] ss:$24 sps:$4 sm:$0xff]   ;;  %v5767_v6 = vld [vmem:[%s6320_s30 + $0x70] ss:$8 sps:$4 sm:$0xff]  }
  0x6a   : > { %v6717_v7 = vld [vmem:[%s6320_s30 + $0xf0] ss:$8 sps:$4 sm:$0xff]  }
  0x6b   : > { %1118 = vmatmul.mubr.bf16.gmra.mrb[12].mxu0 %v6559_v8  ;;  %1198 = vmatmul.mubr.bf16.gmra.mrb[12].mxu1 %v6562_v9 }
  0x6c   : > { %1261 = vmatpush1.bf16.msra.mxu1 %v5697_v10  ;;  %1454 = vmatpush1.bf16.msra.mxu0 %v5700_v11  ;;  %v5769_v10 = vld [vmem:[%s8905_s1 + $0x2a8] ss:$24 sps:$4 sm:$0xff]  }
  0x6d   : > { %1262 = vmatprep.subr.bf16.mxu1 %v5705_v12  ;;  %1455 = vmatprep.subr.bf16.mxu0 %v5708_v14  ;;  %v5772_v11 = vld [vmem:[%s8905_s1 + $0x2b0] ss:$24 sps:$4 sm:$0xff]   ;;  %v5777_v12 = vld [vmem:[%s8905_s1 + $0x2dc] ss:$24 sps:$4 sm:$0xff]  }
  0x6e   : > { %1127 = vmatprep.mubr.bf16.mxu0 %v6577_v16  ;;  %1207 = vmatprep.mubr.bf16.mxu1 %v6580_v17  ;;  %v5780_v14 = vld [vmem:[%s8905_s1 + $0x2e4] ss:$24 sps:$4 sm:$0xff]  }
  0x70   : > { %1263 = vmatpush1.bf16.msra.mxu1 %v5703_v18  ;;  %1456 = vmatpush1.bf16.msra.mxu0 %v5706_v19  ;;  %v5775_v18 = vld [vmem:[%s8905_s1 + $0x2d8] ss:$24 sps:$4 sm:$0xff]  }
  0x71   : > { %1264 = vmatprep.subr.bf16.mxu1 %v5717_v20  ;;  %1457 = vmatprep.subr.bf16.mxu0 %v5720_v21  ;;  %v5778_v19 = vld [vmem:[%s8905_s1 + $0x2e0] ss:$24 sps:$4 sm:$0xff]  }
  0x73   : > { %1128 = vmatmul.mubr.bf16.gmra.mrb[16].mxu0 %v6599_v22  ;;  %1208 = vmatmul.mubr.bf16.gmra.mrb[16].mxu1 %v6602_v23 }
  0x74   : > { %1265 = vmatpush1.bf16.msra.mxu1 %v5715_v24  ;;  %1458 = vmatpush1.bf16.msra.mxu0 %v5718_v25 }
  0x75   : > { %1266 = vmatprep.subr.bf16.mxu1 %v5723_v26  ;;  %1459 = vmatprep.subr.bf16.mxu0 %v5726_v27 }
  0x76   : > { %1137 = vmatprep.mubr.bf16.mxu0 %v6617_v28  ;;  %1217 = vmatprep.mubr.bf16.mxu1 %v6620_v29 }
  0x78   : > { %1267 = vmatpush1.bf16.msra.mxu1 %v5721_v30  ;;  %1460 = vmatpush1.bf16.msra.mxu0 %v5724_v31 }
  0x79   : > { %1268 = vmatprep.subr.bf16.mxu1 %v5735_v32  ;;  %1461 = vmatprep.subr.bf16.mxu0 %v5738_v33 }
  0x7b   : > { %1138 = vmatmul.mubr.bf16.gmra.mrb[20].mxu0 %v6639_v34  ;;  %1218 = vmatmul.mubr.bf16.gmra.mrb[20].mxu1 %v6642_v36 }
  0x7c   : > { %1269 = vmatpush1.bf16.msra.mxu1 %v5733_v38  ;;  %1462 = vmatpush1.bf16.msra.mxu0 %v5736_v39 }
  0x7d   : > { %1270 = vmatprep.subr.bf16.mxu1 %v5741_v40  ;;  %1463 = vmatprep.subr.bf16.mxu0 %v5744_v41 }
  0x7e   : > { %1147 = vmatprep.mubr.bf16.mxu0 %v6657_v44  ;;  %1227 = vmatprep.mubr.bf16.mxu1 %v6660_v45 }
  0x80   : > { %1271 = vmatpush1.bf16.msra.mxu1 %v5739_v46  ;;  %1464 = vmatpush1.bf16.msra.mxu0 %v5742_v48 }
  0x81   : > { %1272 = vmatprep.subr.bf16.mxu1 %v5753_v50  ;;  %1465 = vmatprep.subr.bf16.mxu0 %v5756_v51 }
  0x83   : > { %1148 = vmatmul.mubr.bf16.gmra.mrb[24].mxu0 %v6679_v52  ;;  %1228 = vmatmul.mubr.bf16.gmra.mrb[24].mxu1 %v6682_v53 }
  0x84   : > { %1273 = vmatpush1.bf16.msra.mxu1 %v5751_v56  ;;  %1466 = vmatpush1.bf16.msra.mxu0 %v5754_v57 }
  0x85   : > { %1274 = vmatprep.subr.bf16.mxu1 %v5759_v58  ;;  %1467 = vmatprep.subr.bf16.mxu0 %v5762_v60 }
  0x86   : > { %1157 = vmatprep.mubr.bf16.mxu0 %v5763_v62  ;;  %1237 = vmatprep.mubr.bf16.mxu1 %v6698_v63 }
  0x88   : > { %1275 = vmatpush1.bf16.msra.mxu1 %v5757_v0  ;;  %1468 = vmatpush1.bf16.msra.mxu0 %v5760_v1 }
  0x89   : > { %1276 = vmatprep.subr.bf16.mxu1 %v5771_v4  ;;  %1469 = vmatprep.subr.bf16.mxu0 %v5774_v5 }
  0x8b   : > { %1158 = vmatmul.mubr.bf16.gmra.mrb[28].mxu0 %v5767_v6  ;;  %1238 = vmatmul.mubr.bf16.gmra.mrb[28].mxu1 %v6717_v7 }
  0x8c   : > { %1277 = vmatpush1.bf16.msra.mxu1 %v5769_v10  ;;  %1470 = vmatpush1.bf16.msra.mxu0 %v5772_v11 }
  0x8d   : > { %1278 = vmatprep.subr.bf16.mxu1 %v5777_v12  ;;  %1471 = vmatprep.subr.bf16.mxu0 %v5780_v14 }
  0x8e   : > { %1280 = vmatprep.mubr.bf16.mxu1 %v6368_v13  ;;  %1473 = vmatprep.mubr.bf16.mxu0 %v6368_v13  ;;  %v385_v13 = vlaneseq }
  0x90   : > { %1279 = vmatpush1.bf16.msra.mxu1 %v5775_v18  ;;  %1472 = vmatpush1.bf16.msra.mxu0 %v5778_v19 }
  0x93   : > { %1281 = vmatmul.mubr.bf16.vlgmr.msra.gmra.mrb[32].mxu1 %v6436_v35  ;;  %1474 = vmatmul.mubr.bf16.vlgmr.msra.gmra.mrb[32].mxu0 %v6436_v35 }
  0x94   : > { %1290 = vmatprep.mubr.bf16.mxu1 %v6457_v42  ;;  %1483 = vmatprep.mubr.bf16.mxu0 %v6457_v42 }
  0x9b   : > { %1291 = vmatmul.mubr.bf16.gmra.mrb[36].mxu1 %v6474_v47  ;;  %1484 = vmatmul.mubr.bf16.gmra.mrb[36].mxu0 %v6474_v47 }
  0x9c   : > { %1300 = vmatprep.mubr.bf16.mxu1 %v6497_v54  ;;  %1493 = vmatprep.mubr.bf16.mxu0 %v6497_v54 }
  0xa3   : > { %1301 = vmatmul.mubr.bf16.gmra.mrb[40].mxu1 %v6514_v59  ;;  %1494 = vmatmul.mubr.bf16.gmra.mrb[40].mxu0 %v6514_v59 }
  0xa4   : > { %1310 = vmatprep.mubr.bf16.mxu1 %v6537_v2  ;;  %1503 = vmatprep.mubr.bf16.mxu0 %v6537_v2 }
  0xab   : > { %1311 = vmatmul.mubr.bf16.gmra.mrb[44].mxu1 %v6559_v8  ;;  %1504 = vmatmul.mubr.bf16.gmra.mrb[44].mxu0 %v6559_v8 }
  0xac   : > { %1320 = vmatprep.mubr.bf16.mxu1 %v6577_v16  ;;  %1513 = vmatprep.mubr.bf16.mxu0 %v6577_v16 }
  0xb3   : > { %1321 = vmatmul.mubr.bf16.gmra.mrb[48].mxu1 %v6599_v22  ;;  %1514 = vmatmul.mubr.bf16.gmra.mrb[48].mxu0 %v6599_v22 }
  0xb4   : > { %1330 = vmatprep.mubr.bf16.mxu1 %v6617_v28  ;;  %1523 = vmatprep.mubr.bf16.mxu0 %v6617_v28 }
  0xbb   : > { %1331 = vmatmul.mubr.bf16.gmra.mrb[52].mxu1 %v6639_v34  ;;  %1524 = vmatmul.mubr.bf16.gmra.mrb[52].mxu0 %v6639_v34 }
  0xbc   : > { %1340 = vmatprep.mubr.bf16.mxu1 %v6657_v44  ;;  %1533 = vmatprep.mubr.bf16.mxu0 %v6657_v44 }
  0xc3   : > { %1341 = vmatmul.mubr.bf16.gmra.mrb[56].mxu1 %v6679_v52  ;;  %1534 = vmatmul.mubr.bf16.gmra.mrb[56].mxu0 %v6679_v52 }
  0xc4   : > { %1350 = vmatprep.mubr.bf16.mxu1 %v5763_v62  ;;  %1543 = vmatprep.mubr.bf16.mxu0 %v5763_v62 }
  0xcb   : > { %1351 = vmatmul.mubr.bf16.gmra.mrb[60].mxu1 %v5767_v6  ;;  %1544 = vmatmul.mubr.bf16.gmra.mrb[60].mxu0 %v5767_v6 }
  0xcc   : > { %1360 = vmatprep.mubr.bf16.mxu1 %v6374_v15  ;;  %1553 = vmatprep.mubr.bf16.mxu0 %v6374_v15  ;;  %v6798_v15 = vshrl.u32 %v385_v13, 7 }
  0xce   : > { %v387_v35 = vsub.s32 0, %v6798_v15  ;;  %v391_v42 = vsub.s32 1, %v6798_v15 }
  0xd3   : > { %1361 = vmatmul.mubr.bf16.gmra.mrb[64].mxu1 %v6442_v37  ;;  %1554 = vmatmul.mubr.bf16.gmra.mrb[64].mxu0 %v6442_v37  ;;  %v6804_v37 = vld [vmem:[%s8906_s2] sm:$0x3f] }
  0xd4   : > { %1370 = vmatprep.mubr.bf16.mxu1 %v6460_v43  ;;  %1563 = vmatprep.mubr.bf16.mxu0 %v6460_v43  ;;  %v6808_v43 = vrot.slane %v6804_v37, %v387_v35  ;;  %v6811_v54 = vrot.slane %v6804_v37, %v391_v42 }
  0xdb   : > { %1371 = vmatmul.mubr.bf16.gmra.mrb[68].mxu1 %v6482_v49  ;;  %1564 = vmatmul.mubr.bf16.gmra.mrb[68].mxu0 %v6482_v49 }
  0xdc   : > { %1380 = vmatprep.mubr.bf16.mxu1 %v6500_v55  ;;  %1573 = vmatprep.mubr.bf16.mxu0 %v6500_v55 }
  0xe3   : > { %1381 = vmatmul.mubr.bf16.gmra.mrb[72].mxu1 %v6522_v61  ;;  %1574 = vmatmul.mubr.bf16.gmra.mrb[72].mxu0 %v6522_v61 }
  0xe4   : > { %1390 = vmatprep.mubr.bf16.mxu1 %v6540_v3  ;;  %1583 = vmatprep.mubr.bf16.mxu0 %v6540_v3 }
  0xeb   : > { %1391 = vmatmul.mubr.bf16.gmra.mrb[76].mxu1 %v6562_v9  ;;  %1584 = vmatmul.mubr.bf16.gmra.mrb[76].mxu0 %v6562_v9 }
  0xec   : > { %1400 = vmatprep.mubr.bf16.mxu1 %v6580_v17  ;;  %1593 = vmatprep.mubr.bf16.mxu0 %v6580_v17 }
  0xf3   : > { %1401 = vmatmul.mubr.bf16.gmra.mrb[80].mxu1 %v6602_v23  ;;  %1594 = vmatmul.mubr.bf16.gmra.mrb[80].mxu0 %v6602_v23 }
  0xf4   : > { %1410 = vmatprep.mubr.bf16.mxu1 %v6620_v29  ;;  %1603 = vmatprep.mubr.bf16.mxu0 %v6620_v29 }
  0xfb   : > { %1411 = vmatmul.mubr.bf16.gmra.mrb[84].mxu1 %v6642_v36  ;;  %1604 = vmatmul.mubr.bf16.gmra.mrb[84].mxu0 %v6642_v36 }
  0xfc   : > { %1420 = vmatprep.mubr.bf16.mxu1 %v6660_v45  ;;  %1613 = vmatprep.mubr.bf16.mxu0 %v6660_v45 }
 0x103   : > { %1421 = vmatmul.mubr.bf16.gmra.mrb[88].mxu1 %v6682_v53  ;;  %1614 = vmatmul.mubr.bf16.gmra.mrb[88].mxu0 %v6682_v53 }
 0x104   : > { %1430 = vmatprep.mubr.bf16.mxu1 %v6698_v63  ;;  %1623 = vmatprep.mubr.bf16.mxu0 %v6698_v63 }
 0x10b   : > { %1431 = vmatmul.mubr.bf16.gmra.mrb[92].mxu1 %v6717_v7  ;;  %1624 = vmatmul.mubr.bf16.gmra.mrb[92].mxu0 %v6717_v7 }
 0x126   : > { %v1089_v47 = vpop.f32.mrb[0].mxu0  ;;  %v1169_v49 = vpop.f32.mrb[0].mxu1 }
 0x127   : > { %v1091_v55 = vpop.f32.mrb[1].mxu0  ;;  %v1171_v59 = vpop.f32.mrb[1].mxu1  ;;  %v1090_v3 = vadd.f32 %v1089_v47, %v6808_v43  ;;  %v1170_v8 = vadd.f32 %v1169_v49, %v6808_v43 }
 0x128   : > { %v1093_v61 = vpop.f32.mrb[2].mxu0  ;;  %v1173_v2 = vpop.f32.mrb[2].mxu1  ;;  %v1092_v21 = vadd.f32 %v1091_v55, %v6811_v54  ;;  %v1172_v22 = vadd.f32 %v1171_v59, %v6811_v54 }
 0x129   : > { %v1094_v9 = vadd.f32 %v1093_v61, %v6808_v43  ;;  %v1174_v16 = vadd.f32 %v1173_v2, %v6808_v43  ;;  %v1095_v17 = vpop.f32.mrb[3].mxu0  ;;  %v1175_v20 = vpop.f32.mrb[3].mxu1 }
 0x12a   : > { %v1096_v23 = vadd.f32 %v1095_v17, %v6811_v54  ;;  %v1176_v24 = vadd.f32 %v1175_v20, %v6811_v54 }
 0x12b   : > { %v1634_v25 = vpack.c.bf16 %v1094_v9, %v1090_v3  ;;  %v1682_v26 = vpack.c.bf16 %v1174_v16, %v1170_v8 }
 0x12c   : > { %v1635_v27 = vpack.c.bf16 %v1096_v23, %v1092_v21  ;;  %v1683_v28 = vpack.c.bf16 %v1176_v24, %v1172_v22 }
 0x12d   : > { %1730 = vst [vmem:[#allocation2] sm:$0xff] %v1634_v25  ;;  %1778 = vst [vmem:[#allocation2 + $0x180] sm:$0xff] %v1682_v26 }
 0x12e   : > { %1731 = vst [vmem:[#allocation2 + $0x8] sm:$0xff] %v1635_v27  ;;  %1779 = vst [vmem:[#allocation2 + $0x188] sm:$0xff] %v1683_v28  ;;  %v1099_v29 = vpop.f32.mrb[4].mxu0  ;;  %v1179_v30 = vpop.f32.mrb[4].mxu1 }
 0x12f   : > { %v1101_v31 = vpop.f32.mrb[5].mxu0  ;;  %v1181_v32 = vpop.f32.mrb[5].mxu1  ;;  %v1100_v36 = vadd.f32 %v1099_v29, %v6808_v43  ;;  %v1180_v38 = vadd.f32 %v1179_v30, %v6808_v43 }
 0x130   : > { %v1103_v33 = vpop.f32.mrb[6].mxu0  ;;  %v1183_v34 = vpop.f32.mrb[6].mxu1  ;;  %v1102_v45 = vadd.f32 %v1101_v31, %v6811_v54  ;;  %v1182_v46 = vadd.f32 %v1181_v32, %v6811_v54 }
 0x131   : > { %v1104_v39 = vadd.f32 %v1103_v33, %v6808_v43  ;;  %v1184_v40 = vadd.f32 %v1183_v34, %v6808_v43  ;;  %v1105_v41 = vpop.f32.mrb[7].mxu0  ;;  %v1185_v44 = vpop.f32.mrb[7].mxu1 }
 0x132   : > { %v1106_v48 = vadd.f32 %v1105_v41, %v6811_v54  ;;  %v1186_v50 = vadd.f32 %v1185_v44, %v6811_v54 }
 0x133   : > { %v1640_v51 = vpack.c.bf16 %v1104_v39, %v1100_v36  ;;  %v1688_v52 = vpack.c.bf16 %v1184_v40, %v1180_v38 }
 0x134   : > { %v1641_v53 = vpack.c.bf16 %v1106_v48, %v1102_v45  ;;  %v1689_v56 = vpack.c.bf16 %v1186_v50, %v1182_v46 }
 0x135   : > { %1736 = vst [vmem:[#allocation2 + $0x30] sm:$0xff] %v1640_v51  ;;  %1784 = vst [vmem:[#allocation2 + $0x1b0] sm:$0xff] %v1688_v52 }
 0x136   : > { %1737 = vst [vmem:[#allocation2 + $0x38] sm:$0xff] %v1641_v53  ;;  %1785 = vst [vmem:[#allocation2 + $0x1b8] sm:$0xff] %v1689_v56  ;;  %v1109_v57 = vpop.f32.mrb[8].mxu0  ;;  %v1189_v58 = vpop.f32.mrb[8].mxu1 }
 0x137   : > { %v1111_v60 = vpop.f32.mrb[9].mxu0  ;;  %v1191_v62 = vpop.f32.mrb[9].mxu1  ;;  %v1110_v1 = vadd.f32 %v1109_v57, %v6808_v43  ;;  %v1190_v4 = vadd.f32 %v1189_v58, %v6808_v43 }
 0x138   : > { %v1113_v63 = vpop.f32.mrb[10].mxu0  ;;  %v1193_v0 = vpop.f32.mrb[10].mxu1  ;;  %v1112_v11 = vadd.f32 %v1111_v60, %v6811_v54  ;;  %v1192_v12 = vadd.f32 %v1191_v62, %v6811_v54 }
 0x139   : > { %v1114_v5 = vadd.f32 %v1113_v63, %v6808_v43  ;;  %v1194_v6 = vadd.f32 %v1193_v0, %v6808_v43  ;;  %v1115_v7 = vpop.f32.mrb[11].mxu0  ;;  %v1195_v10 = vpop.f32.mrb[11].mxu1 }
 0x13a   : > { %v1116_v14 = vadd.f32 %v1115_v7, %v6811_v54  ;;  %v1196_v18 = vadd.f32 %v1195_v10, %v6811_v54 }
 0x13b   : > { %v1646_v19 = vpack.c.bf16 %v1114_v5, %v1110_v1  ;;  %v1694_v13 = vpack.c.bf16 %v1194_v6, %v1190_v4 }
 0x13c   : > { %v1647_v35 = vpack.c.bf16 %v1116_v14, %v1112_v11  ;;  %v1695_v42 = vpack.c.bf16 %v1196_v18, %v1192_v12 }
 0x13d   : > { %1742 = vst [vmem:[#allocation2 + $0x60] sm:$0xff] %v1646_v19  ;;  %1790 = vst [vmem:[#allocation2 + $0x1e0] sm:$0xff] %v1694_v13 }
 0x13e   : > { %1743 = vst [vmem:[#allocation2 + $0x68] sm:$0xff] %v1647_v35  ;;  %1791 = vst [vmem:[#allocation2 + $0x1e8] sm:$0xff] %v1695_v42  ;;  %v1119_v47 = vpop.f32.mrb[12].mxu0  ;;  %v1199_v49 = vpop.f32.mrb[12].mxu1 }
 0x13f   : > { %v1121_v55 = vpop.f32.mrb[13].mxu0  ;;  %v1201_v59 = vpop.f32.mrb[13].mxu1  ;;  %v1120_v3 = vadd.f32 %v1119_v47, %v6808_v43  ;;  %v1200_v8 = vadd.f32 %v1199_v49, %v6808_v43 }
 0x140   : > { %v1123_v61 = vpop.f32.mrb[14].mxu0  ;;  %v1203_v2 = vpop.f32.mrb[14].mxu1  ;;  %v1122_v21 = vadd.f32 %v1121_v55, %v6811_v54  ;;  %v1202_v22 = vadd.f32 %v1201_v59, %v6811_v54 }
 0x141   : > { %v1124_v9 = vadd.f32 %v1123_v61, %v6808_v43  ;;  %v1204_v16 = vadd.f32 %v1203_v2, %v6808_v43  ;;  %v1125_v17 = vpop.f32.mrb[15].mxu0  ;;  %v1205_v20 = vpop.f32.mrb[15].mxu1 }
 0x142   : > { %v1126_v23 = vadd.f32 %v1125_v17, %v6811_v54  ;;  %v1206_v24 = vadd.f32 %v1205_v20, %v6811_v54 }
 0x143   : > { %v1652_v25 = vpack.c.bf16 %v1124_v9, %v1120_v3  ;;  %v1700_v26 = vpack.c.bf16 %v1204_v16, %v1200_v8 }
 0x144   : > { %v1653_v27 = vpack.c.bf16 %v1126_v23, %v1122_v21  ;;  %v1701_v28 = vpack.c.bf16 %v1206_v24, %v1202_v22 }
 0x145   : > { %1748 = vst [vmem:[#allocation2 + $0x90] sm:$0xff] %v1652_v25  ;;  %1796 = vst [vmem:[#allocation2 + $0x210] sm:$0xff] %v1700_v26 }
 0x146   : > { %1749 = vst [vmem:[#allocation2 + $0x98] sm:$0xff] %v1653_v27  ;;  %1797 = vst [vmem:[#allocation2 + $0x218] sm:$0xff] %v1701_v28  ;;  %v1129_v29 = vpop.f32.mrb[16].mxu0  ;;  %v1209_v30 = vpop.f32.mrb[16].mxu1 }
 0x147   : > { %v1131_v31 = vpop.f32.mrb[17].mxu0  ;;  %v1211_v32 = vpop.f32.mrb[17].mxu1  ;;  %v1130_v36 = vadd.f32 %v1129_v29, %v6808_v43  ;;  %v1210_v38 = vadd.f32 %v1209_v30, %v6808_v43 }
 0x148   : > { %v1133_v33 = vpop.f32.mrb[18].mxu0  ;;  %v1213_v34 = vpop.f32.mrb[18].mxu1  ;;  %v1132_v45 = vadd.f32 %v1131_v31, %v6811_v54  ;;  %v1212_v46 = vadd.f32 %v1211_v32, %v6811_v54 }
 0x149   : > { %v1134_v39 = vadd.f32 %v1133_v33, %v6808_v43  ;;  %v1214_v40 = vadd.f32 %v1213_v34, %v6808_v43  ;;  %v1135_v41 = vpop.f32.mrb[19].mxu0  ;;  %v1215_v44 = vpop.f32.mrb[19].mxu1 }
 0x14a   : > { %v1136_v48 = vadd.f32 %v1135_v41, %v6811_v54  ;;  %v1216_v50 = vadd.f32 %v1215_v44, %v6811_v54 }
 0x14b   : > { %v1658_v51 = vpack.c.bf16 %v1134_v39, %v1130_v36  ;;  %v1706_v52 = vpack.c.bf16 %v1214_v40, %v1210_v38  ;;  %v395_v36 = vsub.s32 2, %v6798_v15  ;;  %v403_v38 = vsub.s32 4, %v6798_v15 }
 0x14c   : > { %v1659_v53 = vpack.c.bf16 %v1136_v48, %v1132_v45  ;;  %v1707_v56 = vpack.c.bf16 %v1216_v50, %v1212_v46  ;;  %v399_v39 = vsub.s32 3, %v6798_v15  ;;  %v407_v40 = vsub.s32 5, %v6798_v15 }
 0x14d   : > { %1754 = vst [vmem:[#allocation2 + $0xc0] sm:$0xff] %v1658_v51  ;;  %1802 = vst [vmem:[#allocation2 + $0x240] sm:$0xff] %v1706_v52 }
 0x14e   : > { %1755 = vst [vmem:[#allocation2 + $0xc8] sm:$0xff] %v1659_v53  ;;  %1803 = vst [vmem:[#allocation2 + $0x248] sm:$0xff] %v1707_v56  ;;  %v1139_v57 = vpop.f32.mrb[20].mxu0  ;;  %v1219_v58 = vpop.f32.mrb[20].mxu1 }
 0x14f   : > { %v1141_v60 = vpop.f32.mrb[21].mxu0  ;;  %v1221_v62 = vpop.f32.mrb[21].mxu1  ;;  %v1140_v1 = vadd.f32 %v1139_v57, %v6808_v43  ;;  %v1220_v4 = vadd.f32 %v1219_v58, %v6808_v43 }
 0x150   : > { %v1143_v63 = vpop.f32.mrb[22].mxu0  ;;  %v1223_v0 = vpop.f32.mrb[22].mxu1  ;;  %v1142_v11 = vadd.f32 %v1141_v60, %v6811_v54  ;;  %v1222_v12 = vadd.f32 %v1221_v62, %v6811_v54  ;;  %v6882_v62 = vrot.slane %v6804_v37, %v395_v36 }
 0x151   : > { %v1144_v5 = vadd.f32 %v1143_v63, %v6808_v43  ;;  %v1224_v6 = vadd.f32 %v1223_v0, %v6808_v43  ;;  %v1145_v7 = vpop.f32.mrb[23].mxu0  ;;  %v1225_v10 = vpop.f32.mrb[23].mxu1 }
 0x152   : > { %v1146_v14 = vadd.f32 %v1145_v7, %v6811_v54  ;;  %v1226_v18 = vadd.f32 %v1225_v10, %v6811_v54 }
 0x153   : > { %v1664_v19 = vpack.c.bf16 %v1144_v5, %v1140_v1  ;;  %v1712_v13 = vpack.c.bf16 %v1224_v6, %v1220_v4  ;;  %v6888_v1 = vrot.slane %v6804_v37, %v399_v39 }
 0x154   : > { %v1665_v35 = vpack.c.bf16 %v1146_v14, %v1142_v11  ;;  %v1713_v42 = vpack.c.bf16 %v1226_v18, %v1222_v12 }
 0x155   : > { %1760 = vst [vmem:[#allocation2 + $0xf0] sm:$0xff] %v1664_v19  ;;  %1808 = vst [vmem:[#allocation2 + $0x270] sm:$0xff] %v1712_v13 }
 0x156   : > { %1761 = vst [vmem:[#allocation2 + $0xf8] sm:$0xff] %v1665_v35  ;;  %1809 = vst [vmem:[#allocation2 + $0x278] sm:$0xff] %v1713_v42  ;;  %v1149_v47 = vpop.f32.mrb[24].mxu0  ;;  %v1229_v49 = vpop.f32.mrb[24].mxu1 }
 0x157   : > { %v1151_v55 = vpop.f32.mrb[25].mxu0  ;;  %v1231_v59 = vpop.f32.mrb[25].mxu1  ;;  %v1150_v3 = vadd.f32 %v1149_v47, %v6808_v43  ;;  %v1230_v8 = vadd.f32 %v1229_v49, %v6808_v43 }
 0x158   : > { %v1153_v61 = vpop.f32.mrb[26].mxu0  ;;  %v1233_v2 = vpop.f32.mrb[26].mxu1  ;;  %v1152_v21 = vadd.f32 %v1151_v55, %v6811_v54  ;;  %v1232_v22 = vadd.f32 %v1231_v59, %v6811_v54 }
 0x159   : > { %v1154_v9 = vadd.f32 %v1153_v61, %v6808_v43  ;;  %v1234_v16 = vadd.f32 %v1233_v2, %v6808_v43  ;;  %v1155_v17 = vpop.f32.mrb[27].mxu0  ;;  %v1235_v20 = vpop.f32.mrb[27].mxu1 }
 0x15a   : > { %v1156_v23 = vadd.f32 %v1155_v17, %v6811_v54  ;;  %v1236_v24 = vadd.f32 %v1235_v20, %v6811_v54 }
 0x15b   : > { %v1670_v25 = vpack.c.bf16 %v1154_v9, %v1150_v3  ;;  %v1718_v26 = vpack.c.bf16 %v1234_v16, %v1230_v8 }
 0x15c   : > { %v1671_v27 = vpack.c.bf16 %v1156_v23, %v1152_v21  ;;  %v1719_v28 = vpack.c.bf16 %v1236_v24, %v1232_v22 }
 0x15d   : > { %1766 = vst [vmem:[#allocation2 + $0x120] sm:$0xff] %v1670_v25  ;;  %1814 = vst [vmem:[#allocation2 + $0x2a0] sm:$0xff] %v1718_v26 }
 0x15e   : > { %1767 = vst [vmem:[#allocation2 + $0x128] sm:$0xff] %v1671_v27  ;;  %1815 = vst [vmem:[#allocation2 + $0x2a8] sm:$0xff] %v1719_v28  ;;  %v1159_v29 = vpop.f32.mrb[28].mxu0  ;;  %v1239_v30 = vpop.f32.mrb[28].mxu1 }
 0x15f   : > { %v1161_v31 = vpop.f32.mrb[29].mxu0  ;;  %v1241_v32 = vpop.f32.mrb[29].mxu1  ;;  %v1160_v41 = vadd.f32 %v1159_v29, %v6808_v43  ;;  %v1240_v44 = vadd.f32 %v1239_v30, %v6808_v43 }
 0x160   : > { %v1163_v33 = vpop.f32.mrb[30].mxu0  ;;  %v1243_v34 = vpop.f32.mrb[30].mxu1  ;;  %v1162_v51 = vadd.f32 %v1161_v31, %v6811_v54  ;;  %v1242_v52 = vadd.f32 %v1241_v32, %v6811_v54 }
 0x161   : > { %v1164_v45 = vadd.f32 %v1163_v33, %v6808_v43  ;;  %v1244_v46 = vadd.f32 %v1243_v34, %v6808_v43  ;;  %v1165_v48 = vpop.f32.mrb[31].mxu0  ;;  %v1245_v50 = vpop.f32.mrb[31].mxu1  ;;  %v6885_v43 = vrot.slane %v6804_v37, %v403_v38 }
 0x162   : > { %v1166_v53 = vadd.f32 %v1165_v48, %v6811_v54  ;;  %v1246_v56 = vadd.f32 %v1245_v50, %v6811_v54  ;;  %v6891_v54 = vrot.slane %v6804_v37, %v407_v40 }
 0x163   : > { %v1676_v57 = vpack.c.bf16 %v1164_v45, %v1160_v41  ;;  %v1724_v15 = vpack.c.bf16 %v1244_v46, %v1240_v44 }
 0x164   : > { %v1677_v58 = vpack.c.bf16 %v1166_v53, %v1162_v51  ;;  %v1725_v60 = vpack.c.bf16 %v1246_v56, %v1242_v52 }
 0x165   : > { %1772 = vst [vmem:[#allocation2 + $0x150] sm:$0xff] %v1676_v57  ;;  %1820 = vst [vmem:[#allocation2 + $0x2d0] sm:$0xff] %v1724_v15 }
 0x166   : > { %1773 = vst [vmem:[#allocation2 + $0x158] sm:$0xff] %v1677_v58  ;;  %1821 = vst [vmem:[#allocation2 + $0x2d8] sm:$0xff] %v1725_v60  ;;  %v1282_v63 = vpop.f32.mrb[32].mxu1  ;;  %v1475_v0 = vpop.f32.mrb[32].mxu0 }
 0x167   : > { %v1284_v4 = vpop.f32.mrb[33].mxu1  ;;  %v1477_v5 = vpop.f32.mrb[33].mxu0  ;;  %v1283_v10 = vadd.f32 %v1282_v63, %v6882_v62  ;;  %v1476_v11 = vadd.f32 %v1475_v0, %v6885_v43 }
 0x168   : > { %v1286_v6 = vpop.f32.mrb[34].mxu1  ;;  %v1479_v7 = vpop.f32.mrb[34].mxu0  ;;  %v1285_v13 = vadd.f32 %v1284_v4, %v6888_v1  ;;  %v1478_v35 = vadd.f32 %v1477_v5, %v6891_v54 }
 0x169   : > { %v1287_v12 = vadd.f32 %v1286_v6, %v6882_v62  ;;  %v1480_v14 = vadd.f32 %v1479_v7, %v6885_v43  ;;  %v1288_v18 = vpop.f32.mrb[35].mxu1  ;;  %v1481_v19 = vpop.f32.mrb[35].mxu0 }
 0x16a   : > { %v1289_v37 = vadd.f32 %v1288_v18, %v6888_v1  ;;  %v1482_v42 = vadd.f32 %v1481_v19, %v6891_v54 }
 0x16b   : > { %v1636_v47 = vpack.c.bf16 %v1287_v12, %v1283_v10  ;;  %v1638_v49 = vpack.c.bf16 %v1480_v14, %v1476_v11 }
 0x16c   : > { %v1637_v55 = vpack.c.bf16 %v1289_v37, %v1285_v13  ;;  %v1639_v59 = vpack.c.bf16 %v1482_v42, %v1478_v35 }
 0x16d   : > { %1732 = vst [vmem:[#allocation2 + $0x10] sm:$0xff] %v1636_v47  ;;  %1734 = vst [vmem:[#allocation2 + $0x20] sm:$0xff] %v1638_v49 }
 0x16e   : > { %1733 = vst [vmem:[#allocation2 + $0x18] sm:$0xff] %v1637_v55  ;;  %1735 = vst [vmem:[#allocation2 + $0x28] sm:$0xff] %v1639_v59  ;;  %v1292_v61 = vpop.f32.mrb[36].mxu1  ;;  %v1485_v2 = vpop.f32.mrb[36].mxu0 }
 0x16f   : > { %v1294_v3 = vpop.f32.mrb[37].mxu1  ;;  %v1487_v8 = vpop.f32.mrb[37].mxu0  ;;  %v1293_v17 = vadd.f32 %v1292_v61, %v6882_v62  ;;  %v1486_v20 = vadd.f32 %v1485_v2, %v6885_v43 }
 0x170   : > { %v1296_v9 = vpop.f32.mrb[38].mxu1  ;;  %v1489_v16 = vpop.f32.mrb[38].mxu0  ;;  %v1295_v25 = vadd.f32 %v1294_v3, %v6888_v1  ;;  %v1488_v26 = vadd.f32 %v1487_v8, %v6891_v54 }
 0x171   : > { %v1297_v21 = vadd.f32 %v1296_v9, %v6882_v62  ;;  %v1490_v22 = vadd.f32 %v1489_v16, %v6885_v43  ;;  %v1298_v23 = vpop.f32.mrb[39].mxu1  ;;  %v1491_v24 = vpop.f32.mrb[39].mxu0 }
 0x172   : > { %v1299_v27 = vadd.f32 %v1298_v23, %v6888_v1  ;;  %v1492_v28 = vadd.f32 %v1491_v24, %v6891_v54 }
 0x173   : > { %v1642_v29 = vpack.c.bf16 %v1297_v21, %v1293_v17  ;;  %v1644_v30 = vpack.c.bf16 %v1490_v22, %v1486_v20 }
 0x174   : > { %v1643_v31 = vpack.c.bf16 %v1299_v27, %v1295_v25  ;;  %v1645_v32 = vpack.c.bf16 %v1492_v28, %v1488_v26 }
 0x175   : > { %1738 = vst [vmem:[#allocation2 + $0x40] sm:$0xff] %v1642_v29  ;;  %1740 = vst [vmem:[#allocation2 + $0x50] sm:$0xff] %v1644_v30 }
 0x176   : > { %1739 = vst [vmem:[#allocation2 + $0x48] sm:$0xff] %v1643_v31  ;;  %1741 = vst [vmem:[#allocation2 + $0x58] sm:$0xff] %v1645_v32  ;;  %v1302_v33 = vpop.f32.mrb[40].mxu1  ;;  %v1495_v34 = vpop.f32.mrb[40].mxu0 }
 0x177   : > { %v1304_v36 = vpop.f32.mrb[41].mxu1  ;;  %v1497_v38 = vpop.f32.mrb[41].mxu0  ;;  %v1303_v41 = vadd.f32 %v1302_v33, %v6882_v62  ;;  %v1496_v44 = vadd.f32 %v1495_v34, %v6885_v43 }
 0x178   : > { %v1306_v39 = vpop.f32.mrb[42].mxu1  ;;  %v1499_v40 = vpop.f32.mrb[42].mxu0  ;;  %v1305_v51 = vadd.f32 %v1304_v36, %v6888_v1  ;;  %v1498_v52 = vadd.f32 %v1497_v38, %v6891_v54 }
 0x179   : > { %v1307_v45 = vadd.f32 %v1306_v39, %v6882_v62  ;;  %v1500_v46 = vadd.f32 %v1499_v40, %v6885_v43  ;;  %v1308_v48 = vpop.f32.mrb[43].mxu1  ;;  %v1501_v50 = vpop.f32.mrb[43].mxu0 }
 0x17a   : > { %v1309_v53 = vadd.f32 %v1308_v48, %v6888_v1  ;;  %v1502_v56 = vadd.f32 %v1501_v50, %v6891_v54 }
 0x17b   : > { %v1648_v57 = vpack.c.bf16 %v1307_v45, %v1303_v41  ;;  %v1650_v15 = vpack.c.bf16 %v1500_v46, %v1496_v44 }
 0x17c   : > { %v1649_v58 = vpack.c.bf16 %v1309_v53, %v1305_v51  ;;  %v1651_v60 = vpack.c.bf16 %v1502_v56, %v1498_v52 }
 0x17d   : > { %1744 = vst [vmem:[#allocation2 + $0x70] sm:$0xff] %v1648_v57  ;;  %1746 = vst [vmem:[#allocation2 + $0x80] sm:$0xff] %v1650_v15 }
 0x17e   : > { %1745 = vst [vmem:[#allocation2 + $0x78] sm:$0xff] %v1649_v58  ;;  %1747 = vst [vmem:[#allocation2 + $0x88] sm:$0xff] %v1651_v60  ;;  %v1312_v63 = vpop.f32.mrb[44].mxu1  ;;  %v1505_v0 = vpop.f32.mrb[44].mxu0 }
 0x17f   : > { %v1314_v4 = vpop.f32.mrb[45].mxu1  ;;  %v1507_v5 = vpop.f32.mrb[45].mxu0  ;;  %v1313_v10 = vadd.f32 %v1312_v63, %v6882_v62  ;;  %v1506_v11 = vadd.f32 %v1505_v0, %v6885_v43 }
 0x180   : > { %v1316_v6 = vpop.f32.mrb[46].mxu1  ;;  %v1509_v7 = vpop.f32.mrb[46].mxu0  ;;  %v1315_v13 = vadd.f32 %v1314_v4, %v6888_v1  ;;  %v1508_v35 = vadd.f32 %v1507_v5, %v6891_v54 }
 0x181   : > { %v1317_v12 = vadd.f32 %v1316_v6, %v6882_v62  ;;  %v1510_v14 = vadd.f32 %v1509_v7, %v6885_v43  ;;  %v1318_v18 = vpop.f32.mrb[47].mxu1  ;;  %v1511_v19 = vpop.f32.mrb[47].mxu0 }
 0x182   : > { %v1319_v37 = vadd.f32 %v1318_v18, %v6888_v1  ;;  %v1512_v42 = vadd.f32 %v1511_v19, %v6891_v54 }
 0x183   : > { %v1654_v47 = vpack.c.bf16 %v1317_v12, %v1313_v10  ;;  %v1656_v49 = vpack.c.bf16 %v1510_v14, %v1506_v11 }
 0x184   : > { %v1655_v55 = vpack.c.bf16 %v1319_v37, %v1315_v13  ;;  %v1657_v59 = vpack.c.bf16 %v1512_v42, %v1508_v35 }
 0x185   : > { %1750 = vst [vmem:[#allocation2 + $0xa0] sm:$0xff] %v1654_v47  ;;  %1752 = vst [vmem:[#allocation2 + $0xb0] sm:$0xff] %v1656_v49 }
 0x186   : > { %1751 = vst [vmem:[#allocation2 + $0xa8] sm:$0xff] %v1655_v55  ;;  %1753 = vst [vmem:[#allocation2 + $0xb8] sm:$0xff] %v1657_v59  ;;  %v1322_v61 = vpop.f32.mrb[48].mxu1  ;;  %v1515_v2 = vpop.f32.mrb[48].mxu0 }
 0x187   : > { %v1324_v3 = vpop.f32.mrb[49].mxu1  ;;  %v1517_v8 = vpop.f32.mrb[49].mxu0  ;;  %v1323_v17 = vadd.f32 %v1322_v61, %v6882_v62  ;;  %v1516_v20 = vadd.f32 %v1515_v2, %v6885_v43 }
 0x188   : > { %v1326_v9 = vpop.f32.mrb[50].mxu1  ;;  %v1519_v16 = vpop.f32.mrb[50].mxu0  ;;  %v1325_v25 = vadd.f32 %v1324_v3, %v6888_v1  ;;  %v1518_v26 = vadd.f32 %v1517_v8, %v6891_v54 }
 0x189   : > { %v1327_v21 = vadd.f32 %v1326_v9, %v6882_v62  ;;  %v1520_v22 = vadd.f32 %v1519_v16, %v6885_v43  ;;  %v1328_v23 = vpop.f32.mrb[51].mxu1  ;;  %v1521_v24 = vpop.f32.mrb[51].mxu0 }
 0x18a   : > { %v1329_v27 = vadd.f32 %v1328_v23, %v6888_v1  ;;  %v1522_v28 = vadd.f32 %v1521_v24, %v6891_v54 }
 0x18b   : > { %v1660_v29 = vpack.c.bf16 %v1327_v21, %v1323_v17  ;;  %v1662_v30 = vpack.c.bf16 %v1520_v22, %v1516_v20 }
 0x18c   : > { %v1661_v31 = vpack.c.bf16 %v1329_v27, %v1325_v25  ;;  %v1663_v32 = vpack.c.bf16 %v1522_v28, %v1518_v26 }
 0x18d   : > { %1756 = vst [vmem:[#allocation2 + $0xd0] sm:$0xff] %v1660_v29  ;;  %1758 = vst [vmem:[#allocation2 + $0xe0] sm:$0xff] %v1662_v30 }
 0x18e   : > { %1757 = vst [vmem:[#allocation2 + $0xd8] sm:$0xff] %v1661_v31  ;;  %1759 = vst [vmem:[#allocation2 + $0xe8] sm:$0xff] %v1663_v32  ;;  %v1332_v33 = vpop.f32.mrb[52].mxu1  ;;  %v1525_v34 = vpop.f32.mrb[52].mxu0 }
 0x18f   : > { %v1334_v36 = vpop.f32.mrb[53].mxu1  ;;  %v1527_v38 = vpop.f32.mrb[53].mxu0  ;;  %v1333_v41 = vadd.f32 %v1332_v33, %v6882_v62  ;;  %v1526_v44 = vadd.f32 %v1525_v34, %v6885_v43 }
 0x190   : > { %v1336_v39 = vpop.f32.mrb[54].mxu1  ;;  %v1529_v40 = vpop.f32.mrb[54].mxu0  ;;  %v1335_v51 = vadd.f32 %v1334_v36, %v6888_v1  ;;  %v1528_v52 = vadd.f32 %v1527_v38, %v6891_v54 }
 0x191   : > { %v1337_v45 = vadd.f32 %v1336_v39, %v6882_v62  ;;  %v1530_v46 = vadd.f32 %v1529_v40, %v6885_v43  ;;  %v1338_v48 = vpop.f32.mrb[55].mxu1  ;;  %v1531_v50 = vpop.f32.mrb[55].mxu0 }
 0x192   : > { %v1339_v53 = vadd.f32 %v1338_v48, %v6888_v1  ;;  %v1532_v56 = vadd.f32 %v1531_v50, %v6891_v54 }
 0x193   : > { %v1666_v57 = vpack.c.bf16 %v1337_v45, %v1333_v41  ;;  %v1668_v15 = vpack.c.bf16 %v1530_v46, %v1526_v44 }
 0x194   : > { %v1667_v58 = vpack.c.bf16 %v1339_v53, %v1335_v51  ;;  %v1669_v60 = vpack.c.bf16 %v1532_v56, %v1528_v52 }
 0x195   : > { %1762 = vst [vmem:[#allocation2 + $0x100] sm:$0xff] %v1666_v57  ;;  %1764 = vst [vmem:[#allocation2 + $0x110] sm:$0xff] %v1668_v15 }
 0x196   : > { %1763 = vst [vmem:[#allocation2 + $0x108] sm:$0xff] %v1667_v58  ;;  %1765 = vst [vmem:[#allocation2 + $0x118] sm:$0xff] %v1669_v60  ;;  %v1342_v63 = vpop.f32.mrb[56].mxu1  ;;  %v1535_v0 = vpop.f32.mrb[56].mxu0 }
 0x197   : > { %v1344_v4 = vpop.f32.mrb[57].mxu1  ;;  %v1537_v5 = vpop.f32.mrb[57].mxu0  ;;  %v1343_v10 = vadd.f32 %v1342_v63, %v6882_v62  ;;  %v1536_v11 = vadd.f32 %v1535_v0, %v6885_v43 }
 0x198   : > { %v1346_v6 = vpop.f32.mrb[58].mxu1  ;;  %v1539_v7 = vpop.f32.mrb[58].mxu0  ;;  %v1345_v13 = vadd.f32 %v1344_v4, %v6888_v1  ;;  %v1538_v35 = vadd.f32 %v1537_v5, %v6891_v54 }
 0x199   : > { %v1347_v12 = vadd.f32 %v1346_v6, %v6882_v62  ;;  %v1540_v14 = vadd.f32 %v1539_v7, %v6885_v43  ;;  %v1348_v18 = vpop.f32.mrb[59].mxu1  ;;  %v1541_v19 = vpop.f32.mrb[59].mxu0 }
 0x19a   : > { %v1349_v37 = vadd.f32 %v1348_v18, %v6888_v1  ;;  %v1542_v42 = vadd.f32 %v1541_v19, %v6891_v54 }
 0x19b   : > { %v1672_v47 = vpack.c.bf16 %v1347_v12, %v1343_v10  ;;  %v1674_v49 = vpack.c.bf16 %v1540_v14, %v1536_v11 }
 0x19c   : > { %v1673_v55 = vpack.c.bf16 %v1349_v37, %v1345_v13  ;;  %v1675_v59 = vpack.c.bf16 %v1542_v42, %v1538_v35 }
 0x19d   : > { %1768 = vst [vmem:[#allocation2 + $0x130] sm:$0xff] %v1672_v47  ;;  %1770 = vst [vmem:[#allocation2 + $0x140] sm:$0xff] %v1674_v49 }
 0x19e   : > { %1769 = vst [vmem:[#allocation2 + $0x138] sm:$0xff] %v1673_v55  ;;  %1771 = vst [vmem:[#allocation2 + $0x148] sm:$0xff] %v1675_v59  ;;  %v1352_v61 = vpop.f32.mrb[60].mxu1  ;;  %v1545_v2 = vpop.f32.mrb[60].mxu0 }
 0x19f   : > { %v1354_v3 = vpop.f32.mrb[61].mxu1  ;;  %v1547_v8 = vpop.f32.mrb[61].mxu0  ;;  %v1353_v17 = vadd.f32 %v1352_v61, %v6882_v62  ;;  %v1546_v20 = vadd.f32 %v1545_v2, %v6885_v43 }
 0x1a0   : > { %v1356_v9 = vpop.f32.mrb[62].mxu1  ;;  %v1549_v16 = vpop.f32.mrb[62].mxu0  ;;  %v1355_v25 = vadd.f32 %v1354_v3, %v6888_v1  ;;  %v1548_v26 = vadd.f32 %v1547_v8, %v6891_v54 }
 0x1a1   : > { %v1357_v21 = vadd.f32 %v1356_v9, %v6882_v62  ;;  %v1550_v22 = vadd.f32 %v1549_v16, %v6885_v43  ;;  %v1358_v23 = vpop.f32.mrb[63].mxu1  ;;  %v1551_v24 = vpop.f32.mrb[63].mxu0 }
 0x1a2   : > { %v1359_v27 = vadd.f32 %v1358_v23, %v6888_v1  ;;  %v1552_v28 = vadd.f32 %v1551_v24, %v6891_v54 }
 0x1a3   : > { %v1678_v29 = vpack.c.bf16 %v1357_v21, %v1353_v17  ;;  %v1680_v30 = vpack.c.bf16 %v1550_v22, %v1546_v20 }
 0x1a4   : > { %v1679_v31 = vpack.c.bf16 %v1359_v27, %v1355_v25  ;;  %v1681_v32 = vpack.c.bf16 %v1552_v28, %v1548_v26 }
 0x1a5   : > { %1774 = vst [vmem:[#allocation2 + $0x160] sm:$0xff] %v1678_v29  ;;  %1776 = vst [vmem:[#allocation2 + $0x170] sm:$0xff] %v1680_v30 }
 0x1a6   : > { %1775 = vst [vmem:[#allocation2 + $0x168] sm:$0xff] %v1679_v31  ;;  %1777 = vst [vmem:[#allocation2 + $0x178] sm:$0xff] %v1681_v32  ;;  %v1362_v33 = vpop.f32.mrb[64].mxu1  ;;  %v1555_v34 = vpop.f32.mrb[64].mxu0 }
 0x1a7   : > { %v1364_v36 = vpop.f32.mrb[65].mxu1  ;;  %v1557_v38 = vpop.f32.mrb[65].mxu0  ;;  %v1363_v41 = vadd.f32 %v1362_v33, %v6882_v62  ;;  %v1556_v44 = vadd.f32 %v1555_v34, %v6885_v43 }
 0x1a8   : > { %v1366_v39 = vpop.f32.mrb[66].mxu1  ;;  %v1559_v40 = vpop.f32.mrb[66].mxu0  ;;  %v1365_v51 = vadd.f32 %v1364_v36, %v6888_v1  ;;  %v1558_v52 = vadd.f32 %v1557_v38, %v6891_v54 }
 0x1a9   : > { %v1367_v45 = vadd.f32 %v1366_v39, %v6882_v62  ;;  %v1560_v46 = vadd.f32 %v1559_v40, %v6885_v43  ;;  %v1368_v48 = vpop.f32.mrb[67].mxu1  ;;  %v1561_v50 = vpop.f32.mrb[67].mxu0 }
 0x1aa   : > { %v1369_v53 = vadd.f32 %v1368_v48, %v6888_v1  ;;  %v1562_v56 = vadd.f32 %v1561_v50, %v6891_v54 }
 0x1ab   : > { %v1684_v57 = vpack.c.bf16 %v1367_v45, %v1363_v41  ;;  %v1686_v15 = vpack.c.bf16 %v1560_v46, %v1556_v44 }
 0x1ac   : > { %v1685_v58 = vpack.c.bf16 %v1369_v53, %v1365_v51  ;;  %v1687_v60 = vpack.c.bf16 %v1562_v56, %v1558_v52 }
 0x1ad   : > { %1780 = vst [vmem:[#allocation2 + $0x190] sm:$0xff] %v1684_v57  ;;  %1782 = vst [vmem:[#allocation2 + $0x1a0] sm:$0xff] %v1686_v15 }
 0x1ae   : > { %1781 = vst [vmem:[#allocation2 + $0x198] sm:$0xff] %v1685_v58  ;;  %1783 = vst [vmem:[#allocation2 + $0x1a8] sm:$0xff] %v1687_v60  ;;  %v1372_v63 = vpop.f32.mrb[68].mxu1  ;;  %v1565_v0 = vpop.f32.mrb[68].mxu0 }
 0x1af   : > { %v1374_v4 = vpop.f32.mrb[69].mxu1  ;;  %v1567_v5 = vpop.f32.mrb[69].mxu0  ;;  %v1373_v10 = vadd.f32 %v1372_v63, %v6882_v62  ;;  %v1566_v11 = vadd.f32 %v1565_v0, %v6885_v43 }
 0x1b0   : > { %v1376_v6 = vpop.f32.mrb[70].mxu1  ;;  %v1569_v7 = vpop.f32.mrb[70].mxu0  ;;  %v1375_v13 = vadd.f32 %v1374_v4, %v6888_v1  ;;  %v1568_v35 = vadd.f32 %v1567_v5, %v6891_v54 }
 0x1b1   : > { %v1377_v12 = vadd.f32 %v1376_v6, %v6882_v62  ;;  %v1570_v14 = vadd.f32 %v1569_v7, %v6885_v43  ;;  %v1378_v18 = vpop.f32.mrb[71].mxu1  ;;  %v1571_v19 = vpop.f32.mrb[71].mxu0 }
 0x1b2   : > { %v1379_v37 = vadd.f32 %v1378_v18, %v6888_v1  ;;  %v1572_v42 = vadd.f32 %v1571_v19, %v6891_v54 }
 0x1b3   : > { %v1690_v47 = vpack.c.bf16 %v1377_v12, %v1373_v10  ;;  %v1692_v49 = vpack.c.bf16 %v1570_v14, %v1566_v11 }
 0x1b4   : > { %v1691_v55 = vpack.c.bf16 %v1379_v37, %v1375_v13  ;;  %v1693_v59 = vpack.c.bf16 %v1572_v42, %v1568_v35 }
 0x1b5   : > { %1786 = vst [vmem:[#allocation2 + $0x1c0] sm:$0xff] %v1690_v47  ;;  %1788 = vst [vmem:[#allocation2 + $0x1d0] sm:$0xff] %v1692_v49 }
 0x1b6   : > { %1787 = vst [vmem:[#allocation2 + $0x1c8] sm:$0xff] %v1691_v55  ;;  %1789 = vst [vmem:[#allocation2 + $0x1d8] sm:$0xff] %v1693_v59  ;;  %v1382_v61 = vpop.f32.mrb[72].mxu1  ;;  %v1575_v2 = vpop.f32.mrb[72].mxu0 }
 0x1b7   : > { %v1384_v3 = vpop.f32.mrb[73].mxu1  ;;  %v1577_v8 = vpop.f32.mrb[73].mxu0  ;;  %v1383_v17 = vadd.f32 %v1382_v61, %v6882_v62  ;;  %v1576_v20 = vadd.f32 %v1575_v2, %v6885_v43 }
 0x1b8   : > { %v1386_v9 = vpop.f32.mrb[74].mxu1  ;;  %v1579_v16 = vpop.f32.mrb[74].mxu0  ;;  %v1385_v25 = vadd.f32 %v1384_v3, %v6888_v1  ;;  %v1578_v26 = vadd.f32 %v1577_v8, %v6891_v54 }
 0x1b9   : > { %v1387_v21 = vadd.f32 %v1386_v9, %v6882_v62  ;;  %v1580_v22 = vadd.f32 %v1579_v16, %v6885_v43  ;;  %v1388_v23 = vpop.f32.mrb[75].mxu1  ;;  %v1581_v24 = vpop.f32.mrb[75].mxu0 }
 0x1ba   : > { %v1389_v27 = vadd.f32 %v1388_v23, %v6888_v1  ;;  %v1582_v28 = vadd.f32 %v1581_v24, %v6891_v54 }
 0x1bb   : > { %v1696_v29 = vpack.c.bf16 %v1387_v21, %v1383_v17  ;;  %v1698_v30 = vpack.c.bf16 %v1580_v22, %v1576_v20 }
 0x1bc   : > { %v1697_v31 = vpack.c.bf16 %v1389_v27, %v1385_v25  ;;  %v1699_v32 = vpack.c.bf16 %v1582_v28, %v1578_v26 }
 0x1bd   : > { %1792 = vst [vmem:[#allocation2 + $0x1f0] sm:$0xff] %v1696_v29  ;;  %1794 = vst [vmem:[#allocation2 + $0x200] sm:$0xff] %v1698_v30 }
 0x1be   : > { %1793 = vst [vmem:[#allocation2 + $0x1f8] sm:$0xff] %v1697_v31  ;;  %1795 = vst [vmem:[#allocation2 + $0x208] sm:$0xff] %v1699_v32  ;;  %v1392_v33 = vpop.f32.mrb[76].mxu1  ;;  %v1585_v34 = vpop.f32.mrb[76].mxu0 }
 0x1bf   : > { %v1394_v36 = vpop.f32.mrb[77].mxu1  ;;  %v1587_v38 = vpop.f32.mrb[77].mxu0  ;;  %v1393_v41 = vadd.f32 %v1392_v33, %v6882_v62  ;;  %v1586_v44 = vadd.f32 %v1585_v34, %v6885_v43 }
 0x1c0   : > { %v1396_v39 = vpop.f32.mrb[78].mxu1  ;;  %v1589_v40 = vpop.f32.mrb[78].mxu0  ;;  %v1395_v51 = vadd.f32 %v1394_v36, %v6888_v1  ;;  %v1588_v52 = vadd.f32 %v1587_v38, %v6891_v54 }
 0x1c1   : > { %v1397_v45 = vadd.f32 %v1396_v39, %v6882_v62  ;;  %v1590_v46 = vadd.f32 %v1589_v40, %v6885_v43  ;;  %v1398_v48 = vpop.f32.mrb[79].mxu1  ;;  %v1591_v50 = vpop.f32.mrb[79].mxu0 }
 0x1c2   : > { %v1399_v53 = vadd.f32 %v1398_v48, %v6888_v1  ;;  %v1592_v56 = vadd.f32 %v1591_v50, %v6891_v54 }
 0x1c3   : > { %v1702_v57 = vpack.c.bf16 %v1397_v45, %v1393_v41  ;;  %v1704_v15 = vpack.c.bf16 %v1590_v46, %v1586_v44 }
 0x1c4   : > { %v1703_v58 = vpack.c.bf16 %v1399_v53, %v1395_v51  ;;  %v1705_v60 = vpack.c.bf16 %v1592_v56, %v1588_v52 }
 0x1c5   : > { %1798 = vst [vmem:[#allocation2 + $0x220] sm:$0xff] %v1702_v57  ;;  %1800 = vst [vmem:[#allocation2 + $0x230] sm:$0xff] %v1704_v15 }
 0x1c6   : > { %1799 = vst [vmem:[#allocation2 + $0x228] sm:$0xff] %v1703_v58  ;;  %1801 = vst [vmem:[#allocation2 + $0x238] sm:$0xff] %v1705_v60  ;;  %v1402_v63 = vpop.f32.mrb[80].mxu1  ;;  %v1595_v0 = vpop.f32.mrb[80].mxu0 }
 0x1c7   : > { %v1404_v4 = vpop.f32.mrb[81].mxu1  ;;  %v1597_v5 = vpop.f32.mrb[81].mxu0  ;;  %v1403_v10 = vadd.f32 %v1402_v63, %v6882_v62  ;;  %v1596_v11 = vadd.f32 %v1595_v0, %v6885_v43 }
 0x1c8   : > { %v1406_v6 = vpop.f32.mrb[82].mxu1  ;;  %v1599_v7 = vpop.f32.mrb[82].mxu0  ;;  %v1405_v13 = vadd.f32 %v1404_v4, %v6888_v1  ;;  %v1598_v35 = vadd.f32 %v1597_v5, %v6891_v54 }
 0x1c9   : > { %v1407_v12 = vadd.f32 %v1406_v6, %v6882_v62  ;;  %v1600_v14 = vadd.f32 %v1599_v7, %v6885_v43  ;;  %v1408_v18 = vpop.f32.mrb[83].mxu1  ;;  %v1601_v19 = vpop.f32.mrb[83].mxu0 }
 0x1ca   : > { %v1409_v37 = vadd.f32 %v1408_v18, %v6888_v1  ;;  %v1602_v42 = vadd.f32 %v1601_v19, %v6891_v54 }
 0x1cb   : > { %v1708_v47 = vpack.c.bf16 %v1407_v12, %v1403_v10  ;;  %v1710_v49 = vpack.c.bf16 %v1600_v14, %v1596_v11 }
 0x1cc   : > { %v1709_v55 = vpack.c.bf16 %v1409_v37, %v1405_v13  ;;  %v1711_v59 = vpack.c.bf16 %v1602_v42, %v1598_v35 }
 0x1cd   : > { %1804 = vst [vmem:[#allocation2 + $0x250] sm:$0xff] %v1708_v47  ;;  %1806 = vst [vmem:[#allocation2 + $0x260] sm:$0xff] %v1710_v49 }
 0x1ce   : > { %1805 = vst [vmem:[#allocation2 + $0x258] sm:$0xff] %v1709_v55  ;;  %1807 = vst [vmem:[#allocation2 + $0x268] sm:$0xff] %v1711_v59  ;;  %v1412_v61 = vpop.f32.mrb[84].mxu1  ;;  %v1605_v2 = vpop.f32.mrb[84].mxu0 }
 0x1cf   : > { %v1414_v3 = vpop.f32.mrb[85].mxu1  ;;  %v1607_v8 = vpop.f32.mrb[85].mxu0  ;;  %v1413_v17 = vadd.f32 %v1412_v61, %v6882_v62  ;;  %v1606_v20 = vadd.f32 %v1605_v2, %v6885_v43 }
 0x1d0   : > { %v1416_v9 = vpop.f32.mrb[86].mxu1  ;;  %v1609_v16 = vpop.f32.mrb[86].mxu0  ;;  %v1415_v25 = vadd.f32 %v1414_v3, %v6888_v1  ;;  %v1608_v26 = vadd.f32 %v1607_v8, %v6891_v54 }
 0x1d1   : > { %v1417_v21 = vadd.f32 %v1416_v9, %v6882_v62  ;;  %v1610_v22 = vadd.f32 %v1609_v16, %v6885_v43  ;;  %v1418_v23 = vpop.f32.mrb[87].mxu1  ;;  %v1611_v24 = vpop.f32.mrb[87].mxu0 }
 0x1d2   : > { %v1419_v27 = vadd.f32 %v1418_v23, %v6888_v1  ;;  %v1612_v28 = vadd.f32 %v1611_v24, %v6891_v54 }
 0x1d3   : > { %v1714_v29 = vpack.c.bf16 %v1417_v21, %v1413_v17  ;;  %v1716_v30 = vpack.c.bf16 %v1610_v22, %v1606_v20 }
 0x1d4   : > { %v1715_v31 = vpack.c.bf16 %v1419_v27, %v1415_v25  ;;  %v1717_v32 = vpack.c.bf16 %v1612_v28, %v1608_v26 }
 0x1d5   : > { %1810 = vst [vmem:[#allocation2 + $0x280] sm:$0xff] %v1714_v29  ;;  %1812 = vst [vmem:[#allocation2 + $0x290] sm:$0xff] %v1716_v30 }
 0x1d6   : > { %1811 = vst [vmem:[#allocation2 + $0x288] sm:$0xff] %v1715_v31  ;;  %1813 = vst [vmem:[#allocation2 + $0x298] sm:$0xff] %v1717_v32  ;;  %v1422_v33 = vpop.f32.mrb[88].mxu1  ;;  %v1615_v34 = vpop.f32.mrb[88].mxu0 }
 0x1d7   : > { %v1424_v36 = vpop.f32.mrb[89].mxu1  ;;  %v1617_v38 = vpop.f32.mrb[89].mxu0  ;;  %v1423_v41 = vadd.f32 %v1422_v33, %v6882_v62  ;;  %v1616_v44 = vadd.f32 %v1615_v34, %v6885_v43 }
 0x1d8   : > { %v1426_v39 = vpop.f32.mrb[90].mxu1  ;;  %v1619_v40 = vpop.f32.mrb[90].mxu0  ;;  %v1425_v51 = vadd.f32 %v1424_v36, %v6888_v1  ;;  %v1618_v52 = vadd.f32 %v1617_v38, %v6891_v54 }
 0x1d9   : > { %v1427_v45 = vadd.f32 %v1426_v39, %v6882_v62  ;;  %v1620_v46 = vadd.f32 %v1619_v40, %v6885_v43  ;;  %v1428_v48 = vpop.f32.mrb[91].mxu1  ;;  %v1621_v50 = vpop.f32.mrb[91].mxu0 }
 0x1da   : > { %v1429_v53 = vadd.f32 %v1428_v48, %v6888_v1  ;;  %v1622_v56 = vadd.f32 %v1621_v50, %v6891_v54 }
 0x1db   : > { %v1720_v57 = vpack.c.bf16 %v1427_v45, %v1423_v41  ;;  %v1722_v15 = vpack.c.bf16 %v1620_v46, %v1616_v44 }
 0x1dc   : > { %v1721_v58 = vpack.c.bf16 %v1429_v53, %v1425_v51  ;;  %v1723_v60 = vpack.c.bf16 %v1622_v56, %v1618_v52 }
 0x1dd   : > { %1816 = vst [vmem:[#allocation2 + $0x2b0] sm:$0xff] %v1720_v57  ;;  %1818 = vst [vmem:[#allocation2 + $0x2c0] sm:$0xff] %v1722_v15 }
 0x1de   : > { %1817 = vst [vmem:[#allocation2 + $0x2b8] sm:$0xff] %v1721_v58  ;;  %1819 = vst [vmem:[#allocation2 + $0x2c8] sm:$0xff] %v1723_v60  ;;  %v1432_v63 = vpop.f32.mrb[92].mxu1  ;;  %v1625_v0 = vpop.f32.mrb[92].mxu0 }
 0x1df   : > { %v1434_v4 = vpop.f32.mrb[93].mxu1  ;;  %v1627_v5 = vpop.f32.mrb[93].mxu0  ;;  %v1433_v10 = vadd.f32 %v1432_v63, %v6882_v62  ;;  %v1626_v11 = vadd.f32 %v1625_v0, %v6885_v43 }
 0x1e0   : > { %v1436_v6 = vpop.f32.mrb[94].mxu1  ;;  %v1629_v7 = vpop.f32.mrb[94].mxu0  ;;  %v1435_v13 = vadd.f32 %v1434_v4, %v6888_v1  ;;  %v1628_v35 = vadd.f32 %v1627_v5, %v6891_v54 }
 0x1e1   : > { %v1437_v12 = vadd.f32 %v1436_v6, %v6882_v62  ;;  %v1630_v14 = vadd.f32 %v1629_v7, %v6885_v43  ;;  %v1438_v18 = vpop.f32.mrb[95].mxu1  ;;  %v1631_v19 = vpop.f32.mrb[95].mxu0 }
 0x1e2   : > { %v1439_v37 = vadd.f32 %v1438_v18, %v6888_v1  ;;  %v1632_v42 = vadd.f32 %v1631_v19, %v6891_v54 }
 0x1e3   : > { %v1726_v47 = vpack.c.bf16 %v1437_v12, %v1433_v10  ;;  %v1728_v49 = vpack.c.bf16 %v1630_v14, %v1626_v11 }
 0x1e4   : > { %v1727_v55 = vpack.c.bf16 %v1439_v37, %v1435_v13  ;;  %v1729_v59 = vpack.c.bf16 %v1632_v42, %v1628_v35 }
 0x1e5   : > { %1822 = vst [vmem:[#allocation2 + $0x2e0] sm:$0xff] %v1726_v47  ;;  %1824 = vst [vmem:[#allocation2 + $0x2f0] sm:$0xff] %v1728_v49 }
 0x1e6   : > { %1823 = vst [vmem:[#allocation2 + $0x2e8] sm:$0xff] %v1727_v55  ;;  %1825 = vst [vmem:[#allocation2 + $0x2f8] sm:$0xff] %v1729_v59 }
 0x1e7 PF: > { %v1856_v62 = vld [vmem:[#allocation2 + $0x190] sm:$0xff]  ;;  %vm1880_vm0 = vcmask 523264   ;;  %v1857_v61 = vld [vmem:[#allocation2 + $0x1c0] sm:$0xff]  ;;  %s4998_s19 = sshll.u32 %s6235_s18, 7  ;;  %s6253_s26 = smov 64  }
 0x1e8   : > { %v1848_v43 = vld [vmem:[#allocation2 + $0x10] sm:$0xff]  ;;  %5516 = vmatprep.subr.msk.bf16.mxu0 %vm1880_vm0, %v1856_v62  ;;  %s1827_s25 = sshra.s32 %s4998_s19, 4  ;;  %2467 = vrot.lane.b32.xlu1 %v1856_v62, %s6253_s26  ;;  %v1849_v54 = vld [vmem:[#allocation2 + $0x40] sm:$0xff] }
 0x1e9   : > { %v1906_v1 = vsel %vm1880_vm0, %v1848_v43, 0  ;;  %s5067_s27 = smul.u32 48, %s1827_s25  ;;  %2451 = vrot.lane.b32.xlu0 %v1848_v43, %s6253_s26  ;;  %v1909_v3 = vsel %vm1880_vm0, %v1849_v54, 0  ;;  %v1858_v8 = vld [vmem:[#allocation2 + $0x1f0] sm:$0xff]  ;;  %v1859_v16 = vld [vmem:[#allocation2 + $0x220] sm:$0xff] }
 0x1ea   : > { %5069 = vmatpush3.bf16.xpose.msra.mxu0 %v1906_v1  ;;  %v1850_v9 = vld [vmem:[#allocation2 + $0x70] sm:$0xff]  ;;  %v1851_v17 = vld [vmem:[#allocation2 + $0xa0] sm:$0xff] }
 0x1eb   : > { %5517 = vmatprep.subr.msk.bf16.mxu0 %vm1880_vm0, %v1857_v61  ;;  %s7027_s28 = scalar_lea.vmem [#allocation2], %s5067_s27  ;;  %v1852_v20 = vld [vmem:[#allocation2 + $0xd0] sm:$0xff]  ;;  %v1912_v21 = vsel %vm1880_vm0, %v1850_v9, 0  ;;  %v1915_v23 = vsel %vm1880_vm0, %v1851_v17, 0  ;;  %v7049_v25 = vld [vmem:[#allocation2 + $0x280] sm:$0xff] }
 0x1ec   : > { %2469 = vrot.lane.b32.xlu1 %v1857_v61, %s6253_s26  ;;  %v1860_v22 = vld [vmem:[#allocation2 + $0x250] sm:$0xff]  ;;  %v1918_v24 = vsel %vm1880_vm0, %v1852_v20, 0  ;;  %v7053_v26 = vld [vmem:[#allocation2 + $0x100] sm:$0xff] }
 0x1ed   : > { %v7030_v2 = vld [vmem:[%s7027_s28] sm:$0xff]  ;;  %2453 = vrot.lane.b32.xlu0 %v1849_v54, %s6253_s26  ;;  %v1921_v27 = vsel %vm1880_vm0, %v7053_v26, 0  ;;  %v7057_v28 = vld [vmem:[#allocation2 + $0x2b0] sm:$0xff] }
 0x1ee   : > { %5084 = vmatprep.mubr.msk.bf16.mxu0 %vm1880_vm0, %v7030_v2  ;;  %v7061_v29 = vld [vmem:[#allocation2 + $0x130] sm:$0xff]  ;;  %v7065_v31 = vld [vmem:[#allocation2 + $0x2e0] sm:$0xff] }
 0x1ef   : > { %v1924_v30 = vsel %vm1880_vm0, %v7061_v29, 0  ;;  %v7069_v32 = vld [vmem:[#allocation2 + $0x160] sm:$0xff]  ;;  %v7074_v34 = vld [vmem:[%s7027_s28 + $0x30] sm:$0xff] }
 0x1f0   : > { %2471 = vrot.lane.b32.xlu1 %v1858_v8, %s6253_s26  ;;  %v1927_v33 = vsel %vm1880_vm0, %v7069_v32, 0  ;;  %v7081_v36 = vld [vmem:[%s7027_s28 + $0x60] sm:$0xff]  ;;  %v7088_v38 = vld [vmem:[%s7027_s28 + $0x90] sm:$0xff] }
 0x1f1   : > { %2455 = vrot.lane.b32.xlu0 %v1850_v9, %s6253_s26  ;;  %v7095_v39 = vld [vmem:[%s7027_s28 + $0xc0] sm:$0xff]  ;;  %v7102_v40 = vld [vmem:[%s7027_s28 + $0xf0] sm:$0xff] }
 0x1f2   : > { %5071 = vmatpush3.bf16.xpose.msra.mxu0 %v1909_v3  ;;  %v7109_v41 = vld [vmem:[%s7027_s28 + $0x120] sm:$0xff]  ;;  %v7116_v44 = vld [vmem:[%s7027_s28 + $0x150] sm:$0xff] }
 0x1f3   : > { %5518 = vmatprep.subr.msk.bf16.mxu0 %vm1880_vm0, %v1858_v8  ;;  %v7124_v45 = vld [vmem:[#allocation2 + $0x1a0] sm:$0xff]  ;;  %v7128_v48 = vld [vmem:[#allocation2 + $0x1d0] sm:$0xff] }
 0x1f4   : > { %2473 = vrot.lane.b32.xlu1 %v1859_v16, %s6253_s26  ;;  %v7126_v46 = vld [vmem:[#allocation2 + $0x20] sm:$0xff]  ;;  %5100 = vmatprep.subr.bf16.mxu1 %v7124_v45  ;;  %v7133_v50 = vld [vmem:[#allocation2 + $0x50] sm:$0xff] }
 0x1f5   : > { %2457 = vrot.lane.b32.xlu0 %v1851_v17, %s6253_s26  ;;  %5101 = vmatpush3.bf16.msra.mxu1 %v7126_v46  ;;  %v7136_v51 = vld [vmem:[#allocation2 + $0x200] sm:$0xff]  ;;  %v7140_v53 = vld [vmem:[#allocation2 + $0x230] sm:$0xff] }
 0x1f6   : > { %5102 = vmatprep.subr.bf16.mxu1 %v7128_v48  ;;  %v7138_v52 = vld [vmem:[#allocation2 + $0x80] sm:$0xff]  ;;  %v7145_v56 = vld [vmem:[#allocation2 + $0xb0] sm:$0xff] }
 0x1f7   : > { %v7148_v57 = vld [vmem:[#allocation2 + $0x260] sm:$0xff]  ;;  %v7153_v58 = vld [vmem:[#allocation2 + $0x290] sm:$0xff] }
 0x1f8   : > { %2459 = vrot.lane.b32.xlu1 %v1852_v20, %s6253_s26  ;;  %v7150_v15 = vld [vmem:[#allocation2 + $0xe0] sm:$0xff]  ;;  %v7157_v60 = vld [vmem:[#allocation2 + $0x110] sm:$0xff] }
 0x1f9   : > { %5103 = vmatpush3.bf16.msra.mxu1 %v7133_v50  ;;  %8966 = vst [vmem:[#allocation3_spill] sm:$0xff] %v7157_v60  ;;  %v7159_v63 = vld [vmem:[#allocation2 + $0x2c0] sm:$0xff]  ;;  %v7165_v4 = vld [vmem:[#allocation2 + $0x2f0] sm:$0xff] }
 0x1fa   : > { %5073 = vmatpush3.bf16.xpose.msra.mxu0 %v1912_v21  ;;  %5104 = vmatprep.subr.bf16.mxu1 %v7136_v51  ;;  %v7163_v0 = vld [vmem:[#allocation2 + $0x140] sm:$0xff]  ;;  %8968 = vst [vmem:[#allocation5_spill] sm:$0xff] %v7165_v4  ;;  %v7169_v5 = vld [vmem:[#allocation2 + $0x170] sm:$0xff] }
 0x1fb   : > { %5519 = vmatprep.subr.msk.bf16.mxu0 %vm1880_vm0, %v1859_v16  ;;  %8967 = vst [vmem:[#allocation4_spill] sm:$0xff] %v7163_v0  ;;  %8969 = vst [vmem:[#allocation6_spill] sm:$0xff] %v7169_v5 }
 0x1fc   : > { %2475 = vrot.lane.b32.xlu1 %v1860_v22, %s6253_s26 }
 0x1fd   : > { %5105 = vmatpush3.bf16.msra.mxu1 %v7138_v52 }
 0x1fe   : > { %5106 = vmatprep.subr.bf16.mxu1 %v7140_v53 }
 0x201   : > { %5107 = vmatpush3.bf16.msra.mxu1 %v7145_v56 }
 0x202   : > { %5075 = vmatpush3.bf16.xpose.msra.mxu0 %v1915_v23  ;;  %5108 = vmatprep.subr.bf16.mxu1 %v7148_v57 }
 0x203   : > { %5520 = vmatprep.subr.msk.bf16.mxu0 %vm1880_vm0, %v1860_v22 }
 0x205   : > { %5109 = vmatpush3.bf16.msra.mxu1 %v7150_v15 }
 0x206   : > { %5110 = vmatprep.subr.bf16.mxu1 %v7153_v58 }
 0x209   : > { %5111 = vmatpush3.bf16.msra.mxu1 %v7157_v60 }
 0x20a   : > { %5077 = vmatpush3.bf16.xpose.msra.mxu0 %v1918_v24  ;;  %5112 = vmatprep.subr.bf16.mxu1 %v7159_v63 }
 0x20b   : > { %5521 = vmatprep.subr.msk.bf16.mxu0 %vm1880_vm0, %v7049_v25 }
 0x20d   : > { %5113 = vmatpush3.bf16.msra.mxu1 %v7163_v0 }
 0x20e   : > { %5114 = vmatprep.subr.bf16.mxu1 %v7165_v4 }
 0x211   : > { %5115 = vmatpush3.bf16.msra.mxu1 %v7169_v5 }
 0x212   : > { %5079 = vmatpush3.bf16.xpose.msra.mxu0 %v1921_v27 }
 0x213   : > { %5522 = vmatprep.subr.msk.bf16.mxu0 %vm1880_vm0, %v7057_v28 }
 0x21a   : > { %5081 = vmatpush3.bf16.xpose.msra.mxu0 %v1924_v30 }
 0x21b   : > { %5523 = vmatprep.subr.msk.bf16.mxu0 %vm1880_vm0, %v7065_v31 }
 0x222   : > { %5083 = vmatpush3.bf16.xpose.msra.mxu0 %v1927_v33 }
 0x229   : > { %5085 = vmatmul.mubr.msk.bf16.vlgmr.msra.gmra.mrb[0].mxu0 %vm1880_vm0, %v7030_v2 }
 0x22a   : > { %5086 = vmatprep.mubr.msk.bf16.mxu0 %vm1880_vm0, %v7074_v34 }
 0x231   : > { %5087 = vmatmul.mubr.msk.bf16.gmra.mrb[4].mxu0 %vm1880_vm0, %v7074_v34 }
 0x232   : > { %5088 = vmatprep.mubr.msk.bf16.mxu0 %vm1880_vm0, %v7081_v36 }
 0x239   : > { %5089 = vmatmul.mubr.msk.bf16.gmra.mrb[8].mxu0 %vm1880_vm0, %v7081_v36 }
 0x23a   : > { %5090 = vmatprep.mubr.msk.bf16.mxu0 %vm1880_vm0, %v7088_v38 }
 0x241   : > { %5091 = vmatmul.mubr.msk.bf16.gmra.mrb[12].mxu0 %vm1880_vm0, %v7088_v38 }
 0x242   : > { %5092 = vmatprep.mubr.msk.bf16.mxu0 %vm1880_vm0, %v7095_v39 }
 0x249   : > { %5093 = vmatmul.mubr.msk.bf16.gmra.mrb[16].mxu0 %vm1880_vm0, %v7095_v39 }
 0x24a   : > { %5094 = vmatprep.mubr.msk.bf16.mxu0 %vm1880_vm0, %v7102_v40 }
 0x251   : > { %5095 = vmatmul.mubr.msk.bf16.gmra.mrb[20].mxu0 %vm1880_vm0, %v7102_v40 }
 0x252   : > { %5096 = vmatprep.mubr.msk.bf16.mxu0 %vm1880_vm0, %v7109_v41 }
 0x259   : > { %5097 = vmatmul.mubr.msk.bf16.gmra.mrb[24].mxu0 %vm1880_vm0, %v7109_v41 }
 0x25a   : > { %5098 = vmatprep.mubr.msk.bf16.mxu0 %vm1880_vm0, %v7116_v44  ;;  %v2468_v6 = vpop.permute.xlu1 %2467 }
 0x25b   : > { %5524 = vmatprep.subr.msk.bf16.mxu1 %vm1880_vm0, %v2468_v6  ;;  %v7277_v4 = vpop.permute.xlu0 %2451 }
 0x25e   : > { %v7279_v60 = vpop.permute.xlu1 %2469 }
 0x261   : > { %5099 = vmatmul.mubr.msk.bf16.gmra.mrb[28].mxu0 %vm1880_vm0, %v7116_v44 }
 0x2fc   : > { %v7173_v7 = vpop.f32.mrb[0].mxu0 }
 0x2fd   : > { %v7175_v10 = vpop.f32.mrb[1].mxu0 }
 0x2fe   : > { %v7177_v11 = vpop.f32.mrb[2].mxu0  ;;  %v2066_v12 = vmax.f32 %v7173_v7, %v7175_v10 }
 0x2ff   : > { %v7181_v14 = vpop.f32.mrb[3].mxu0 }
 0x300   : > { %2067 = vmax.xlane.f32.xlu0 %v2066_v12  ;;  %v2069_v18 = vmax.f32 %v7177_v11, %v7181_v14 }
 0x304   : > { %2070 = vmax.xlane.f32.xlu0 %v2069_v18  ;;  %v7185_v19 = vpop.f32.mrb[4].mxu0 }
 0x305   : > { %v7187_v13 = vpop.f32.mrb[5].mxu0 }
 0x306   : > { %v7189_v35 = vpop.f32.mrb[6].mxu0  ;;  %v2072_v37 = vmax.f32 %v7185_v19, %v7187_v13 }
 0x307   : > { %v7193_v42 = vpop.f32.mrb[7].mxu0 }
 0x308   : > { %2073 = vmax.xlane.f32.xlu1 %v2072_v37  ;;  %v2075_v47 = vmax.f32 %v7189_v35, %v7193_v42 }
 0x30c   : > { %2076 = vmax.xlane.f32.xlu1 %v2075_v47  ;;  %v7197_v49 = vpop.f32.mrb[8].mxu0 }
 0x30d   : > { %v7199_v55 = vpop.f32.mrb[9].mxu0 }
 0x30e   : > { %v7201_v59 = vpop.f32.mrb[10].mxu0  ;;  %v2078_v62 = vmax.f32 %v7197_v49, %v7199_v55 }
 0x30f   : > { %v7205_v43 = vpop.f32.mrb[11].mxu0 }
 0x310   : > { %2079 = vmax.xlane.f32.xlu0 %v2078_v62  ;;  %v2081_v61 = vmax.f32 %v7201_v59, %v7205_v43 }
 0x312   : > { %2082 = vmax.xlane.f32.xlu1 %v2081_v61 }
 0x314   : > { %v7209_v1 = vpop.f32.mrb[12].mxu0 }
 0x315   : > { %v7211_v54 = vpop.f32.mrb[13].mxu0 }
 0x316   : > { %v7213_v3 = vpop.f32.mrb[14].mxu0  ;;  %v2084_v8 = vmax.f32 %v7209_v1, %v7211_v54 }
 0x317   : > { %v7217_v9 = vpop.f32.mrb[15].mxu0 }
 0x318   : > { %2085 = vmax.xlane.f32.xlu0 %v2084_v8  ;;  %v2087_v16 = vmax.f32 %v7213_v3, %v7217_v9 }
 0x31a   : > { %2088 = vmax.xlane.f32.xlu1 %v2087_v16 }
 0x31c   : > { %v7221_v17 = vpop.f32.mrb[16].mxu0 }
 0x31d   : > { %v7223_v20 = vpop.f32.mrb[17].mxu0 }
 0x31e   : > { %v7225_v21 = vpop.f32.mrb[18].mxu0  ;;  %v2090_v22 = vmax.f32 %v7221_v17, %v7223_v20 }
 0x31f   : > { %v7229_v23 = vpop.f32.mrb[19].mxu0 }
 0x320   : > { %2091 = vmax.xlane.f32.xlu0 %v2090_v22  ;;  %v2093_v24 = vmax.f32 %v7225_v21, %v7229_v23 }
 0x322   : > { %2094 = vmax.xlane.f32.xlu1 %v2093_v24 }
 0x324   : > { %v7233_v27 = vpop.f32.mrb[20].mxu0 }
 0x325   : > { %v7235_v30 = vpop.f32.mrb[21].mxu0 }
 0x326   : > { %v7237_v33 = vpop.f32.mrb[22].mxu0  ;;  %v2096_v6 = vmax.f32 %v7233_v27, %v7235_v30 }
 0x327   : > { %v7241_v12 = vpop.f32.mrb[23].mxu0 }
 0x328   : > { %2097 = vmax.xlane.f32.xlu1 %v2096_v6  ;;  %v2099_v18 = vmax.f32 %v7237_v33, %v7241_v12 }
 0x32a   : > { %2100 = vmax.xlane.f32.xlu0 %v2099_v18 }
 0x32c   : > { %v7245_v37 = vpop.f32.mrb[24].mxu0 }
 0x32d   : > { %v7247_v47 = vpop.f32.mrb[25].mxu0 }
 0x32e   : > { %v7249_v62 = vpop.f32.mrb[26].mxu0  ;;  %v2102_v61 = vmax.f32 %v7245_v37, %v7247_v47 }
 0x32f   : > { %v7253_v8 = vpop.f32.mrb[27].mxu0 }
 0x330   : > { %v2105_v16 = vmax.f32 %v7249_v62, %v7253_v8 }
 0x334   : > { %v7257_v22 = vpop.f32.mrb[28].mxu0 }
 0x335   : > { %v7259_v24 = vpop.f32.mrb[29].mxu0 }
 0x336   : > { %v7261_v6 = vpop.f32.mrb[30].mxu0  ;;  %v2108_v18 = vmax.f32 %v7257_v22, %v7259_v24 }
 0x337   : > { %v7265_v5 = vpop.f32.mrb[31].mxu0 }
 0x338   : > { %v2111_v0 = vmax.f32 %v7261_v6, %v7265_v5 }
 0x339   : > { %2477 = vrot.lane.b32.xlu1 %v7049_v25, %s6253_s26  ;;  %v7285_v25 = vpop.permute.xlu0 %2453 }
 0x340   : > { %2461 = vrot.lane.b32.xlu0 %v7053_v26, %s6253_s26  ;;  %v7291_v26 = vpop.permute.xlu1 %2471 }
 0x35d   : > { %2103 = vmax.xlane.f32.xlu1 %v2102_v61 }
 0x35f   : > { %2106 = vmax.xlane.f32.xlu0 %v2105_v16 }
 0x361   : > { %2109 = vmax.xlane.f32.xlu1 %v2108_v18 }
 0x363   : > { %2112 = vmax.xlane.f32.xlu0 %v2111_v0 }
 0x372   : > { %2479 = vrot.lane.b32.xlu1 %v7057_v28, %s6253_s26  ;;  %v7297_v28 = vpop.permute.xlu0 %2455 }
 0x376   : > { %2481 = vrot.lane.b32.xlu1 %v7065_v31, %s6253_s26  ;;  %v7305_v31 = vld [vmem:[#allocation2 + $0x198] sm:$0xff] }
 0x379   : > { %2463 = vrot.lane.b32.xlu0 %v7061_v29, %s6253_s26  ;;  %v7299_v29 = vpop.permute.xlu1 %2473 }
 0x37a   : > { %2421 = vrot.lane.b32.xlu1 %v7074_v34, %s6253_s26  ;;  %v7315_v34 = vld [vmem:[#allocation2 + $0x1c8] sm:$0xff] }
 0x37b   : > { %8970 = vst [vmem:[#allocation7_spill] sm:$0xff] %v7315_v34 }
 0x37d   : > { %2465 = vrot.lane.b32.xlu0 %v7069_v32, %s6253_s26  ;;  %v7307_v32 = vpop.permute.xlu0 %2457 }
 0x37e   : > { %2425 = vrot.lane.b32.xlu1 %v7088_v38, %s6253_s26 }
 0x381   : > { %2419 = vrot.lane.b32.xlu0 %v7030_v2, %s6253_s26  ;;  %v7313_v2 = vpop.permute.xlu1 %2459 }
 0x382   : > { %2429 = vrot.lane.b32.xlu1 %v7102_v40, %s6253_s26 }
 0x385   : > { %2423 = vrot.lane.b32.xlu0 %v7081_v36, %s6253_s26  ;;  %v7327_v16 = vpop.permute.xlu1 %2475 }
 0x386   : > { %2433 = vrot.lane.b32.xlu1 %v7116_v44, %s6253_s26  ;;  %v7321_v44 = vld [vmem:[#allocation2 + $0x18] sm:$0xff] }
 0x389   : > { %2427 = vrot.lane.b32.xlu0 %v7095_v39, %s6253_s26  ;;  %v7325_v39 = vld [vmem:[#allocation2 + $0x1f8] sm:$0xff] }
 0x38a   : > { %3695 = vrot.lane.b32.xlu1 %v7305_v31, %s6253_s26  ;;  %8971 = vst [vmem:[#allocation8_spill] sm:$0xff] %v7325_v39 }
 0x38d   : > { %v2068_v38 = vpop.xlane.xlu0 %2067  ;;  %2431 = vrot.lane.b32.xlu0 %v7109_v41, %s6253_s26 }
 0x38e   : > { %v2114_v36 = vsub.f32 %v7173_v7, %v2068_v38  ;;  %v2115_v40 = vsub.f32 %v7175_v10, %v2068_v38  ;;  %3697 = vrot.lane.b32.xlu1 %v7315_v34, %s6253_s26  ;;  %v7333_v10 = vld [vmem:[#allocation2 + $0x48] sm:$0xff] }
 0x38f   : > { %v7337_v38 = vld [vmem:[#allocation2 + $0x228] sm:$0xff] }
 0x390   : > { %v2146_v0 = vmul.f32 1.442695, %v2114_v36  ;;  %v2148_v61 = vmul.f32 1.442695, %v2115_v40  ;;  %8972 = vst [vmem:[#allocation9_spill] sm:$0xff] %v7337_v38 }
 0x391   : > { %v2071_v18 = vpop.xlane.xlu0 %2070  ;;  %3679 = vrot.lane.b32.xlu0 %v7321_v44, %s6253_s26 }
 0x392   : > { %5829 = vpow2.f32 %v2146_v0  ;;  %v2116_v41 = vsub.f32 %v7177_v11, %v2071_v18  ;;  %v2117_v7 = vsub.f32 %v7181_v14, %v2071_v18  ;;  %3699 = vrot.lane.b32.xlu1 %v7325_v39, %s6253_s26  ;;  %v7343_v14 = vld [vmem:[#allocation2 + $0x78] sm:$0xff] }
 0x393   : > { %5831 = vpow2.f32 %v2148_v61  ;;  %8973 = vst [vmem:[#allocation10_spill] sm:$0xff] %v7343_v14  ;;  %v7347_v61 = vld [vmem:[#allocation2 + $0x258] sm:$0xff] }
 0x394   : > { %v2150_v36 = vmul.f32 1.442695, %v2116_v41  ;;  %v2152_v40 = vmul.f32 1.442695, %v2117_v7  ;;  %8974 = vst [vmem:[#allocation11_spill] sm:$0xff] %v7347_v61 }
 0x395   : > { %v2074_v34 = vpop.xlane.xlu1 %2073  ;;  %3681 = vrot.lane.b32.xlu0 %v7333_v10, %s6253_s26 }
 0x396   : > { %5833 = vpow2.f32 %v2150_v36  ;;  %v2118_v0 = vsub.f32 %v7185_v19, %v2074_v34  ;;  %v2119_v11 = vsub.f32 %v7187_v13, %v2074_v34  ;;  %3701 = vrot.lane.b32.xlu1 %v7337_v38, %s6253_s26  ;;  %v7353_v13 = vld [vmem:[#allocation2 + $0xa8] sm:$0xff] }
 0x397   : > { %5835 = vpow2.f32 %v2152_v40  ;;  %8975 = vst [vmem:[#allocation12_spill] sm:$0xff] %v7353_v13  ;;  %v7357_v34 = vld [vmem:[#allocation2 + $0x288] sm:$0xff] }
 0x398   : > { %v2154_v18 = vmul.f32 1.442695, %v2118_v0  ;;  %v2156_v41 = vmul.f32 1.442695, %v2119_v11  ;;  %8976 = vst [vmem:[#allocation13_spill] sm:$0xff] %v7357_v34 }
 0x399   : > { %v2077_v7 = vpop.xlane.xlu1 %2076  ;;  %3683 = vrot.lane.b32.xlu0 %v7343_v14, %s6253_s26 }
 0x39a   : > { %5837 = vpow2.f32 %v2154_v18  ;;  %v2120_v36 = vsub.f32 %v7189_v35, %v2077_v7  ;;  %v2121_v19 = vsub.f32 %v7193_v42, %v2077_v7  ;;  %3703 = vrot.lane.b32.xlu1 %v7347_v61, %s6253_s26  ;;  %v7363_v18 = vld [vmem:[#allocation2 + $0xd8] sm:$0xff] }
 0x39b   : > { %5839 = vpow2.f32 %v2156_v41 }
 0x39c   : > { %v5830_v40 = vpop.eup %5829  ;;  %v2158_v0 = vmul.f32 1.442695, %v2120_v36  ;;  %v2160_v11 = vmul.f32 1.442695, %v2121_v19  ;;  %v7369_v36 = vld [vmem:[#allocation2 + $0x2b8] sm:$0xff] }
 0x39d   : > { %v5832_v38 = vpop.eup %5831  ;;  %v2080_v39 = vpop.xlane.xlu0 %2079  ;;  %3685 = vrot.lane.b32.xlu0 %v7353_v13, %s6253_s26 }
 0x39e   : > { %5841 = vpow2.f32 %v2158_v0  ;;  %v2122_v35 = vsub.f32 %v7197_v49, %v2080_v39  ;;  %v2123_v42 = vsub.f32 %v7199_v55, %v2080_v39  ;;  %3705 = vrot.lane.b32.xlu1 %v7357_v34, %s6253_s26  ;;  %v7367_v41 = vadd.f32 %v5832_v38, %v5830_v40 }
 0x39f   : > { %5843 = vpow2.f32 %v2160_v11  ;;  %v2083_v7 = vpop.xlane.xlu1 %2082  ;;  %v7375_v11 = vld [vmem:[#allocation2 + $0x108] sm:$0xff] }
 0x3a0   : > { %8977 = vst [vmem:[#allocation14_spill] sm:$0xff] %v7367_v41  ;;  %v5834_v19 = vpop.eup %5833  ;;  %v2162_v61 = vmul.f32 1.442695, %v2122_v35  ;;  %v2164_v14 = vmul.f32 1.442695, %v2123_v42  ;;  %v2124_v0 = vsub.f32 %v7201_v59, %v2083_v7  ;;  %v2125_v49 = vsub.f32 %v7205_v43, %v2083_v7  ;;  %v7379_v35 = vld [vmem:[#allocation2 + $0x2e8] sm:$0xff] }
 0x3a1   : > { %v5836_v13 = vpop.eup %5835  ;;  %v2258_v55 = vpack.c.bf16 %v5834_v19, %v5830_v40  ;;  %3687 = vrot.lane.b32.xlu0 %v7363_v18, %s6253_s26  ;;  %v7389_v42 = vld [vmem:[#allocation2 + $0x138] sm:$0xff] }
 0x3a2   : > { %5845 = vpow2.f32 %v2162_v61  ;;  %v2166_v39 = vmul.f32 1.442695, %v2124_v0  ;;  %v2168_v34 = vmul.f32 1.442695, %v2125_v49  ;;  %v2259_v41 = vpack.c.bf16 %v5836_v13, %v5832_v38  ;;  %3707 = vrot.lane.b32.xlu1 %v7369_v36, %s6253_s26 }
 0x3a3   : > { %5847 = vpow2.f32 %v2164_v14  ;;  %v7381_v59 = vadd.f32 %v5836_v13, %v5834_v19  ;;  %v2508_v61 = vsel %vm1880_vm0, %v7277_v4, 0 }
 0x3a4   : > { %v5838_v43 = vpop.eup %5837  ;;  %5849 = vpow2.f32 %v2166_v39  ;;  %2306 = vmatprep.mubr.bf16.mxu1 %v2259_v41 }
 0x3a5   : > { %8978 = vst [vmem:[#allocation15_spill] sm:$0xff] %v7381_v59  ;;  %v5840_v40 = vpop.eup %5839  ;;  %5851 = vpow2.f32 %v2168_v34  ;;  %2307 = vmatmul.mubr.bf16.vlgmr.msra.gmra.mrb[0].mxu1 %v2258_v55  ;;  %v2086_v38 = vpop.xlane.xlu0 %2085  ;;  %3689 = vrot.lane.b32.xlu0 %v7375_v11, %s6253_s26  ;;  %v7398_v34 = vld [vmem:[%s7027_s28 + $0x38] sm:$0xff] }
 0x3a6   : > { %5165 = vmatpush3.bf16.xpose.msra.mxu1 %v2508_v61  ;;  %v2126_v14 = vsub.f32 %v7209_v1, %v2086_v38  ;;  %v2127_v13 = vsub.f32 %v7211_v54, %v2086_v38  ;;  %3709 = vrot.lane.b32.xlu1 %v7379_v35, %s6253_s26  ;;  %v7393_v41 = vadd.f32 %v5840_v40, %v5838_v43 }
 0x3a7   : > { %5525 = vmatprep.subr.msk.bf16.mxu1 %vm1880_vm0, %v7279_v60  ;;  %v2089_v4 = vpop.xlane.xlu1 %2088  ;;  %v7404_v60 = vld [vmem:[#allocation2 + $0x168] sm:$0xff] }
 0x3a8   : > { %8979 = vst [vmem:[#allocation16_spill] sm:$0xff] %v7393_v41  ;;  %v5842_v7 = vpop.eup %5841  ;;  %v2170_v19 = vmul.f32 1.442695, %v2126_v14  ;;  %v2172_v0 = vmul.f32 1.442695, %v2127_v13  ;;  %v2128_v1 = vsub.f32 %v7213_v3, %v2089_v4  ;;  %v2129_v54 = vsub.f32 %v7217_v9, %v2089_v4 }
 0x3a9   : > { %v5844_v49 = vpop.eup %5843  ;;  %v2260_v55 = vpack.c.bf16 %v5842_v7, %v5838_v43  ;;  %3691 = vrot.lane.b32.xlu0 %v7389_v42, %s6253_s26  ;;  %v2511_v43 = vsel %vm1880_vm0, %v7285_v25, 0 }
 0x3aa   : > { %5853 = vpow2.f32 %v2170_v19  ;;  %v2174_v39 = vmul.f32 1.442695, %v2128_v1  ;;  %v2176_v61 = vmul.f32 1.442695, %v2129_v54  ;;  %v2261_v38 = vpack.c.bf16 %v5844_v49, %v5840_v40  ;;  %3649 = vrot.lane.b32.xlu1 %v7398_v34, %s6253_s26  ;;  %v7417_v19 = vld [vmem:[%s7027_s28 + $0x8] sm:$0xff] }
 0x3ab   : > { %5855 = vpow2.f32 %v2172_v0  ;;  %v7408_v14 = vadd.f32 %v5844_v49, %v5842_v7 }
 0x3ac   : > { %v5846_v3 = vpop.eup %5845  ;;  %5857 = vpow2.f32 %v2174_v39  ;;  %2314 = vmatprep.mubr.bf16.mxu1 %v2261_v38 }
 0x3ad   : > { %8980 = vst [vmem:[#allocation17_spill] sm:$0xff] %v7408_v14  ;;  %v5848_v9 = vpop.eup %5847  ;;  %5859 = vpow2.f32 %v2176_v61  ;;  %2315 = vmatmul.mubr.bf16.gmra.mrb[4].mxu1 %v2260_v55  ;;  %v2092_v13 = vpop.xlane.xlu0 %2091  ;;  %3693 = vrot.lane.b32.xlu0 %v7404_v60, %s6253_s26 }
 0x3ae   : > { %v5850_v40 = vpop.eup %5849  ;;  %5167 = vmatpush3.bf16.xpose.msra.mxu1 %v2511_v43  ;;  %v2130_v4 = vsub.f32 %v7221_v17, %v2092_v13  ;;  %v2131_v7 = vsub.f32 %v7223_v20, %v2092_v13  ;;  %v7419_v0 = vadd.f32 %v5848_v9, %v5846_v3  ;;  %v7428_v20 = vld [vmem:[%s7027_s28 + $0x98] sm:$0xff] }
 0x3af   : > { %v5852_v1 = vpop.eup %5851  ;;  %5526 = vmatprep.subr.msk.bf16.mxu1 %vm1880_vm0, %v7291_v26  ;;  %v2095_v25 = vpop.xlane.xlu1 %2094  ;;  %v2262_v54 = vpack.c.bf16 %v5850_v40, %v5846_v3  ;;  %v7433_v26 = vld [vmem:[%s7027_s28 + $0x68] sm:$0xff]  ;;  %3653 = vrot.lane.b32.xlu1 %v7428_v20, %s6253_s26  ;;  %v2514_v3 = vsel %vm1880_vm0, %v7297_v28, 0 }
 0x3b0   : > { %8981 = vst [vmem:[#allocation18_spill] sm:$0xff] %v7419_v0  ;;  %v2178_v49 = vmul.f32 1.442695, %v2130_v4  ;;  %v2180_v55 = vmul.f32 1.442695, %v2131_v7  ;;  %v2132_v39 = vsub.f32 %v7225_v21, %v2095_v25  ;;  %v2133_v61 = vsub.f32 %v7229_v23, %v2095_v25 }
 0x3b1   : > { %v2263_v17 = vpack.c.bf16 %v5852_v1, %v5848_v9  ;;  %3647 = vrot.lane.b32.xlu0 %v7417_v19, %s6253_s26  ;;  %v7430_v38 = vadd.f32 %v5852_v1, %v5850_v40 }
 0x3b2   : > { %5861 = vpow2.f32 %v2178_v49  ;;  %v2182_v43 = vmul.f32 1.442695, %v2132_v39  ;;  %v2184_v13 = vmul.f32 1.442695, %v2133_v61 }
 0x3b3   : > { %8982 = vst [vmem:[#allocation19_spill] sm:$0xff] %v7430_v38  ;;  %5863 = vpow2.f32 %v2180_v55  ;;  %2322 = vmatprep.mubr.bf16.mxu1 %v2263_v17 }
 0x3b4   : > { %v5854_v21 = vpop.eup %5853  ;;  %5865 = vpow2.f32 %v2182_v43 }
 0x3b5   : > { %v5856_v23 = vpop.eup %5855  ;;  %5867 = vpow2.f32 %v2184_v13  ;;  %2323 = vmatmul.mubr.bf16.gmra.mrb[8].mxu1 %v2262_v54  ;;  %v2098_v9 = vpop.xlane.xlu1 %2097  ;;  %3651 = vrot.lane.b32.xlu0 %v7433_v26, %s6253_s26 }
 0x3b6   : > { %v5858_v40 = vpop.eup %5857  ;;  %5169 = vmatpush3.bf16.xpose.msra.mxu1 %v2514_v3  ;;  %v2134_v4 = vsub.f32 %v7233_v27, %v2098_v9  ;;  %v2135_v7 = vsub.f32 %v7235_v30, %v2098_v9  ;;  %v7443_v1 = vadd.f32 %v5856_v23, %v5854_v21 }
 0x3b7   : > { %v5860_v25 = vpop.eup %5859  ;;  %5527 = vmatprep.subr.msk.bf16.mxu1 %vm1880_vm0, %v7299_v29  ;;  %v2101_v49 = vpop.xlane.xlu0 %2100  ;;  %v2264_v28 = vpack.c.bf16 %v5858_v40, %v5854_v21  ;;  %v2517_v29 = vsel %vm1880_vm0, %v7307_v32, 0  ;;  %v2520_v32 = vsel %vm1880_vm0, %v7313_v2, 0 }
 0x3b8   : > { %8983 = vst [vmem:[#allocation20_spill] sm:$0xff] %v7443_v1  ;;  %v2186_v55 = vmul.f32 1.442695, %v2134_v4  ;;  %v2188_v54 = vmul.f32 1.442695, %v2135_v7  ;;  %v2136_v39 = vsub.f32 %v7237_v33, %v2101_v49  ;;  %v2137_v61 = vsub.f32 %v7241_v12, %v2101_v49 }
 0x3b9   : > { %v2265_v17 = vpack.c.bf16 %v5860_v25, %v5856_v23  ;;  %v7449_v43 = vadd.f32 %v5860_v25, %v5858_v40  ;;  %v2478_v49 = vpop.permute.xlu1 %2477 }
 0x3ba   : > { %5869 = vpow2.f32 %v2186_v55  ;;  %v2190_v27 = vmul.f32 1.442695, %v2136_v39  ;;  %v2192_v30 = vmul.f32 1.442695, %v2137_v61 }
 0x3bb   : > { %8984 = vst [vmem:[#allocation21_spill] sm:$0xff] %v7449_v43  ;;  %5871 = vpow2.f32 %v2188_v54  ;;  %2330 = vmatprep.mubr.bf16.mxu1 %v2265_v17  ;;  %v2462_v61 = vpop.permute.xlu0 %2461  ;;  %v7468_v17 = vld [vmem:[%s7027_s28 + $0xc8] sm:$0xff] }
 0x3bc   : > { %v5862_v13 = vpop.eup %5861  ;;  %5873 = vpow2.f32 %v2190_v27  ;;  %v2523_v2 = vsel %vm1880_vm0, %v2462_v61, 0  ;;  %3655 = vrot.lane.b32.xlu0 %v7468_v17, %s6253_s26  ;;  %v7473_v27 = vld [vmem:[%s7027_s28 + $0xf8] sm:$0xff] }
 0x3bd   : > { %v5864_v3 = vpop.eup %5863  ;;  %5875 = vpow2.f32 %v2192_v30  ;;  %2331 = vmatmul.mubr.bf16.gmra.mrb[12].mxu1 %v2264_v28  ;;  %3657 = vrot.lane.b32.xlu1 %v7473_v27, %s6253_s26  ;;  %v7478_v30 = vld [vmem:[%s7027_s28 + $0x128] sm:$0xff] }
 0x3be   : > { %v5866_v21 = vpop.eup %5865  ;;  %5171 = vmatpush3.bf16.xpose.msra.mxu1 %v2517_v29  ;;  %v7453_v33 = vadd.f32 %v5864_v3, %v5862_v13 }
 0x3bf   : > { %v5868_v12 = vpop.eup %5867  ;;  %5528 = vmatprep.subr.msk.bf16.mxu1 %vm1880_vm0, %v7327_v16  ;;  %v2266_v23 = vpack.c.bf16 %v5866_v21, %v5862_v13 }
 0x3c0   : > { %8985 = vst [vmem:[#allocation22_spill] sm:$0xff] %v7453_v33  ;;  %v2267_v9 = vpack.c.bf16 %v5868_v12, %v5864_v3  ;;  %v7457_v40 = vadd.f32 %v5868_v12, %v5866_v21  ;;  %3659 = vrot.lane.b32.xlu0 %v7478_v30, %s6253_s26 }
 0x3c2   : > { %8986 = vst [vmem:[#allocation23_spill] sm:$0xff] %v7457_v40  ;;  %2338 = vmatprep.mubr.bf16.mxu1 %v2267_v9 }
 0x3c4   : > { %v5870_v4 = vpop.eup %5869  ;;  %2908 = vrot.lane.b32.xlu0 %v7124_v45, %s6253_s26 }
 0x3c5   : > { %v5872_v7 = vpop.eup %5871  ;;  %2339 = vmatmul.mubr.bf16.gmra.mrb[16].mxu1 %v2266_v23 }
 0x3c6   : > { %v5874_v25 = vpop.eup %5873  ;;  %5173 = vmatpush3.bf16.xpose.msra.mxu1 %v2520_v32  ;;  %v7461_v28 = vadd.f32 %v5872_v7, %v5870_v4 }
 0x3c7   : > { %v5876_v16 = vpop.eup %5875  ;;  %5529 = vmatprep.subr.msk.bf16.mxu1 %vm1880_vm0, %v2478_v49  ;;  %v2268_v55 = vpack.c.bf16 %v5874_v25, %v5870_v4 }
 0x3c8   : > { %8987 = vst [vmem:[#allocation24_spill] sm:$0xff] %v7461_v28  ;;  %v2269_v54 = vpack.c.bf16 %v5876_v16, %v5872_v7  ;;  %v7464_v39 = vadd.f32 %v5876_v16, %v5874_v25  ;;  %v7491_v16 = vld [vmem:[%s7027_s28 + $0x158] sm:$0xff]  ;;  %2910 = vrot.lane.b32.xlu0 %v7128_v48, %s6253_s26 }
 0x3c9   : > { %3661 = vrot.lane.b32.xlu1 %v7491_v16, %s6253_s26 }
 0x3ca   : > { %8988 = vst [vmem:[#allocation25_spill] sm:$0xff] %v7464_v39  ;;  %2346 = vmatprep.mubr.bf16.mxu1 %v2269_v54 }
 0x3cc   : > { %2912 = vrot.lane.b32.xlu0 %v7136_v51, %s6253_s26 }
 0x3cd   : > { %2347 = vmatmul.mubr.bf16.gmra.mrb[20].mxu1 %v2268_v55  ;;  %2892 = vrot.lane.b32.xlu1 %v7126_v46, %s6253_s26 }
 0x3ce   : > { %5175 = vmatpush3.bf16.xpose.msra.mxu1 %v2523_v2 }
 0x3d0   : > { %2914 = vrot.lane.b32.xlu0 %v7140_v53, %s6253_s26 }
 0x3d1   : > { %2894 = vrot.lane.b32.xlu1 %v7133_v50, %s6253_s26 }
 0x3d4   : > { %2916 = vrot.lane.b32.xlu0 %v7148_v57, %s6253_s26 }
 0x3d5   : > { %2896 = vrot.lane.b32.xlu1 %v7138_v52, %s6253_s26 }
 0x3d8   : > { %2918 = vrot.lane.b32.xlu0 %v7153_v58, %s6253_s26  ;;  %v8995_v58 = vld [vmem:[#allocation4_spill] sm:$0xff] }
 0x3d9   : > { %2898 = vrot.lane.b32.xlu1 %v7145_v56, %s6253_s26  ;;  %v8994_v56 = vld [vmem:[#allocation5_spill] sm:$0xff] }
 0x3dc   : > { %2920 = vrot.lane.b32.xlu0 %v7159_v63, %s6253_s26  ;;  %v8996_v63 = vld [vmem:[#allocation7_spill] sm:$0xff] }
 0x3dd   : > { %2900 = vrot.lane.b32.xlu1 %v7150_v15, %s6253_s26 }
 0x3e0   : > { %2922 = vrot.lane.b32.xlu0 %v8994_v56, %s6253_s26 }
 0x3ea   : > { %v2104_v13 = vpop.xlane.xlu1 %2103 }
 0x3eb   : > { %v2138_v3 = vsub.f32 %v7245_v37, %v2104_v13  ;;  %v2139_v29 = vsub.f32 %v7247_v47, %v2104_v13 }
 0x3ec   : > { %v2107_v21 = vpop.xlane.xlu0 %2106 }
 0x3ed   : > { %v2194_v12 = vmul.f32 1.442695, %v2138_v3  ;;  %v2196_v23 = vmul.f32 1.442695, %v2139_v29  ;;  %v2140_v9 = vsub.f32 %v7249_v62, %v2107_v21  ;;  %v2141_v4 = vsub.f32 %v7253_v8, %v2107_v21 }
 0x3ee   : > { %v2110_v7 = vpop.xlane.xlu1 %2109 }
 0x3ef   : > { %5877 = vpow2.f32 %v2194_v12  ;;  %v2198_v32 = vmul.f32 1.442695, %v2140_v9  ;;  %v2200_v25 = vmul.f32 1.442695, %v2141_v4  ;;  %v2142_v49 = vsub.f32 %v7257_v22, %v2110_v7 }
 0x3f0   : > { %5879 = vpow2.f32 %v2196_v23  ;;  %v2143_v37 = vsub.f32 %v7259_v24, %v2110_v7  ;;  %v2113_v47 = vpop.xlane.xlu0 %2112 }
 0x3f1   : > { %5881 = vpow2.f32 %v2198_v32  ;;  %v2202_v55 = vmul.f32 1.442695, %v2142_v49  ;;  %v2144_v62 = vsub.f32 %v7261_v6, %v2113_v47  ;;  %v2145_v8 = vsub.f32 %v7265_v5, %v2113_v47 }
 0x3f2   : > { %5883 = vpow2.f32 %v2200_v25  ;;  %v2204_v45 = vmul.f32 1.442695, %v2143_v37  ;;  %v2480_v22 = vpop.permute.xlu1 %2479  ;;  %v3134_v49 = vsel %vm1880_vm0, %v7321_v44, 0  ;;  %v8997_v37 = vld [vmem:[#allocation6_spill] sm:$0xff]  ;;  %v3137_v47 = vsel %vm1880_vm0, %v7333_v10, 0  ;;  %v8998_v44 = vld [vmem:[#allocation8_spill] sm:$0xff] }
 0x3f3   : > { %5885 = vpow2.f32 %v2202_v55  ;;  %v2206_v24 = vmul.f32 1.442695, %v2144_v62  ;;  %v2208_v54 = vmul.f32 1.442695, %v2145_v8  ;;  %5530 = vmatprep.subr.msk.bf16.mxu1 %vm1880_vm0, %v2480_v22  ;;  %v8999_v62 = vld [vmem:[#allocation10_spill] sm:$0xff]  ;;  %v9000_v22 = vld [vmem:[#allocation9_spill] sm:$0xff] }
 0x3f4   : > { %5887 = vpow2.f32 %v2204_v45  ;;  %v2464_v61 = vpop.permute.xlu0 %2463  ;;  %v3140_v8 = vsel %vm1880_vm0, %v8999_v62, 0  ;;  %v9001_v10 = vld [vmem:[#allocation12_spill] sm:$0xff] }
 0x3f5   : > { %5889 = vpow2.f32 %v2206_v24  ;;  %v2526_v6 = vsel %vm1880_vm0, %v2464_v61, 0  ;;  %v3143_v24 = vsel %vm1880_vm0, %v9001_v10, 0  ;;  %v7563_v61 = vld [vmem:[#allocation2 + $0x28] sm:$0xff] }
 0x3f6   : > { %5891 = vpow2.f32 %v2208_v54  ;;  %5177 = vmatpush3.bf16.xpose.msra.mxu1 %v2526_v6  ;;  %v2482_v48 = vpop.permute.xlu1 %2481  ;;  %v7566_v6 = vld [vmem:[#allocation2 + $0x1a8] sm:$0xff] }
 0x3f7   : > { %5531 = vmatprep.subr.msk.bf16.mxu1 %vm1880_vm0, %v2482_v48  ;;  %v9002_v48 = vld [vmem:[#allocation11_spill] sm:$0xff]  ;;  %4136 = vrot.lane.b32.xlu0 %v7566_v6, %s6253_s26 }
 0x3f8   : > { %v2466_v5 = vpop.permute.xlu0 %2465 }
 0x3f9   : > { %v5878_v2 = vpop.eup %5877  ;;  %v2529_v46 = vsel %vm1880_vm0, %v2466_v5, 0  ;;  %v7572_v5 = vld [vmem:[#allocation2 + $0x1d8] sm:$0xff] }
 0x3fa   : > { %v5880_v13 = vpop.eup %5879  ;;  %v2422_v15 = vpop.permute.xlu1 %2421 }
 0x3fb   : > { %v5882_v3 = vpop.eup %5881  ;;  %v7511_v29 = vadd.f32 %v5880_v13, %v5878_v2 }
 0x3fc   : > { %v5884_v51 = vpop.eup %5883  ;;  %v2270_v21 = vpack.c.bf16 %v5882_v3, %v5878_v2  ;;  %v2420_v57 = vpop.permute.xlu0 %2419  ;;  %v7576_v2 = vld [vmem:[#allocation2 + $0x208] sm:$0xff] }
 0x3fd   : > { %8989 = vst [vmem:[#allocation26_spill] sm:$0xff] %v7511_v29  ;;  %v5886_v12 = vpop.eup %5885  ;;  %v2271_v23 = vpack.c.bf16 %v5884_v51, %v5880_v13  ;;  %v7517_v50 = vadd.f32 %v5884_v51, %v5882_v3  ;;  %v3146_v13 = vsel %vm1880_vm0, %v7363_v18, 0  ;;  %4140 = vrot.lane.b32.xlu0 %v7576_v2, %s6253_s26  ;;  %v7587_v51 = vld [vmem:[#allocation2 + $0x238] sm:$0xff]  ;;  %v7594_v18 = vld [vmem:[#allocation2 + $0x88] sm:$0xff] }
 0x3fe   : > { %v5888_v9 = vpop.eup %5887  ;;  %5179 = vmatpush3.bf16.xpose.msra.mxu1 %v2529_v46  ;;  %v2426_v45 = vpop.permute.xlu1 %2425  ;;  %v7582_v46 = vld [vmem:[#allocation2 + $0x58] sm:$0xff] }
 0x3ff   : > { %8990 = vst [vmem:[#allocation27_spill] sm:$0xff] %v7517_v50  ;;  %v5890_v53 = vpop.eup %5889  ;;  %2354 = vmatprep.mubr.bf16.mxu1 %v2271_v23  ;;  %5532 = vmatprep.subr.msk.bf16.mxu1 %vm1880_vm0, %v7305_v31  ;;  %v7521_v4 = vadd.f32 %v5888_v9, %v5886_v12  ;;  %v8993_v31 = vld [vmem:[#allocation3_spill] sm:$0xff]  ;;  %v3149_v23 = vsel %vm1880_vm0, %v7375_v11, 0  ;;  %v7616_v11 = vld [vmem:[#allocation2 + $0xe8] sm:$0xff] }
 0x400   : > { %v5892_v7 = vpop.eup %5891  ;;  %2355 = vmatmul.mubr.bf16.gmra.mrb[24].mxu1 %v2270_v21  ;;  %v2272_v32 = vpack.c.bf16 %v5890_v53, %v5886_v12  ;;  %2902 = vrot.lane.b32.xlu1 %v8993_v31, %s6253_s26  ;;  %v2424_v55 = vpop.permute.xlu0 %2423  ;;  %v9003_v21 = vld [vmem:[#allocation13_spill] sm:$0xff]  ;;  %v7598_v12 = vld [vmem:[#allocation2 + $0x268] sm:$0xff] }
 0x401   : > { %8991 = vst [vmem:[#allocation28_spill] sm:$0xff] %v7521_v4  ;;  %v2273_v25 = vpack.c.bf16 %v5892_v7, %v5888_v9  ;;  %v7527_v52 = vadd.f32 %v5892_v7, %v5890_v53  ;;  %4142 = vrot.lane.b32.xlu0 %v7587_v51, %s6253_s26  ;;  %v7604_v53 = vld [vmem:[#allocation2 + $0xb8] sm:$0xff]  ;;  %v7850_v50 = vld [vmem:[#allocation2 + $0x148] sm:$0xff] }
 0x402   : > { %v2430_v3 = vpop.permute.xlu1 %2429  ;;  %v7609_v7 = vld [vmem:[#allocation2 + $0x298] sm:$0xff] }
 0x403   : > { %8992 = vst [vmem:[#allocation29_spill] sm:$0xff] %v7527_v52  ;;  %2362 = vmatprep.mubr.bf16.mxu1 %v2273_v25 }
 0x404   : > { %2904 = vrot.lane.b32.xlu1 %v8995_v58, %s6253_s26  ;;  %v2428_v54 = vpop.permute.xlu0 %2427 }
 0x405   : > { %4144 = vrot.lane.b32.xlu0 %v7598_v12, %s6253_s26 }
 0x406   : > { %v2434_v25 = vpop.permute.xlu1 %2433 }
 0x408   : > { %2363 = vmatmul.mubr.bf16.gmra.mrb[28].mxu1 %v2272_v32  ;;  %2906 = vrot.lane.b32.xlu1 %v8997_v37, %s6253_s26  ;;  %v2432_v9 = vpop.permute.xlu0 %2431  ;;  %v3152_v32 = vsel %vm1880_vm0, %v7389_v42, 0 }
 0x409   : > { %5180 = vmatprep.mubr.msk.bf16.mxu1 %vm1880_vm0, %v2420_v57  ;;  %4146 = vrot.lane.b32.xlu0 %v7609_v7, %s6253_s26 }
 0x40a   : > { %v3696_v42 = vpop.permute.xlu1 %3695 }
 0x40c   : > { %4120 = vrot.lane.b32.xlu1 %v7563_v61, %s6253_s26  ;;  %v3680_v31 = vpop.permute.xlu0 %3679 }
 0x40d   : > { %v3736_v56 = vsel %vm1880_vm0, %v3680_v31, 0 }
 0x40e   : > { %v3698_v58 = vpop.permute.xlu1 %3697 }
 0x410   : > { %5181 = vmatmul.mubr.msk.bf16.vlgmr.msra.gmra.mrb[32].mxu1 %vm1880_vm0, %v2420_v57  ;;  %4138 = vrot.lane.b32.xlu1 %v7572_v5, %s6253_s26  ;;  %v7624_v57 = vld [vmem:[#allocation2 + $0x118] sm:$0xff] }
 0x411   : > { %5261 = vmatpush3.bf16.xpose.msra.mxu1 %v3134_v49  ;;  %5182 = vmatprep.mubr.msk.bf16.mxu1 %vm1880_vm0, %v2422_v15 }
 0x412   : > { %5533 = vmatprep.subr.msk.bf16.mxu1 %vm1880_vm0, %v8996_v63  ;;  %v3700_v49 = vpop.permute.xlu1 %3699 }
 0x414   : > { %4122 = vrot.lane.b32.xlu1 %v7582_v46, %s6253_s26 }
 0x416   : > { %v3702_v63 = vpop.permute.xlu1 %3701 }
 0x418   : > { %5183 = vmatmul.mubr.msk.bf16.gmra.mrb[36].mxu1 %vm1880_vm0, %v2422_v15  ;;  %4124 = vrot.lane.b32.xlu1 %v7594_v18, %s6253_s26 }
 0x419   : > { %5263 = vmatpush3.bf16.xpose.msra.mxu1 %v3137_v47  ;;  %5184 = vmatprep.mubr.msk.bf16.mxu1 %vm1880_vm0, %v2424_v55 }
 0x41a   : > { %5534 = vmatprep.subr.msk.bf16.mxu1 %vm1880_vm0, %v8998_v44  ;;  %v3704_v47 = vpop.permute.xlu1 %3703 }
 0x41c   : > { %4126 = vrot.lane.b32.xlu1 %v7604_v53, %s6253_s26 }
 0x41e   : > { %v3706_v44 = vpop.permute.xlu1 %3705 }
 0x420   : > { %5185 = vmatmul.mubr.msk.bf16.gmra.mrb[40].mxu1 %vm1880_vm0, %v2424_v55  ;;  %4128 = vrot.lane.b32.xlu1 %v7616_v11, %s6253_s26 }
 0x421   : > { %5265 = vmatpush3.bf16.xpose.msra.mxu1 %v3140_v8  ;;  %5186 = vmatprep.mubr.msk.bf16.mxu1 %vm1880_vm0, %v2426_v45 }
 0x422   : > { %5535 = vmatprep.subr.msk.bf16.mxu1 %vm1880_vm0, %v9000_v22  ;;  %v3708_v8 = vpop.permute.xlu1 %3707 }
 0x424   : > { %4130 = vrot.lane.b32.xlu1 %v7624_v57, %s6253_s26 }
 0x428   : > { %5187 = vmatmul.mubr.msk.bf16.gmra.mrb[44].mxu1 %vm1880_vm0, %v2426_v45 }
 0x429   : > { %5267 = vmatpush3.bf16.xpose.msra.mxu1 %v3143_v24  ;;  %5188 = vmatprep.mubr.msk.bf16.mxu1 %vm1880_vm0, %v2428_v54 }
 0x42a   : > { %5536 = vmatprep.subr.msk.bf16.mxu1 %vm1880_vm0, %v9002_v48 }
 0x430   : > { %5189 = vmatmul.mubr.msk.bf16.gmra.mrb[48].mxu1 %vm1880_vm0, %v2428_v54 }
 0x431   : > { %5269 = vmatpush3.bf16.xpose.msra.mxu1 %v3146_v13  ;;  %5190 = vmatprep.mubr.msk.bf16.mxu1 %vm1880_vm0, %v2430_v3 }
 0x432   : > { %5537 = vmatprep.subr.msk.bf16.mxu1 %vm1880_vm0, %v9003_v21 }
 0x438   : > { %5191 = vmatmul.mubr.msk.bf16.gmra.mrb[52].mxu1 %vm1880_vm0, %v2430_v3  ;;  %v3710_v3 = vpop.permute.xlu1 %3709 }
 0x439   : > { %5271 = vmatpush3.bf16.xpose.msra.mxu1 %v3149_v23  ;;  %5192 = vmatprep.mubr.msk.bf16.mxu1 %vm1880_vm0, %v2432_v9 }
 0x43a   : > { %5538 = vmatprep.subr.msk.bf16.mxu1 %vm1880_vm0, %v7369_v36  ;;  %v3155_v36 = vsel %vm1880_vm0, %v7404_v60, 0 }
 0x440   : > { %5193 = vmatmul.mubr.msk.bf16.gmra.mrb[56].mxu1 %vm1880_vm0, %v2432_v9 }
 0x441   : > { %5273 = vmatpush3.bf16.xpose.msra.mxu1 %v3152_v32  ;;  %5194 = vmatprep.mubr.msk.bf16.mxu1 %vm1880_vm0, %v2434_v25 }
 0x442   : > { %5539 = vmatprep.subr.msk.bf16.mxu1 %vm1880_vm0, %v7379_v35  ;;  %v3682_v35 = vpop.permute.xlu0 %3681 }
 0x443   : > { %v3739_v60 = vsel %vm1880_vm0, %v3682_v35, 0 }
 0x448   : > { %5195 = vmatmul.mubr.msk.bf16.gmra.mrb[60].mxu1 %vm1880_vm0, %v2434_v25 }
 0x449   : > { %5275 = vmatpush3.bf16.xpose.msra.mxu1 %v3155_v36  ;;  %5276 = vmatprep.mubr.msk.bf16.mxu1 %vm1880_vm0, %v7417_v19 }
 0x44a   : > { %5540 = vmatprep.subr.msk.bf16.mxu1 %vm1880_vm0, %v3696_v42 }
 0x450   : > { %5277 = vmatmul.mubr.msk.bf16.vlgmr.msra.gmra.mrb[64].mxu1 %vm1880_vm0, %v7417_v19  ;;  %v3684_v19 = vpop.permute.xlu0 %3683 }
 0x451   : > { %5357 = vmatpush3.bf16.xpose.msra.mxu1 %v3736_v56  ;;  %5278 = vmatprep.mubr.msk.bf16.mxu1 %vm1880_vm0, %v7398_v34  ;;  %v3742_v15 = vsel %vm1880_vm0, %v3684_v19, 0  ;;  %v3650_v19 = vpop.permute.xlu1 %3649 }
 0x452   : > { %5541 = vmatprep.subr.msk.bf16.mxu1 %vm1880_vm0, %v3698_v58 }
 0x458   : > { %5279 = vmatmul.mubr.msk.bf16.gmra.mrb[68].mxu1 %vm1880_vm0, %v7398_v34  ;;  %v3686_v34 = vpop.permute.xlu0 %3685 }
 0x459   : > { %5359 = vmatpush3.bf16.xpose.msra.mxu1 %v3739_v60  ;;  %5280 = vmatprep.mubr.msk.bf16.mxu1 %vm1880_vm0, %v7433_v26  ;;  %v3745_v37 = vsel %vm1880_vm0, %v3686_v34, 0 }
 0x45a   : > { %5542 = vmatprep.subr.msk.bf16.mxu1 %vm1880_vm0, %v3700_v49 }
 0x460   : > { %5281 = vmatmul.mubr.msk.bf16.gmra.mrb[72].mxu1 %vm1880_vm0, %v7433_v26  ;;  %v3688_v26 = vpop.permute.xlu0 %3687 }
 0x461   : > { %5361 = vmatpush3.bf16.xpose.msra.mxu1 %v3742_v15  ;;  %5282 = vmatprep.mubr.msk.bf16.mxu1 %vm1880_vm0, %v7428_v20  ;;  %v3748_v55 = vsel %vm1880_vm0, %v3688_v26, 0  ;;  %v3654_v26 = vpop.permute.xlu1 %3653 }
 0x462   : > { %5543 = vmatprep.subr.msk.bf16.mxu1 %vm1880_vm0, %v3702_v63 }
 0x468   : > { %5283 = vmatmul.mubr.msk.bf16.gmra.mrb[76].mxu1 %vm1880_vm0, %v7428_v20  ;;  %v3690_v20 = vpop.permute.xlu0 %3689 }
 0x469   : > { %5363 = vmatpush3.bf16.xpose.msra.mxu1 %v3745_v37  ;;  %5284 = vmatprep.mubr.msk.bf16.mxu1 %vm1880_vm0, %v7468_v17  ;;  %v3751_v62 = vsel %vm1880_vm0, %v3690_v20, 0  ;;  %v3658_v20 = vpop.permute.xlu1 %3657 }
 0x46a   : > { %5544 = vmatprep.subr.msk.bf16.mxu1 %vm1880_vm0, %v3704_v47 }
 0x46c   : > { %v3692_v54 = vpop.permute.xlu0 %3691 }
 0x46d   : > { %v3754_v13 = vsel %vm1880_vm0, %v3692_v54, 0  ;;  %v3662_v54 = vpop.permute.xlu1 %3661 }
 0x470   : > { %5285 = vmatmul.mubr.msk.bf16.gmra.mrb[80].mxu1 %vm1880_vm0, %v7468_v17  ;;  %v3694_v32 = vpop.permute.xlu0 %3693 }
 0x471   : > { %5365 = vmatpush3.bf16.xpose.msra.mxu1 %v3748_v55  ;;  %5286 = vmatprep.mubr.msk.bf16.mxu1 %vm1880_vm0, %v7473_v27  ;;  %v3757_v42 = vsel %vm1880_vm0, %v3694_v32, 0 }
 0x472   : > { %5545 = vmatprep.subr.msk.bf16.mxu1 %vm1880_vm0, %v3706_v44 }
 0x474   : > { %v3648_v31 = vpop.permute.xlu0 %3647 }
 0x478   : > { %v5116_v45 = vpop.f32.mrb[0].mxu1  ;;  %5287 = vmatmul.mubr.msk.bf16.gmra.mrb[84].mxu1 %vm1880_vm0, %v7473_v27  ;;  %v3652_v37 = vpop.permute.xlu0 %3651 }
 0x479   : > { %v5117_v22 = vpop.f32.mrb[1].mxu1  ;;  %5367 = vmatpush3.bf16.xpose.msra.mxu1 %v3751_v62  ;;  %5288 = vmatprep.mubr.msk.bf16.mxu1 %vm1880_vm0, %v7478_v30 }
 0x47a   : > { %v7673_v17 = vadd.f32 %v5117_v22, %v5116_v45  ;;  %v5119_v10 = vpop.f32.mrb[2].mxu1  ;;  %5546 = vmatprep.subr.msk.bf16.mxu1 %vm1880_vm0, %v3708_v8 }
 0x47b   : > { %v5120_v24 = vpop.f32.mrb[3].mxu1 }
 0x47c   : > { %9004 = vst [vmem:[#allocation3_spill] sm:$0xff] %v7673_v17  ;;  %v7676_v48 = vadd.f32 %v5120_v24, %v5119_v10  ;;  %v3656_v44 = vpop.permute.xlu0 %3655 }
 0x47e   : > { %9005 = vst [vmem:[#allocation5_spill] sm:$0xff] %v7676_v48 }
 0x480   : > { %v5122_v21 = vpop.f32.mrb[4].mxu1  ;;  %5289 = vmatmul.mubr.msk.bf16.gmra.mrb[88].mxu1 %vm1880_vm0, %v7478_v30  ;;  %v3660_v10 = vpop.permute.xlu0 %3659 }
 0x481   : > { %v5123_v27 = vpop.f32.mrb[5].mxu1  ;;  %5369 = vmatpush3.bf16.xpose.msra.mxu1 %v3754_v13  ;;  %5290 = vmatprep.mubr.msk.bf16.mxu1 %vm1880_vm0, %v7491_v16 }
 0x482   : > { %v7683_v23 = vadd.f32 %v5123_v27, %v5122_v21  ;;  %v5125_v9 = vpop.f32.mrb[6].mxu1  ;;  %5547 = vmatprep.subr.msk.bf16.mxu1 %vm1880_vm0, %v3710_v3  ;;  %v2893_v21 = vpop.permute.xlu1 %2892 }
 0x483   : > { %v5126_v25 = vpop.f32.mrb[7].mxu1 }
 0x484   : > { %9006 = vst [vmem:[#allocation4_spill] sm:$0xff] %v7683_v23  ;;  %v7686_v36 = vadd.f32 %v5126_v25, %v5125_v9  ;;  %v2909_v3 = vpop.permute.xlu0 %2908 }
 0x485   : > { %5196 = vmatprep.subr.bf16.mxu0 %v2909_v3 }
 0x486   : > { %9007 = vst [vmem:[#allocation7_spill] sm:$0xff] %v7686_v36  ;;  %5197 = vmatpush3.bf16.msra.mxu0 %v2893_v21 }
 0x488   : > { %v5128_v56 = vpop.f32.mrb[8].mxu1  ;;  %5291 = vmatmul.mubr.msk.bf16.gmra.mrb[92].mxu1 %vm1880_vm0, %v7491_v16 }
 0x489   : > { %v5129_v30 = vpop.f32.mrb[9].mxu1  ;;  %5371 = vmatpush3.bf16.xpose.msra.mxu1 %v3757_v42  ;;  %5372 = vmatprep.mubr.msk.bf16.mxu1 %vm1880_vm0, %v3648_v31 }
 0x48a   : > { %v7692_v58 = vadd.f32 %v5129_v30, %v5128_v56  ;;  %v5131_v35 = vpop.f32.mrb[10].mxu1  ;;  %v2895_v30 = vpop.permute.xlu1 %2894 }
 0x48b   : > { %v5132_v60 = vpop.f32.mrb[11].mxu1 }
 0x48c   : > { %9008 = vst [vmem:[#allocation6_spill] sm:$0xff] %v7692_v58  ;;  %v7694_v49 = vadd.f32 %v5132_v60, %v5131_v35 }
 0x48e   : > { %9009 = vst [vmem:[#allocation8_spill] sm:$0xff] %v7694_v49  ;;  %v2897_v60 = vpop.permute.xlu1 %2896 }
 0x490   : > { %v5134_v15 = vpop.f32.mrb[12].mxu1  ;;  %5373 = vmatmul.mubr.msk.bf16.vlgmr.msra.gmra.mrb[96].mxu1 %vm1880_vm0, %v3648_v31  ;;  %v2911_v31 = vpop.permute.xlu0 %2910 }
 0x491   : > { %v5135_v63 = vpop.f32.mrb[13].mxu1  ;;  %5374 = vmatprep.mubr.msk.bf16.mxu1 %vm1880_vm0, %v3650_v19  ;;  %5198 = vmatprep.subr.bf16.mxu0 %v2911_v31 }
 0x492   : > { %v7698_v34 = vadd.f32 %v5135_v63, %v5134_v15  ;;  %v5137_v16 = vpop.f32.mrb[14].mxu1  ;;  %5199 = vmatpush3.bf16.msra.mxu0 %v2895_v30  ;;  %v2899_v15 = vpop.permute.xlu1 %2898 }
 0x493   : > { %v5138_v47 = vpop.f32.mrb[15].mxu1 }
 0x494   : > { %9010 = vst [vmem:[#allocation10_spill] sm:$0xff] %v7698_v34  ;;  %v7700_v55 = vadd.f32 %v5138_v47, %v5137_v16  ;;  %v2913_v35 = vpop.permute.xlu0 %2912 }
 0x495   : > { %5200 = vmatprep.subr.bf16.mxu0 %v2913_v35 }
 0x496   : > { %9011 = vst [vmem:[#allocation9_spill] sm:$0xff] %v7700_v55  ;;  %5201 = vmatpush3.bf16.msra.mxu0 %v2897_v60  ;;  %v2901_v16 = vpop.permute.xlu1 %2900 }
 0x498   : > { %v5140_v62 = vpop.f32.mrb[16].mxu1  ;;  %5375 = vmatmul.mubr.msk.bf16.gmra.mrb[100].mxu1 %vm1880_vm0, %v3650_v19  ;;  %v2915_v19 = vpop.permute.xlu0 %2914 }
 0x499   : > { %v5141_v8 = vpop.f32.mrb[17].mxu1  ;;  %5376 = vmatprep.mubr.msk.bf16.mxu1 %vm1880_vm0, %v3652_v37  ;;  %5202 = vmatprep.subr.bf16.mxu0 %v2915_v19 }
 0x49a   : > { %v7704_v45 = vadd.f32 %v5141_v8, %v5140_v62  ;;  %v5143_v22 = vpop.f32.mrb[18].mxu1  ;;  %5203 = vmatpush3.bf16.msra.mxu0 %v2899_v15  ;;  %v2903_v47 = vpop.permute.xlu1 %2902 }
 0x49b   : > { %v5144_v24 = vpop.f32.mrb[19].mxu1 }
 0x49c   : > { %9012 = vst [vmem:[#allocation12_spill] sm:$0xff] %v7704_v45  ;;  %v7706_v13 = vadd.f32 %v5144_v24, %v5143_v22  ;;  %v2917_v63 = vpop.permute.xlu0 %2916 }
 0x49d   : > { %5204 = vmatprep.subr.bf16.mxu0 %v2917_v63 }
 0x49e   : > { %9013 = vst [vmem:[#allocation11_spill] sm:$0xff] %v7706_v13  ;;  %5205 = vmatpush3.bf16.msra.mxu0 %v2901_v16  ;;  %v2905_v62 = vpop.permute.xlu1 %2904 }
 0x4a0   : > { %v5146_v27 = vpop.f32.mrb[20].mxu1  ;;  %5377 = vmatmul.mubr.msk.bf16.gmra.mrb[104].mxu1 %vm1880_vm0, %v3652_v37  ;;  %v2919_v37 = vpop.permute.xlu0 %2918 }
 0x4a1   : > { %v5147_v9 = vpop.f32.mrb[21].mxu1  ;;  %5378 = vmatprep.mubr.msk.bf16.mxu1 %vm1880_vm0, %v3654_v26  ;;  %5206 = vmatprep.subr.bf16.mxu0 %v2919_v37 }
 0x4a2   : > { %v7710_v32 = vadd.f32 %v5147_v9, %v5146_v27  ;;  %v5149_v25 = vpop.f32.mrb[22].mxu1  ;;  %5207 = vmatpush3.bf16.msra.mxu0 %v2903_v47  ;;  %v2907_v22 = vpop.permute.xlu1 %2906 }
 0x4a3   : > { %v5150_v42 = vpop.f32.mrb[23].mxu1 }
 0x4a4   : > { %9014 = vst [vmem:[#allocation13_spill] sm:$0xff] %v7710_v32  ;;  %v7712_v56 = vadd.f32 %v5150_v42, %v5149_v25 }
 0x4a6   : > { %9015 = vst [vmem:[#allocation30_spill] sm:$0xff] %v7712_v56  ;;  %v7904_v38 = vpop.permute.xlu1 %4120 }
 0x4a7   : > { %9045 = vst [vmem:[#allocation60_spill] sm:$0xff] %v7904_v38 }
 0x4a8   : > { %5379 = vmatmul.mubr.msk.bf16.gmra.mrb[108].mxu1 %vm1880_vm0, %v3654_v26  ;;  %v2921_v26 = vpop.permute.xlu0 %2920 }
 0x4a9   : > { %5380 = vmatprep.mubr.msk.bf16.mxu1 %vm1880_vm0, %v3656_v44  ;;  %5208 = vmatprep.subr.bf16.mxu0 %v2921_v26 }
 0x4aa   : > { %5209 = vmatpush3.bf16.msra.mxu0 %v2905_v62 }
 0x4ac   : > { %v2923_v8 = vpop.permute.xlu0 %2922 }
 0x4ad   : > { %5210 = vmatprep.subr.bf16.mxu0 %v2923_v8 }
 0x4ae   : > { %5211 = vmatpush3.bf16.msra.mxu0 %v2907_v22 }
 0x4af   : > { %5292 = vmatprep.subr.bf16.mxu0 %v7566_v6 }
 0x4b0   : > { %5381 = vmatmul.mubr.msk.bf16.gmra.mrb[112].mxu1 %vm1880_vm0, %v3656_v44 }
 0x4b1   : > { %5382 = vmatprep.mubr.msk.bf16.mxu1 %vm1880_vm0, %v3658_v20 }
 0x4b8   : > { %5383 = vmatmul.mubr.msk.bf16.gmra.mrb[116].mxu1 %vm1880_vm0, %v3658_v20 }
 0x4b9   : > { %5384 = vmatprep.mubr.msk.bf16.mxu1 %vm1880_vm0, %v3660_v10 }
 0x4c0   : > { %5385 = vmatmul.mubr.msk.bf16.gmra.mrb[120].mxu1 %vm1880_vm0, %v3660_v10 }
 0x4c1   : > { %5386 = vmatprep.mubr.msk.bf16.mxu1 %vm1880_vm0, %v3662_v54 }
 0x4c8   : > { %5387 = vmatmul.mubr.msk.bf16.gmra.mrb[124].mxu1 %vm1880_vm0, %v3662_v54 }
 0x4d3   : > { %v5152_v44 = vpop.f32.mrb[24].mxu1 }
 0x4d4   : > { %v5153_v24 = vpop.f32.mrb[25].mxu1 }
 0x4d5   : > { %v7724_v20 = vadd.f32 %v5153_v24, %v5152_v44  ;;  %v5155_v3 = vpop.f32.mrb[26].mxu1 }
 0x4d6   : > { %v5156_v21 = vpop.f32.mrb[27].mxu1 }
 0x4d7   : > { %9016 = vst [vmem:[#allocation31_spill] sm:$0xff] %v7724_v20  ;;  %v7726_v27 = vadd.f32 %v5156_v21, %v5155_v3 }
 0x4d9   : > { %9017 = vst [vmem:[#allocation32_spill] sm:$0xff] %v7726_v27 }
 0x4db   : > { %v5158_v9 = vpop.f32.mrb[28].mxu1 }
 0x4dc   : > { %v5159_v25 = vpop.f32.mrb[29].mxu1 }
 0x4dd   : > { %v7728_v42 = vadd.f32 %v5159_v25, %v5158_v9  ;;  %v5161_v31 = vpop.f32.mrb[30].mxu1 }
 0x4de   : > { %v5162_v6 = vpop.f32.mrb[31].mxu1 }
 0x4df   : > { %9018 = vst [vmem:[#allocation33_spill] sm:$0xff] %v7728_v42  ;;  %v7730_v30 = vadd.f32 %v5162_v6, %v5161_v31 }
 0x4e1   : > { %9019 = vst [vmem:[#allocation34_spill] sm:$0xff] %v7730_v30 }
 0x4e3   : > { %v7732_v10 = vpop.f32.mrb[32].mxu1 }
 0x4e4   : > { %v7734_v35 = vpop.f32.mrb[33].mxu1 }
 0x4e5   : > { %v7736_v54 = vpop.f32.mrb[34].mxu1  ;;  %v2668_v60 = vmax.f32 %v7732_v10, %v7734_v35 }
 0x4e6   : > { %v7740_v19 = vpop.f32.mrb[35].mxu1 }
 0x4e7   : > { %2669 = vmax.xlane.f32.xlu0 %v2668_v60  ;;  %v2671_v15 = vmax.f32 %v7736_v54, %v7740_v19 }
 0x4e9   : > { %2672 = vmax.xlane.f32.xlu1 %v2671_v15 }
 0x4eb   : > { %v7744_v63 = vpop.f32.mrb[36].mxu1 }
 0x4ec   : > { %v7746_v16 = vpop.f32.mrb[37].mxu1 }
 0x4ed   : > { %v7748_v37 = vpop.f32.mrb[38].mxu1  ;;  %v2674_v47 = vmax.f32 %v7744_v63, %v7746_v16 }
 0x4ee   : > { %v7752_v26 = vpop.f32.mrb[39].mxu1 }
 0x4ef   : > { %v2677_v62 = vmax.f32 %v7748_v37, %v7752_v26  ;;  %2675 = vmax.xlane.f32.xlu0 %v2674_v47 }
 0x4f1   : > { %2678 = vmax.xlane.f32.xlu1 %v2677_v62 }
 0x4f3   : > { %v7756_v8 = vpop.f32.mrb[40].mxu1 }
 0x4f4   : > { %v7758_v22 = vpop.f32.mrb[41].mxu1 }
 0x4f5   : > { %v7760_v44 = vpop.f32.mrb[42].mxu1  ;;  %v2680_v24 = vmax.f32 %v7756_v8, %v7758_v22 }
 0x4f6   : > { %v7764_v3 = vpop.f32.mrb[43].mxu1 }
 0x4f7   : > { %v2683_v21 = vmax.f32 %v7760_v44, %v7764_v3  ;;  %2681 = vmax.xlane.f32.xlu0 %v2680_v24 }
 0x4f9   : > { %2684 = vmax.xlane.f32.xlu1 %v2683_v21 }
 0x4fb   : > { %v7768_v9 = vpop.f32.mrb[44].mxu1 }
 0x4fc   : > { %v7770_v25 = vpop.f32.mrb[45].mxu1 }
 0x4fd   : > { %v7772_v31 = vpop.f32.mrb[46].mxu1  ;;  %v2686_v6 = vmax.f32 %v7768_v9, %v7770_v25 }
 0x4fe   : > { %v7776_v60 = vpop.f32.mrb[47].mxu1 }
 0x4ff   : > { %v2689_v15 = vmax.f32 %v7772_v31, %v7776_v60  ;;  %2687 = vmax.xlane.f32.xlu0 %v2686_v6 }
 0x501   : > { %2690 = vmax.xlane.f32.xlu1 %v2689_v15 }
 0x503   : > { %v7780_v47 = vpop.f32.mrb[48].mxu1 }
 0x504   : > { %v7782_v62 = vpop.f32.mrb[49].mxu1 }
 0x505   : > { %v7784_v24 = vpop.f32.mrb[50].mxu1  ;;  %v2692_v21 = vmax.f32 %v7780_v47, %v7782_v62 }
 0x506   : > { %v7788_v30 = vpop.f32.mrb[51].mxu1 }
 0x507   : > { %v2695_v42 = vmax.f32 %v7784_v24, %v7788_v30  ;;  %2693 = vmax.xlane.f32.xlu0 %v2692_v21 }
 0x509   : > { %2696 = vmax.xlane.f32.xlu1 %v2695_v42 }
 0x50b   : > { %v7792_v4 = vpop.f32.mrb[52].mxu1 }
 0x50c   : > { %v7794_v6 = vpop.f32.mrb[53].mxu1 }
 0x50d   : > { %v2698_v15 = vmax.f32 %v7792_v4, %v7794_v6  ;;  %v7798_v52 = vpop.f32.mrb[54].mxu1 }
 0x50e   : > { %v7800_v36 = vpop.f32.mrb[55].mxu1 }
 0x50f   : > { %v2701_v23 = vmax.f32 %v7798_v52, %v7800_v36  ;;  %2699 = vmax.xlane.f32.xlu0 %v2698_v15 }
 0x513   : > { %2702 = vmax.xlane.f32.xlu0 %v2701_v23  ;;  %v7804_v20 = vpop.f32.mrb[56].mxu1 }
 0x514   : > { %v7806_v21 = vpop.f32.mrb[57].mxu1 }
 0x515   : > { %v2704_v42 = vmax.f32 %v7804_v20, %v7806_v21  ;;  %v7810_v17 = vpop.f32.mrb[58].mxu1 }
 0x516   : > { %v7812_v27 = vpop.f32.mrb[59].mxu1 }
 0x517   : > { %v2707_v32 = vmax.f32 %v7810_v17, %v7812_v27  ;;  %2705 = vmax.xlane.f32.xlu0 %v2704_v42 }
 0x519   : > { %2708 = vmax.xlane.f32.xlu1 %v2707_v32 }
 0x51b   : > { %v7816_v48 = vpop.f32.mrb[60].mxu1 }
 0x51c   : > { %v7818_v15 = vpop.f32.mrb[61].mxu1 }
 0x51d   : > { %9020 = vst [vmem:[#allocation35_spill] sm:$0xff] %v7818_v15  ;;  %v2710_v23 = vmax.f32 %v7816_v48, %v7818_v15  ;;  %v7822_v45 = vpop.f32.mrb[62].mxu1  ;;  %v7924_v15 = vpop.permute.xlu0 %4136 }
 0x51e   : > { %9021 = vst [vmem:[#allocation36_spill] sm:$0xff] %v7822_v45  ;;  %v7824_v56 = vpop.f32.mrb[63].mxu1 }
 0x51f   : > { %9022 = vst [vmem:[#allocation37_spill] sm:$0xff] %v7824_v56  ;;  %v2713_v34 = vmax.f32 %v7822_v45, %v7824_v56  ;;  %2711 = vmax.xlane.f32.xlu0 %v2710_v23  ;;  %v7912_v45 = vpop.permute.xlu1 %4138 }
 0x520   : > { %9048 = vst [vmem:[#allocation63_spill] sm:$0xff] %v7912_v45 }
 0x521   : > { %2714 = vmax.xlane.f32.xlu1 %v2713_v34 }
 0x523   : > { %v7828_v13 = vpop.f32.mrb[64].mxu1 }
 0x524   : > { %9023 = vst [vmem:[#allocation38_spill] sm:$0xff] %v7828_v13  ;;  %v7830_v42 = vpop.f32.mrb[65].mxu1 }
 0x525   : > { %9024 = vst [vmem:[#allocation39_spill] sm:$0xff] %v7830_v42  ;;  %v3294_v32 = vmax.f32 %v7828_v13, %v7830_v42  ;;  %v7834_v58 = vpop.f32.mrb[66].mxu1 }
 0x526   : > { %9025 = vst [vmem:[#allocation40_spill] sm:$0xff] %v7834_v58  ;;  %v7836_v55 = vpop.f32.mrb[67].mxu1 }
 0x527   : > { %9026 = vst [vmem:[#allocation41_spill] sm:$0xff] %v7836_v55  ;;  %v3297_v49 = vmax.f32 %v7834_v58, %v7836_v55  ;;  %v7856_v55 = vld [vmem:[#allocation2 + $0x2c8] sm:$0xff] }
 0x52b   : > { %v7840_v14 = vpop.f32.mrb[68].mxu1 }
 0x52c   : > { %9027 = vst [vmem:[#allocation42_spill] sm:$0xff] %v7840_v14  ;;  %v7842_v41 = vpop.f32.mrb[69].mxu1 }
 0x52d   : > { %9028 = vst [vmem:[#allocation43_spill] sm:$0xff] %v7842_v41  ;;  %v3300_v34 = vmax.f32 %v7840_v14, %v7842_v41  ;;  %v7846_v23 = vpop.f32.mrb[70].mxu1 }
 0x52e   : > { %9029 = vst [vmem:[#allocation44_spill] sm:$0xff] %v7846_v23  ;;  %v7848_v29 = vpop.f32.mrb[71].mxu1 }
 0x52f   : > { %9030 = vst [vmem:[#allocation45_spill] sm:$0xff] %v7848_v29  ;;  %v3303_v28 = vmax.f32 %v7846_v23, %v7848_v29 }
 0x532   : > { %4132 = vrot.lane.b32.xlu1 %v7850_v50, %s6253_s26 }
 0x533   : > { %v7858_v58 = vpop.f32.mrb[72].mxu1 }
 0x534   : > { %9031 = vst [vmem:[#allocation46_spill] sm:$0xff] %v7858_v58  ;;  %v7860_v59 = vpop.f32.mrb[73].mxu1 }
 0x535   : > { %9032 = vst [vmem:[#allocation47_spill] sm:$0xff] %v7860_v59  ;;  %4148 = vrot.lane.b32.xlu0 %v7856_v55, %s6253_s26  ;;  %v3306_v41 = vmax.f32 %v7858_v58, %v7860_v59  ;;  %v7866_v14 = vpop.f32.mrb[74].mxu1 }
 0x536   : > { %9033 = vst [vmem:[#allocation48_spill] sm:$0xff] %v7866_v14  ;;  %v7868_v42 = vpop.f32.mrb[75].mxu1 }
 0x537   : > { %9034 = vst [vmem:[#allocation49_spill] sm:$0xff] %v7868_v42  ;;  %v3309_v29 = vmax.f32 %v7866_v14, %v7868_v42 }
 0x53b   : > { %v7872_v23 = vpop.f32.mrb[76].mxu1 }
 0x53c   : > { %9035 = vst [vmem:[#allocation50_spill] sm:$0xff] %v7872_v23  ;;  %v7874_v13 = vpop.f32.mrb[77].mxu1 }
 0x53d   : > { %9036 = vst [vmem:[#allocation51_spill] sm:$0xff] %v7874_v13  ;;  %v3312_v33 = vmax.f32 %v7872_v23, %v7874_v13  ;;  %v7878_v39 = vpop.f32.mrb[78].mxu1 }
 0x53e   : > { %9037 = vst [vmem:[#allocation52_spill] sm:$0xff] %v7878_v39  ;;  %v7880_v1 = vpop.f32.mrb[79].mxu1 }
 0x53f   : > { %9038 = vst [vmem:[#allocation53_spill] sm:$0xff] %v7880_v1  ;;  %v3315_v59 = vmax.f32 %v7878_v39, %v7880_v1 }
 0x543   : > { %v7884_v58 = vpop.f32.mrb[80].mxu1 }
 0x544   : > { %9039 = vst [vmem:[#allocation54_spill] sm:$0xff] %v7884_v58  ;;  %v7886_v40 = vpop.f32.mrb[81].mxu1 }
 0x545   : > { %9040 = vst [vmem:[#allocation55_spill] sm:$0xff] %v7886_v40  ;;  %v3318_v42 = vmax.f32 %v7884_v58, %v7886_v40  ;;  %v7890_v14 = vpop.f32.mrb[82].mxu1 }
 0x546   : > { %9041 = vst [vmem:[#allocation56_spill] sm:$0xff] %v7890_v14  ;;  %v7892_v0 = vpop.f32.mrb[83].mxu1 }
 0x547   : > { %9042 = vst [vmem:[#allocation57_spill] sm:$0xff] %v7892_v0  ;;  %v3321_v13 = vmax.f32 %v7890_v14, %v7892_v0 }
 0x54b   : > { %v7896_v23 = vpop.f32.mrb[84].mxu1 }
 0x54c   : > { %9043 = vst [vmem:[#allocation58_spill] sm:$0xff] %v7896_v23  ;;  %v7898_v43 = vpop.f32.mrb[85].mxu1 }
 0x54d   : > { %9044 = vst [vmem:[#allocation59_spill] sm:$0xff] %v7898_v43  ;;  %v3324_v1 = vmax.f32 %v7896_v23, %v7898_v43  ;;  %v7902_v39 = vpop.f32.mrb[86].mxu1 }
 0x54e   : > { %v7906_v56 = vpop.f32.mrb[87].mxu1 }
 0x54f   : > { %9046 = vst [vmem:[#allocation61_spill] sm:$0xff] %v7906_v56  ;;  %v3327_v40 = vmax.f32 %v7902_v39, %v7906_v56  ;;  %v7926_v56 = vpop.permute.xlu1 %4122 }
 0x550   : > { %9051 = vst [vmem:[#allocation66_spill] sm:$0xff] %v7926_v56 }
 0x553   : > { %v7910_v58 = vpop.f32.mrb[88].mxu1  ;;  %v7942_v56 = vpop.permute.xlu1 %4124 }
 0x554   : > { %9047 = vst [vmem:[#allocation62_spill] sm:$0xff] %v7910_v58  ;;  %3295 = vmax.xlane.f32.xlu0 %v3294_v32  ;;  %v7914_v0 = vpop.f32.mrb[89].mxu1 }
 0x555   : > { %9049 = vst [vmem:[#allocation64_spill] sm:$0xff] %v7914_v0  ;;  %v3330_v14 = vmax.f32 %v7910_v58, %v7914_v0  ;;  %v7918_v43 = vpop.f32.mrb[90].mxu1  ;;  %v7936_v58 = vpop.permute.xlu0 %4140 }
 0x556   : > { %3298 = vmax.xlane.f32.xlu1 %v3297_v49  ;;  %v7920_v23 = vpop.f32.mrb[91].mxu1  ;;  %9054 = vst [vmem:[#allocation69_spill] sm:$0xff] %v7936_v58 }
 0x557   : > { %9050 = vst [vmem:[#allocation65_spill] sm:$0xff] %v7920_v23  ;;  %v3333_v38 = vmax.f32 %v7918_v43, %v7920_v23  ;;  %v7954_v58 = vpop.permute.xlu1 %4126 }
 0x558   : > { %3301 = vmax.xlane.f32.xlu0 %v3300_v34  ;;  %9059 = vst [vmem:[#allocation74_spill] sm:$0xff] %v7954_v58 }
 0x55a   : > { %3304 = vmax.xlane.f32.xlu1 %v3303_v28  ;;  %v7946_v28 = vpop.permute.xlu0 %4142 }
 0x55b   : > { %v7928_v32 = vpop.f32.mrb[92].mxu1  ;;  %9057 = vst [vmem:[#allocation72_spill] sm:$0xff] %v7946_v28  ;;  %v7964_v28 = vpop.permute.xlu1 %4128 }
 0x55c   : > { %9052 = vst [vmem:[#allocation67_spill] sm:$0xff] %v7928_v32  ;;  %3307 = vmax.xlane.f32.xlu0 %v3306_v41  ;;  %v7930_v45 = vpop.f32.mrb[93].mxu1  ;;  %9063 = vst [vmem:[#allocation78_spill] sm:$0xff] %v7964_v28 }
 0x55d   : > { %9053 = vst [vmem:[#allocation68_spill] sm:$0xff] %v7930_v45  ;;  %v3336_v0 = vmax.f32 %v7928_v32, %v7930_v45  ;;  %v7934_v49 = vpop.f32.mrb[94].mxu1 }
 0x55e   : > { %3310 = vmax.xlane.f32.xlu1 %v3309_v29  ;;  %v7938_v23 = vpop.f32.mrb[95].mxu1 }
 0x55f   : > { %9055 = vst [vmem:[#allocation70_spill] sm:$0xff] %v7938_v23  ;;  %v3339_v34 = vmax.f32 %v7934_v49, %v7938_v23 }
 0x560   : > { %3313 = vmax.xlane.f32.xlu0 %v3312_v33  ;;  %v7960_v33 = vpop.permute.xlu0 %4144 }
 0x561   : > { %9061 = vst [vmem:[#allocation76_spill] sm:$0xff] %v7960_v33 }
 0x562   : > { %3316 = vmax.xlane.f32.xlu1 %v3315_v59 }
 0x563   : > { %v7944_v41 = vpop.f32.mrb[96].mxu1 }
 0x564   : > { %9056 = vst [vmem:[#allocation71_spill] sm:$0xff] %v7944_v41  ;;  %3319 = vmax.xlane.f32.xlu0 %v3318_v42  ;;  %v7948_v45 = vpop.f32.mrb[97].mxu1  ;;  %v7976_v33 = vpop.permute.xlu0 %4146 }
 0x565   : > { %9058 = vst [vmem:[#allocation73_spill] sm:$0xff] %v7948_v45  ;;  %v3896_v32 = vmax.f32 %v7944_v41, %v7948_v45  ;;  %v7952_v29 = vpop.f32.mrb[98].mxu1  ;;  %9067 = vst [vmem:[#allocation82_spill] sm:$0xff] %v7976_v33 }
 0x566   : > { %3322 = vmax.xlane.f32.xlu1 %v3321_v13  ;;  %v7956_v23 = vpop.f32.mrb[99].mxu1 }
 0x567   : > { %9060 = vst [vmem:[#allocation75_spill] sm:$0xff] %v7956_v23  ;;  %v3899_v59 = vmax.f32 %v7952_v29, %v7956_v23 }
 0x568   : > { %3325 = vmax.xlane.f32.xlu0 %v3324_v1 }
 0x56a   : > { %3328 = vmax.xlane.f32.xlu1 %v3327_v40  ;;  %v7978_v40 = vpop.permute.xlu1 %4130 }
 0x56b   : > { %v7962_v42 = vpop.f32.mrb[100].mxu1  ;;  %9068 = vst [vmem:[#allocation83_spill] sm:$0xff] %v7978_v40 }
 0x56c   : > { %9062 = vst [vmem:[#allocation77_spill] sm:$0xff] %v7962_v42  ;;  %3331 = vmax.xlane.f32.xlu0 %v3330_v14  ;;  %v7966_v45 = vpop.f32.mrb[101].mxu1 }
 0x56d   : > { %9064 = vst [vmem:[#allocation79_spill] sm:$0xff] %v7966_v45  ;;  %v3902_v58 = vmax.f32 %v7962_v42, %v7966_v45  ;;  %v7970_v13 = vpop.f32.mrb[102].mxu1 }
 0x56e   : > { %9065 = vst [vmem:[#allocation80_spill] sm:$0xff] %v7970_v13  ;;  %3334 = vmax.xlane.f32.xlu1 %v3333_v38  ;;  %v7972_v41 = vpop.f32.mrb[103].mxu1 }
 0x56f   : > { %9066 = vst [vmem:[#allocation81_spill] sm:$0xff] %v7972_v41  ;;  %v3905_v1 = vmax.f32 %v7970_v13, %v7972_v41 }
 0x570   : > { %3337 = vmax.xlane.f32.xlu0 %v3336_v0 }
 0x572   : > { %3340 = vmax.xlane.f32.xlu1 %v3339_v34 }
 0x573   : > { %v7980_v14 = vpop.f32.mrb[104].mxu1 }
 0x574   : > { %3897 = vmax.xlane.f32.xlu0 %v3896_v32  ;;  %v2670_v28 = vpop.xlane.xlu0 %2669  ;;  %v7982_v23 = vpop.f32.mrb[105].mxu1 }
 0x575   : > { %9069 = vst [vmem:[#allocation84_spill] sm:$0xff] %v7982_v23  ;;  %v2716_v45 = vsub.f32 %v7732_v10, %v2670_v28  ;;  %v2717_v38 = vsub.f32 %v7734_v35, %v2670_v28  ;;  %v3908_v42 = vmax.f32 %v7980_v14, %v7982_v23  ;;  %v7988_v41 = vpop.f32.mrb[106].mxu1 }
 0x576   : > { %v2673_v33 = vpop.xlane.xlu1 %2672  ;;  %3900 = vmax.xlane.f32.xlu1 %v3899_v59  ;;  %v7990_v0 = vpop.f32.mrb[107].mxu1 }
 0x577   : > { %v2748_v34 = vmul.f32 1.442695, %v2716_v45  ;;  %v2750_v40 = vmul.f32 1.442695, %v2717_v38  ;;  %v2718_v32 = vsub.f32 %v7736_v54, %v2673_v33  ;;  %v2719_v13 = vsub.f32 %v7740_v19, %v2673_v33 }
 0x578   : > { %3903 = vmax.xlane.f32.xlu0 %v3902_v58  ;;  %v3911_v10 = vmax.f32 %v7988_v41, %v7990_v0 }
 0x579   : > { %5893 = vpow2.f32 %v2748_v34  ;;  %v2752_v35 = vmul.f32 1.442695, %v2718_v32  ;;  %v2754_v28 = vmul.f32 1.442695, %v2719_v13 }
 0x57a   : > { %5895 = vpow2.f32 %v2750_v40  ;;  %3906 = vmax.xlane.f32.xlu1 %v3905_v1 }
 0x57b   : > { %5897 = vpow2.f32 %v2752_v35  ;;  %v7996_v23 = vpop.f32.mrb[108].mxu1 }
 0x57c   : > { %5899 = vpow2.f32 %v2754_v28  ;;  %3909 = vmax.xlane.f32.xlu0 %v3908_v42  ;;  %v2676_v45 = vpop.xlane.xlu0 %2675  ;;  %v7998_v59 = vpop.f32.mrb[109].mxu1 }
 0x57d   : > { %9070 = vst [vmem:[#allocation85_spill] sm:$0xff] %v7998_v59  ;;  %v2720_v54 = vsub.f32 %v7744_v63, %v2676_v45  ;;  %v2721_v58 = vsub.f32 %v7746_v16, %v2676_v45  ;;  %v3914_v19 = vmax.f32 %v7996_v23, %v7998_v59  ;;  %v8004_v33 = vpop.f32.mrb[110].mxu1 }
 0x57e   : > { %9071 = vst [vmem:[#allocation86_spill] sm:$0xff] %v8004_v33  ;;  %v2679_v13 = vpop.xlane.xlu1 %2678  ;;  %3912 = vmax.xlane.f32.xlu1 %v3911_v10  ;;  %v8006_v1 = vpop.f32.mrb[111].mxu1 }
 0x57f   : > { %9072 = vst [vmem:[#allocation87_spill] sm:$0xff] %v8006_v1  ;;  %v2756_v40 = vmul.f32 1.442695, %v2720_v54  ;;  %v2758_v38 = vmul.f32 1.442695, %v2721_v58  ;;  %v2722_v42 = vsub.f32 %v7748_v37, %v2679_v13  ;;  %v2723_v34 = vsub.f32 %v7752_v26, %v2679_v13 }
 0x580   : > { %v3917_v63 = vmax.f32 %v8004_v33, %v8006_v1  ;;  %3915 = vmax.xlane.f32.xlu0 %v3914_v19 }
 0x581   : > { %5901 = vpow2.f32 %v2756_v40  ;;  %v2760_v16 = vmul.f32 1.442695, %v2722_v42  ;;  %v2762_v32 = vmul.f32 1.442695, %v2723_v34 }
 0x582   : > { %5903 = vpow2.f32 %v2758_v38  ;;  %3918 = vmax.xlane.f32.xlu1 %v3917_v63 }
 0x583   : > { %v5894_v35 = vpop.eup %5893  ;;  %5905 = vpow2.f32 %v2760_v16  ;;  %v8012_v10 = vpop.f32.mrb[112].mxu1 }
 0x584   : > { %v5896_v28 = vpop.eup %5895  ;;  %5907 = vpow2.f32 %v2762_v32  ;;  %v2682_v45 = vpop.xlane.xlu0 %2681 }
 0x585   : > { %v8014_v54 = vpop.f32.mrb[113].mxu1  ;;  %v5898_v37 = vpop.eup %5897  ;;  %v2724_v26 = vsub.f32 %v7756_v8, %v2682_v45  ;;  %v2725_v58 = vsub.f32 %v7758_v22, %v2682_v45  ;;  %v8022_v40 = vadd.f32 %v5896_v28, %v5894_v35 }
 0x586   : > { %v8020_v13 = vpop.f32.mrb[114].mxu1  ;;  %v5900_v38 = vpop.eup %5899  ;;  %v2860_v34 = vpack.c.bf16 %v5898_v37, %v5894_v35 }
 0x587   : > { %v2685_v42 = vpop.xlane.xlu1 %2684  ;;  %v8024_v63 = vpop.f32.mrb[115].mxu1  ;;  %v2764_v16 = vmul.f32 1.442695, %v2724_v26  ;;  %v2766_v32 = vmul.f32 1.442695, %v2725_v58  ;;  %v2861_v33 = vpack.c.bf16 %v5900_v38, %v5896_v28  ;;  %v8030_v45 = vadd.f32 %v5900_v38, %v5898_v37 }
 0x588   : > { %v2726_v1 = vsub.f32 %v7760_v44, %v2685_v42  ;;  %v2727_v8 = vsub.f32 %v7764_v3, %v2685_v42 }
 0x589   : > { %5909 = vpow2.f32 %v2764_v16  ;;  %2972 = vmatprep.mubr.bf16.mxu0 %v2861_v33 }
 0x58a   : > { %v2768_v19 = vmul.f32 1.442695, %v2726_v1  ;;  %v2770_v59 = vmul.f32 1.442695, %v2727_v8  ;;  %5911 = vpow2.f32 %v2766_v32  ;;  %2973 = vmatmul.mubr.bf16.vlgmr.msra.gmra.mrb[32].mxu0 %v2860_v34  ;;  %v8051_v8 = vld [vmem:[#allocation2 + $0x178] sm:$0xff] }
 0x58b   : > { %v5902_v35 = vpop.eup %5901  ;;  %v8032_v26 = vpop.f32.mrb[116].mxu1  ;;  %5293 = vmatpush3.bf16.msra.mxu0 %v7563_v61 }
 0x58c   : > { %5913 = vpow2.f32 %v2768_v19  ;;  %v5904_v58 = vpop.eup %5903  ;;  %v2688_v44 = vpop.xlane.xlu0 %2687  ;;  %5294 = vmatprep.subr.bf16.mxu0 %v7572_v5 }
 0x58d   : > { %5915 = vpow2.f32 %v2770_v59  ;;  %v8035_v3 = vpop.f32.mrb[117].mxu1  ;;  %v5906_v28 = vpop.eup %5905  ;;  %v2728_v1 = vsub.f32 %v7768_v9, %v2688_v44  ;;  %v2729_v37 = vsub.f32 %v7770_v25, %v2688_v44  ;;  %v8044_v38 = vadd.f32 %v5904_v58, %v5902_v35 }
 0x58e   : > { %v8042_v19 = vpop.f32.mrb[118].mxu1  ;;  %v5908_v59 = vpop.eup %5907  ;;  %v2862_v61 = vpack.c.bf16 %v5906_v28, %v5902_v35 }
 0x58f   : > { %v2691_v42 = vpop.xlane.xlu1 %2690  ;;  %v8046_v34 = vpop.f32.mrb[119].mxu1  ;;  %v2772_v16 = vmul.f32 1.442695, %v2728_v1  ;;  %v2774_v32 = vmul.f32 1.442695, %v2729_v37  ;;  %5295 = vmatpush3.bf16.msra.mxu0 %v7582_v46  ;;  %v2863_v25 = vpack.c.bf16 %v5908_v59, %v5904_v58  ;;  %v8055_v33 = vadd.f32 %v5908_v59, %v5906_v28  ;;  %v8060_v46 = vld [vmem:[#allocation2 + $0x2f8] sm:$0xff] }
 0x590   : > { %v2730_v5 = vsub.f32 %v7772_v31, %v2691_v42  ;;  %v2731_v9 = vsub.f32 %v7776_v60, %v2691_v42  ;;  %5296 = vmatprep.subr.bf16.mxu0 %v7576_v2 }
 0x591   : > { %5917 = vpow2.f32 %v2772_v16  ;;  %2980 = vmatprep.mubr.bf16.mxu0 %v2863_v25 }
 0x592   : > { %v2776_v35 = vmul.f32 1.442695, %v2730_v5  ;;  %v2778_v22 = vmul.f32 1.442695, %v2731_v9  ;;  %5919 = vpow2.f32 %v2774_v32  ;;  %2981 = vmatmul.mubr.bf16.gmra.mrb[36].mxu0 %v2862_v61 }
 0x593   : > { %v5910_v31 = vpop.eup %5909  ;;  %4134 = vrot.lane.b32.xlu1 %v8051_v8, %s6253_s26  ;;  %v8062_v60 = vpop.f32.mrb[120].mxu1  ;;  %5297 = vmatpush3.bf16.msra.mxu0 %v7594_v18 }
 0x594   : > { %5921 = vpow2.f32 %v2776_v35  ;;  %v5912_v58 = vpop.eup %5911  ;;  %v2694_v28 = vpop.xlane.xlu0 %2693  ;;  %5298 = vmatprep.subr.bf16.mxu0 %v7587_v51 }
 0x595   : > { %5923 = vpow2.f32 %v2778_v22  ;;  %v8065_v1 = vpop.f32.mrb[121].mxu1  ;;  %v2732_v37 = vsub.f32 %v7780_v47, %v2694_v28  ;;  %v2733_v59 = vsub.f32 %v7782_v62, %v2694_v28  ;;  %v8074_v16 = vadd.f32 %v5912_v58, %v5910_v31 }
 0x596   : > { %v5914_v2 = vpop.eup %5913  ;;  %v8072_v61 = vpop.f32.mrb[122].mxu1  ;;  %4150 = vrot.lane.b32.xlu0 %v8060_v46, %s6253_s26 }
 0x597   : > { %v5916_v22 = vpop.eup %5915  ;;  %v2697_v32 = vpop.xlane.xlu1 %2696  ;;  %v2864_v18 = vpack.c.bf16 %v5914_v2, %v5910_v31  ;;  %v2780_v51 = vmul.f32 1.442695, %v2732_v37  ;;  %v2782_v9 = vmul.f32 1.442695, %v2733_v59  ;;  %5299 = vmatpush3.bf16.msra.mxu0 %v7604_v53 }
 0x598   : > { %v8078_v5 = vpop.f32.mrb[123].mxu1  ;;  %v2734_v47 = vsub.f32 %v7784_v24, %v2697_v32  ;;  %v2735_v62 = vsub.f32 %v7788_v30, %v2697_v32  ;;  %v2865_v25 = vpack.c.bf16 %v5916_v22, %v5912_v58  ;;  %v8085_v28 = vadd.f32 %v5916_v22, %v5914_v2  ;;  %5300 = vmatprep.subr.bf16.mxu0 %v7598_v12 }
 0x599   : > { %v3935_v35 = vmax.f32 %v8072_v61, %v8078_v5  ;;  %5925 = vpow2.f32 %v2780_v51 }
 0x59a   : > { %v2784_v42 = vmul.f32 1.442695, %v2734_v47  ;;  %v2786_v44 = vmul.f32 1.442695, %v2735_v62  ;;  %5927 = vpow2.f32 %v2782_v9  ;;  %2988 = vmatprep.mubr.bf16.mxu0 %v2865_v25 }
 0x59b   : > { %v5918_v31 = vpop.eup %5917  ;;  %2989 = vmatmul.mubr.bf16.gmra.mrb[40].mxu0 %v2864_v18  ;;  %v8088_v24 = vpop.f32.mrb[124].mxu1 }
 0x59c   : > { %5929 = vpow2.f32 %v2784_v42  ;;  %v5920_v30 = vpop.eup %5919  ;;  %5301 = vmatpush3.bf16.msra.mxu0 %v7616_v11  ;;  %v2700_v53 = vpop.xlane.xlu0 %2699 }
 0x59d   : > { %5931 = vpow2.f32 %v2786_v44  ;;  %v8091_v58 = vpop.f32.mrb[125].mxu1  ;;  %5302 = vmatprep.subr.bf16.mxu0 %v7609_v7  ;;  %v2736_v37 = vsub.f32 %v7792_v4, %v2700_v53  ;;  %v2737_v12 = vsub.f32 %v7794_v6, %v2700_v53  ;;  %v8100_v22 = vadd.f32 %v5920_v30, %v5918_v31 }
 0x59e   : > { %v5922_v2 = vpop.eup %5921  ;;  %v3938_v59 = vmax.f32 %v8088_v24, %v8091_v58  ;;  %v8098_v42 = vpop.f32.mrb[126].mxu1 }
 0x59f   : > { %v5924_v44 = vpop.eup %5923  ;;  %v2866_v32 = vpack.c.bf16 %v5922_v2, %v5918_v31  ;;  %v8102_v11 = vpop.f32.mrb[127].mxu1  ;;  %v2788_v18 = vmul.f32 1.442695, %v2736_v37  ;;  %v2790_v51 = vmul.f32 1.442695, %v2737_v12 }
 0x5a0   : > { %v2867_v9 = vpack.c.bf16 %v5924_v44, %v5920_v30  ;;  %v3941_v7 = vmax.f32 %v8098_v42, %v8102_v11  ;;  %5303 = vmatpush3.bf16.msra.mxu0 %v7624_v57  ;;  %v2703_v4 = vpop.xlane.xlu0 %2702  ;;  %v8107_v6 = vadd.f32 %v5924_v44, %v5922_v2 }
 0x5a1   : > { %5933 = vpow2.f32 %v2788_v18  ;;  %5304 = vmatprep.subr.bf16.mxu0 %v7856_v55  ;;  %v2738_v47 = vsub.f32 %v7798_v52, %v2703_v4  ;;  %v2739_v62 = vsub.f32 %v7800_v36, %v2703_v4 }
 0x5a2   : > { %2996 = vmatprep.mubr.bf16.mxu0 %v2867_v9  ;;  %5935 = vpow2.f32 %v2790_v51 }
 0x5a3   : > { %v5926_v25 = vpop.eup %5925  ;;  %v2792_v31 = vmul.f32 1.442695, %v2738_v47  ;;  %v2794_v30 = vmul.f32 1.442695, %v2739_v62  ;;  %2997 = vmatmul.mubr.bf16.gmra.mrb[44].mxu0 %v2866_v32  ;;  %v9073_v62 = vld [vmem:[#allocation35_spill] sm:$0xff] }
 0x5a4   : > { %v5928_v53 = vpop.eup %5927  ;;  %5305 = vmatpush3.bf16.msra.mxu0 %v7850_v50  ;;  %v2706_v57 = vpop.xlane.xlu0 %2705 }
 0x5a5   : > { %5937 = vpow2.f32 %v2792_v31  ;;  %5306 = vmatprep.subr.bf16.mxu0 %v8060_v46  ;;  %v2740_v2 = vsub.f32 %v7804_v20, %v2706_v57  ;;  %v2741_v55 = vsub.f32 %v7806_v21, %v2706_v57  ;;  %v8116_v52 = vadd.f32 %v5928_v53, %v5926_v25 }
 0x5a6   : > { %v5930_v37 = vpop.eup %5929  ;;  %5939 = vpow2.f32 %v2794_v30  ;;  %v2709_v12 = vpop.xlane.xlu1 %2708 }
 0x5a7   : > { %v5932_v36 = vpop.eup %5931  ;;  %v2868_v44 = vpack.c.bf16 %v5930_v37, %v5926_v25  ;;  %v2796_v18 = vmul.f32 1.442695, %v2740_v2  ;;  %v2798_v32 = vmul.f32 1.442695, %v2741_v55  ;;  %v2742_v51 = vsub.f32 %v7810_v17, %v2709_v12  ;;  %v9075_v2 = vld [vmem:[#allocation37_spill] sm:$0xff] }
 0x5a8   : > { %v2743_v50 = vsub.f32 %v7812_v27, %v2709_v12  ;;  %5307 = vmatpush3.bf16.msra.mxu0 %v8051_v8  ;;  %v2869_v9 = vpack.c.bf16 %v5932_v36, %v5928_v53  ;;  %v8121_v46 = vadd.f32 %v5932_v36, %v5930_v37  ;;  %v9074_v37 = vld [vmem:[#allocation36_spill] sm:$0xff] }
 0x5a9   : > { %5941 = vpow2.f32 %v2796_v18  ;;  %v2800_v20 = vmul.f32 1.442695, %v2742_v51  ;;  %5388 = vmatprep.subr.bf16.mxu0 %v7924_v15 }
 0x5aa   : > { %v2802_v21 = vmul.f32 1.442695, %v2743_v50  ;;  %5943 = vpow2.f32 %v2798_v32  ;;  %3004 = vmatprep.mubr.bf16.mxu0 %v2869_v9 }
 0x5ab   : > { %v5934_v4 = vpop.eup %5933  ;;  %5945 = vpow2.f32 %v2800_v20  ;;  %3005 = vmatmul.mubr.bf16.gmra.mrb[48].mxu0 %v2868_v44  ;;  %v9076_v20 = vmax.f32 %v8012_v10, %v8014_v54 }
 0x5ac   : > { %v5936_v47 = vpop.eup %5935  ;;  %5947 = vpow2.f32 %v2802_v21  ;;  %v2712_v17 = vpop.xlane.xlu0 %2711 }
 0x5ad   : > { %v2744_v27 = vsub.f32 %v7816_v48, %v2712_v17  ;;  %v2745_v8 = vsub.f32 %v9073_v62, %v2712_v17  ;;  %v8126_v25 = vadd.f32 %v5936_v47, %v5934_v4 }
 0x5ae   : > { %v2715_v31 = vpop.xlane.xlu1 %2714 }
 0x5af   : > { %v5938_v30 = vpop.eup %5937  ;;  %v2804_v53 = vmul.f32 1.442695, %v2744_v27  ;;  %v2806_v57 = vmul.f32 1.442695, %v2745_v8  ;;  %v2746_v15 = vsub.f32 %v9074_v37, %v2715_v31  ;;  %v2747_v55 = vsub.f32 %v9075_v2, %v2715_v31 }
 0x5b0   : > { %v5940_v36 = vpop.eup %5939  ;;  %v2870_v12 = vpack.c.bf16 %v5938_v30, %v5934_v4  ;;  %v9078_v8 = vmax.f32 %v8032_v26, %v8035_v3 }
 0x5b1   : > { %5949 = vpow2.f32 %v2804_v53  ;;  %v2808_v44 = vmul.f32 1.442695, %v2746_v15  ;;  %v2810_v18 = vmul.f32 1.442695, %v2747_v55  ;;  %v2871_v32 = vpack.c.bf16 %v5940_v36, %v5936_v47 }
 0x5b2   : > { %5951 = vpow2.f32 %v2806_v57  ;;  %v8130_v48 = vadd.f32 %v5940_v36, %v5938_v30  ;;  %v9077_v47 = vmax.f32 %v8020_v13, %v8024_v63  ;;  %v9079_v57 = vmax.f32 %v8042_v19, %v8046_v34 }
 0x5b3   : > { %v5942_v51 = vpop.eup %5941  ;;  %5953 = vpow2.f32 %v2808_v44  ;;  %3012 = vmatprep.mubr.bf16.mxu0 %v2871_v32  ;;  %v9088_v44 = vld [vmem:[#allocation38_spill] sm:$0xff] }
 0x5b4   : > { %v5944_v50 = vpop.eup %5943  ;;  %5955 = vpow2.f32 %v2810_v18  ;;  %3013 = vmatmul.mubr.bf16.gmra.mrb[52].mxu0 %v2870_v12  ;;  %v9083_v12 = vld [vmem:[#allocation18_spill] sm:$0xff] }
 0x5b5   : > { %v5946_v9 = vpop.eup %5945  ;;  %3921 = vmax.xlane.f32.xlu0 %v9076_v20  ;;  %v8135_v21 = vadd.f32 %v5944_v50, %v5942_v51 }
 0x5b6   : > { %v5948_v4 = vpop.eup %5947  ;;  %v2872_v17 = vpack.c.bf16 %v5946_v9, %v5942_v51 }
 0x5b7   : > { %3924 = vmax.xlane.f32.xlu1 %v9077_v47  ;;  %v2873_v27 = vpack.c.bf16 %v5948_v4, %v5944_v50  ;;  %v8140_v62 = vadd.f32 %v5948_v4, %v5946_v9  ;;  %v9090_v50 = vld [vmem:[#allocation15_spill] sm:$0xff]  ;;  %v9091_v4 = vld [vmem:[#allocation40_spill] sm:$0xff]  ;;  %v9092_v47 = vld [vmem:[#allocation41_spill] sm:$0xff] }
 0x5b9   : > { %3020 = vmatprep.mubr.bf16.mxu0 %v2873_v27  ;;  %3927 = vmax.xlane.f32.xlu0 %v9078_v8  ;;  %v9093_v8 = vld [vmem:[#allocation24_spill] sm:$0xff] }
 0x5bb   : > { %v5950_v31 = vpop.eup %5949  ;;  %3936 = vmax.xlane.f32.xlu1 %v3935_v35  ;;  %v9080_v35 = vmax.f32 %v8062_v60, %v8065_v1 }
 0x5bc   : > { %v5952_v30 = vpop.eup %5951  ;;  %3021 = vmatmul.mubr.bf16.gmra.mrb[56].mxu0 %v2872_v17 }
 0x5bd   : > { %v5954_v53 = vpop.eup %5953  ;;  %3930 = vmax.xlane.f32.xlu0 %v9079_v57  ;;  %v8151_v37 = vadd.f32 %v5952_v30, %v5950_v31  ;;  %v9094_v57 = vld [vmem:[#allocation42_spill] sm:$0xff] }
 0x5be   : > { %v5956_v15 = vpop.eup %5955  ;;  %v2874_v2 = vpack.c.bf16 %v5954_v53, %v5950_v31 }
 0x5bf   : > { %3942 = vmax.xlane.f32.xlu1 %v3941_v7  ;;  %v2875_v55 = vpack.c.bf16 %v5956_v15, %v5952_v30  ;;  %v8156_v36 = vadd.f32 %v5956_v15, %v5954_v53  ;;  %v9081_v7 = vld [vmem:[#allocation19_spill] sm:$0xff] }
 0x5c1   : > { %3028 = vmatprep.mubr.bf16.mxu0 %v2875_v55  ;;  %3933 = vmax.xlane.f32.xlu0 %v9080_v35 }
 0x5c3   : > { %2828 = vadd.xlane.f32.xlu1 %v8085_v28  ;;  %v9082_v28 = vld [vmem:[#allocation21_spill] sm:$0xff] }
 0x5c4   : > { %3029 = vmatmul.mubr.bf16.gmra.mrb[60].mxu0 %v2874_v2  ;;  %v9095_v2 = vld [vmem:[#allocation43_spill] sm:$0xff] }
 0x5c5   : > { %3939 = vmax.xlane.f32.xlu0 %v3938_v59  ;;  %v9084_v59 = vld [vmem:[#allocation23_spill] sm:$0xff] }
 0x5c7   : > { %2834 = vadd.xlane.f32.xlu1 %v8107_v6  ;;  %v8176_v6 = vpop.permute.xlu0 %4148 }
 0x5c9   : > { %2825 = vadd.xlane.f32.xlu0 %v8074_v16  ;;  %v9085_v16 = vld [vmem:[#allocation20_spill] sm:$0xff] }
 0x5cb   : > { %2816 = vadd.xlane.f32.xlu1 %v8030_v45  ;;  %v8179_v45 = vpop.permute.xlu1 %4132 }
 0x5cd   : > { %2831 = vadd.xlane.f32.xlu0 %v8100_v22  ;;  %v9086_v22 = vld [vmem:[#allocation25_spill] sm:$0xff] }
 0x5cf   : > { %2822 = vadd.xlane.f32.xlu1 %v8055_v33  ;;  %v9087_v33 = vld [vmem:[#allocation22_spill] sm:$0xff] }
 0x5d1   : > { %2813 = vadd.xlane.f32.xlu0 %v8022_v40 }
 0x5d3   : > { %2226 = vadd.xlane.f32.xlu1 %v9081_v7  ;;  %v9096_v7 = vld [vmem:[#allocation27_spill] sm:$0xff] }
 0x5d5   : > { %2819 = vadd.xlane.f32.xlu0 %v8044_v38  ;;  %v9089_v38 = vld [vmem:[#allocation39_spill] sm:$0xff] }
 0x5d7   : > { %2232 = vadd.xlane.f32.xlu1 %v9082_v28 }
 0x5d9   : > { %2223 = vadd.xlane.f32.xlu0 %v9083_v12  ;;  %v9097_v12 = vld [vmem:[#allocation44_spill] sm:$0xff] }
 0x5db   : > { %2238 = vadd.xlane.f32.xlu1 %v9084_v59 }
 0x5dd   : > { %2229 = vadd.xlane.f32.xlu0 %v9085_v16  ;;  %v9098_v16 = vld [vmem:[#allocation45_spill] sm:$0xff] }
 0x5df   : > { %2244 = vadd.xlane.f32.xlu1 %v9086_v22 }
 0x5e1   : > { %2235 = vadd.xlane.f32.xlu0 %v9087_v33  ;;  %v3296_v40 = vpop.xlane.xlu0 %3295 }
 0x5e2   : > { %v3342_v18 = vsub.f32 %v9088_v44, %v3296_v40  ;;  %v3343_v32 = vsub.f32 %v9089_v38, %v3296_v40  ;;  %v9099_v40 = vld [vmem:[#allocation14_spill] sm:$0xff] }
 0x5e3   : > { %v3299_v51 = vpop.xlane.xlu1 %3298  ;;  %2214 = vadd.xlane.f32.xlu1 %v9090_v50  ;;  %v9101_v50 = vld [vmem:[#allocation47_spill] sm:$0xff] }
 0x5e4   : > { %v3374_v9 = vmul.f32 1.442695, %v3342_v18  ;;  %v3376_v20 = vmul.f32 1.442695, %v3343_v32  ;;  %v3344_v17 = vsub.f32 %v9091_v4, %v3299_v51  ;;  %v3345_v27 = vsub.f32 %v9092_v47, %v3299_v51  ;;  %v9100_v32 = vld [vmem:[#allocation46_spill] sm:$0xff] }
 0x5e5   : > { %2241 = vadd.xlane.f32.xlu0 %v9093_v8  ;;  %v3302_v31 = vpop.xlane.xlu0 %3301 }
 0x5e6   : > { %5957 = vpow2.f32 %v3374_v9  ;;  %v3378_v30 = vmul.f32 1.442695, %v3344_v17  ;;  %v3380_v53 = vmul.f32 1.442695, %v3345_v27  ;;  %v3346_v15 = vsub.f32 %v9094_v57, %v3302_v31  ;;  %v9102_v17 = vld [vmem:[#allocation48_spill] sm:$0xff]  ;;  %v9103_v27 = vld [vmem:[#allocation49_spill] sm:$0xff] }
 0x5e7   : > { %5959 = vpow2.f32 %v3376_v20  ;;  %v3347_v55 = vsub.f32 %v9095_v2, %v3302_v31  ;;  %v3305_v35 = vpop.xlane.xlu1 %3304  ;;  %2250 = vadd.xlane.f32.xlu1 %v9096_v7  ;;  %v9105_v2 = vld [vmem:[#allocation50_spill] sm:$0xff] }
 0x5e8   : > { %5961 = vpow2.f32 %v3378_v30  ;;  %v3382_v28 = vmul.f32 1.442695, %v3346_v15  ;;  %v3348_v59 = vsub.f32 %v9097_v12, %v3305_v35  ;;  %v3349_v22 = vsub.f32 %v9098_v16, %v3305_v35  ;;  %v9104_v30 = vld [vmem:[#allocation26_spill] sm:$0xff]  ;;  %v9106_v35 = vld [vmem:[#allocation51_spill] sm:$0xff] }
 0x5e9   : > { %5963 = vpow2.f32 %v3380_v53  ;;  %v3384_v33 = vmul.f32 1.442695, %v3347_v55  ;;  %2211 = vadd.xlane.f32.xlu0 %v9099_v40  ;;  %v3308_v44 = vpop.xlane.xlu0 %3307 }
 0x5ea   : > { %5965 = vpow2.f32 %v3382_v28  ;;  %v3386_v18 = vmul.f32 1.442695, %v3348_v59  ;;  %v3388_v38 = vmul.f32 1.442695, %v3349_v22  ;;  %v3350_v51 = vsub.f32 %v9100_v32, %v3308_v44  ;;  %v9107_v59 = vld [vmem:[#allocation52_spill] sm:$0xff]  ;;  %v9108_v22 = vld [vmem:[#allocation53_spill] sm:$0xff] }
 0x5eb   : > { %5967 = vpow2.f32 %v3384_v33  ;;  %v3351_v9 = vsub.f32 %v9101_v50, %v3308_v44  ;;  %v3311_v20 = vpop.xlane.xlu1 %3310  ;;  %2840 = vadd.xlane.f32.xlu1 %v8121_v46 }
 0x5ec   : > { %5969 = vpow2.f32 %v3386_v18  ;;  %v3390_v4 = vmul.f32 1.442695, %v3350_v51  ;;  %v3352_v47 = vsub.f32 %v9102_v17, %v3311_v20  ;;  %v3353_v8 = vsub.f32 %v9103_v27, %v3311_v20  ;;  %v9109_v18 = vld [vmem:[#allocation16_spill] sm:$0xff] }
 0x5ed   : > { %5971 = vpow2.f32 %v3388_v38  ;;  %v3392_v31 = vmul.f32 1.442695, %v3351_v9  ;;  %2247 = vadd.xlane.f32.xlu0 %v9104_v30  ;;  %v3314_v53 = vpop.xlane.xlu0 %3313  ;;  %v9110_v9 = vld [vmem:[#allocation54_spill] sm:$0xff] }
 0x5ee   : > { %5973 = vpow2.f32 %v3390_v4  ;;  %v3394_v57 = vmul.f32 1.442695, %v3352_v47  ;;  %v3396_v15 = vmul.f32 1.442695, %v3353_v8  ;;  %v3354_v55 = vsub.f32 %v9105_v2, %v3314_v53  ;;  %v9111_v4 = vld [vmem:[#allocation55_spill] sm:$0xff] }
 0x5ef   : > { %5975 = vpow2.f32 %v3392_v31  ;;  %v3355_v7 = vsub.f32 %v9106_v35, %v3314_v53  ;;  %v3317_v46 = vpop.xlane.xlu1 %3316  ;;  %2846 = vadd.xlane.f32.xlu1 %v8130_v48  ;;  %v9112_v53 = vld [vmem:[#allocation56_spill] sm:$0xff] }
 0x5f0   : > { %v5958_v28 = vpop.eup %5957  ;;  %5977 = vpow2.f32 %v3394_v57  ;;  %v3398_v12 = vmul.f32 1.442695, %v3354_v55  ;;  %v3356_v16 = vsub.f32 %v9107_v59, %v3317_v46  ;;  %v3357_v33 = vsub.f32 %v9108_v22, %v3317_v46 }
 0x5f1   : > { %v5960_v40 = vpop.eup %5959  ;;  %5979 = vpow2.f32 %v3396_v15  ;;  %v3400_v44 = vmul.f32 1.442695, %v3355_v7  ;;  %2217 = vadd.xlane.f32.xlu0 %v9109_v18  ;;  %v3320_v38 = vpop.xlane.xlu0 %3319  ;;  %v9113_v15 = vld [vmem:[#allocation57_spill] sm:$0xff] }
 0x5f2   : > { %v5962_v32 = vpop.eup %5961  ;;  %5981 = vpow2.f32 %v3398_v12  ;;  %v3402_v51 = vmul.f32 1.442695, %v3356_v16  ;;  %v3404_v50 = vmul.f32 1.442695, %v3357_v33  ;;  %v3358_v20 = vsub.f32 %v9110_v9, %v3320_v38  ;;  %v9114_v16 = vld [vmem:[#allocation58_spill] sm:$0xff]  ;;  %v9116_v9 = vld [vmem:[#allocation61_spill] sm:$0xff] }
 0x5f3   : > { %v5964_v48 = vpop.eup %5963  ;;  %5983 = vpow2.f32 %v3400_v44  ;;  %v3359_v17 = vsub.f32 %v9111_v4, %v3320_v38  ;;  %v3323_v47 = vpop.xlane.xlu1 %3322  ;;  %2852 = vadd.xlane.f32.xlu1 %v8140_v62  ;;  %v3486_v27 = vpack.c.bf16 %v5962_v32, %v5958_v28  ;;  %v3438_v8 = vadd.f32 %v5960_v40, %v5958_v28  ;;  %v9115_v44 = vld [vmem:[#allocation59_spill] sm:$0xff] }
 0x5f4   : > { %v8210_v31 = vpop.eup %5965  ;;  %5985 = vpow2.f32 %v3402_v51  ;;  %v3406_v30 = vmul.f32 1.442695, %v3358_v20  ;;  %v3360_v57 = vsub.f32 %v9112_v53, %v3323_v47  ;;  %v3361_v2 = vsub.f32 %v9113_v15, %v3323_v47 }
 0x5f5   : > { %v5968_v55 = vpop.eup %5967  ;;  %5987 = vpow2.f32 %v3404_v50  ;;  %v3408_v35 = vmul.f32 1.442695, %v3359_v17  ;;  %2837 = vadd.xlane.f32.xlu0 %v8116_v52  ;;  %v3487_v7 = vpack.c.bf16 %v5964_v48, %v5960_v40  ;;  %v3326_v46 = vpop.xlane.xlu0 %3325  ;;  %v8215_v12 = vadd.f32 %v5964_v48, %v5962_v32  ;;  %v9117_v17 = vld [vmem:[#allocation60_spill] sm:$0xff] }
 0x5f6   : > { %v8217_v62 = vpop.eup %5969  ;;  %5989 = vpow2.f32 %v3406_v30  ;;  %v3410_v28 = vmul.f32 1.442695, %v3360_v57  ;;  %v3412_v59 = vmul.f32 1.442695, %v3361_v2  ;;  %v3362_v22 = vsub.f32 %v9114_v16, %v3326_v46  ;;  %v9119_v57 = vld [vmem:[#allocation62_spill] sm:$0xff]  ;;  %v9121_v16 = vld [vmem:[#allocation65_spill] sm:$0xff] }
 0x5f7   : > { %v5972_v33 = vpop.eup %5971  ;;  %5991 = vpow2.f32 %v3408_v35  ;;  %3534 = vmatprep.mubr.bf16.mxu0 %v3487_v7  ;;  %v3363_v18 = vsub.f32 %v9115_v44, %v3326_v46  ;;  %v3329_v38 = vpop.xlane.xlu1 %3328  ;;  %2858 = vadd.xlane.f32.xlu1 %v8156_v36  ;;  %v3488_v52 = vpack.c.bf16 %v8217_v62, %v8210_v31  ;;  %v3444_v40 = vadd.f32 %v5968_v55, %v8210_v31  ;;  %v9120_v35 = vld [vmem:[#allocation64_spill] sm:$0xff] }
 0x5f8   : > { %v8225_v32 = vpop.eup %5973  ;;  %5993 = vpow2.f32 %v3410_v28  ;;  %v3414_v51 = vmul.f32 1.442695, %v3362_v22  ;;  %3535 = vmatmul.mubr.bf16.vlgmr.msra.gmra.mrb[64].mxu0 %v3486_v27  ;;  %v3364_v50 = vsub.f32 %v7902_v39, %v3329_v38  ;;  %v3365_v20 = vsub.f32 %v9116_v9, %v3329_v38  ;;  %v9118_v39 = vld [vmem:[#allocation63_spill] sm:$0xff] }
 0x5f9   : > { %v5976_v48 = vpop.eup %5975  ;;  %5995 = vpow2.f32 %v3412_v59  ;;  %v3416_v4 = vmul.f32 1.442695, %v3363_v18  ;;  %5389 = vmatpush3.bf16.msra.mxu0 %v9117_v17  ;;  %2843 = vadd.xlane.f32.xlu0 %v8126_v25  ;;  %v3489_v36 = vpack.c.bf16 %v5972_v33, %v5968_v55  ;;  %v3332_v47 = vpop.xlane.xlu0 %3331  ;;  %v8232_v31 = vadd.f32 %v5972_v33, %v8217_v62  ;;  %v9122_v18 = vld [vmem:[#allocation66_spill] sm:$0xff] }
 0x5fa   : > { %v8234_v30 = vpop.eup %5977  ;;  %5997 = vpow2.f32 %v3414_v51  ;;  %v3418_v27 = vmul.f32 1.442695, %v3364_v50  ;;  %v3420_v53 = vmul.f32 1.442695, %v3365_v20  ;;  %5390 = vmatprep.subr.bf16.mxu0 %v9118_v39  ;;  %v3366_v15 = vsub.f32 %v9119_v57, %v3332_v47  ;;  %v9123_v20 = vld [vmem:[#allocation69_spill] sm:$0xff] }
 0x5fb   : > { %v5980_v2 = vpop.eup %5979  ;;  %5999 = vpow2.f32 %v3416_v4  ;;  %3542 = vmatprep.mubr.bf16.mxu0 %v3489_v36  ;;  %v3367_v7 = vsub.f32 %v9120_v35, %v3332_v47  ;;  %v3335_v25 = vpop.xlane.xlu1 %3334  ;;  %3439 = vadd.xlane.f32.xlu1 %v3438_v8  ;;  %v3490_v55 = vpack.c.bf16 %v8234_v30, %v8225_v32  ;;  %v8242_v46 = vadd.f32 %v5976_v48, %v8225_v32  ;;  %v9124_v4 = vld [vmem:[#allocation67_spill] sm:$0xff]  ;;  %v9125_v47 = vld [vmem:[#allocation68_spill] sm:$0xff] }
 0x5fc   : > { %v8244_v62 = vpop.eup %5981  ;;  %6001 = vpow2.f32 %v3418_v27  ;;  %v3422_v28 = vmul.f32 1.442695, %v3366_v15  ;;  %v3368_v59 = vsub.f32 %v7918_v43, %v3335_v25  ;;  %v3369_v22 = vsub.f32 %v9121_v16, %v3335_v25 }
 0x5fd   : > { %v8248_v33 = vpop.eup %5983  ;;  %6003 = vpow2.f32 %v3420_v53  ;;  %v3424_v44 = vmul.f32 1.442695, %v3367_v7  ;;  %5391 = vmatpush3.bf16.msra.mxu0 %v9122_v18  ;;  %2849 = vadd.xlane.f32.xlu0 %v8135_v21  ;;  %v3338_v8 = vpop.xlane.xlu0 %3337  ;;  %v3491_v38 = vpack.c.bf16 %v5980_v2, %v5976_v48  ;;  %v8253_v51 = vadd.f32 %v5980_v2, %v8234_v30  ;;  %v9126_v2 = vld [vmem:[#allocation70_spill] sm:$0xff] }
 0x5fe   : > { %v8255_v50 = vpop.eup %5985  ;;  %6005 = vpow2.f32 %v3422_v28  ;;  %v3426_v9 = vmul.f32 1.442695, %v3368_v59  ;;  %v3428_v43 = vmul.f32 1.442695, %v3369_v22  ;;  %5392 = vmatprep.subr.bf16.mxu0 %v9123_v20  ;;  %v3370_v17 = vsub.f32 %v9124_v4, %v3338_v8  ;;  %v9127_v22 = vld [vmem:[#allocation72_spill] sm:$0xff] }
 0x5ff   : > { %v8259_v36 = vpop.eup %5987  ;;  %6007 = vpow2.f32 %v3424_v44  ;;  %v3371_v27 = vsub.f32 %v9125_v47, %v3338_v8  ;;  %v3341_v21 = vpop.xlane.xlu1 %3340  ;;  %3445 = vadd.xlane.f32.xlu1 %v3444_v40  ;;  %v3492_v48 = vpack.c.bf16 %v8255_v50, %v8244_v62  ;;  %v8266_v53 = vadd.f32 %v8248_v33, %v8244_v62  ;;  %v9128_v44 = vld [vmem:[#allocation71_spill] sm:$0xff]  ;;  %v9129_v8 = vld [vmem:[#allocation73_spill] sm:$0xff] }
 0x600   : > { %v8268_v39 = vpop.eup %5989  ;;  %6009 = vpow2.f32 %v3426_v9  ;;  %v3430_v57 = vmul.f32 1.442695, %v3370_v17  ;;  %3543 = vmatmul.mubr.bf16.gmra.mrb[68].mxu0 %v3488_v52  ;;  %v3372_v15 = vsub.f32 %v7934_v49, %v3341_v21  ;;  %v3373_v35 = vsub.f32 %v9126_v2, %v3341_v21  ;;  %v9130_v9 = vld [vmem:[#allocation17_spill] sm:$0xff] }
 0x601   : > { %v8272_v7 = vpop.eup %5991  ;;  %6011 = vpow2.f32 %v3428_v43  ;;  %v3432_v40 = vmul.f32 1.442695, %v3371_v27  ;;  %5393 = vmatpush3.bf16.msra.mxu0 %v7942_v56  ;;  %3550 = vmatprep.mubr.bf16.mxu0 %v3491_v38  ;;  %v3898_v25 = vpop.xlane.xlu0 %3897  ;;  %v3493_v28 = vpack.c.bf16 %v8259_v36, %v8248_v33  ;;  %v8279_v59 = vadd.f32 %v8259_v36, %v8255_v50  ;;  %v9131_v36 = vld [vmem:[#allocation75_spill] sm:$0xff] }
 0x602   : > { %v8281_v52 = vpop.eup %5993  ;;  %6013 = vpow2.f32 %v3430_v57  ;;  %v3434_v49 = vmul.f32 1.442695, %v3372_v15  ;;  %v3436_v16 = vmul.f32 1.442695, %v3373_v35  ;;  %5394 = vmatprep.subr.bf16.mxu0 %v9127_v22  ;;  %2855 = vadd.xlane.f32.xlu0 %v8151_v37  ;;  %v3944_v56 = vsub.f32 %v9128_v44, %v3898_v25  ;;  %v9132_v57 = vld [vmem:[#allocation74_spill] sm:$0xff] }
 0x603   : > { %v8286_v18 = vpop.eup %5995  ;;  %6015 = vpow2.f32 %v3432_v40  ;;  %v3945_v33 = vsub.f32 %v9129_v8, %v3898_v25  ;;  %v3901_v38 = vpop.xlane.xlu1 %3900  ;;  %2220 = vadd.xlane.f32.xlu1 %v9130_v9  ;;  %v8292_v43 = vadd.f32 %v8272_v7, %v8268_v39  ;;  %v3494_v20 = vpack.c.bf16 %v8281_v52, %v8268_v39 }
 0x604   : > { %v8296_v4 = vpop.eup %5997  ;;  %6017 = vpow2.f32 %v3434_v49  ;;  %v3976_v37 = vmul.f32 1.442695, %v3944_v56  ;;  %v3946_v17 = vsub.f32 %v7952_v29, %v3901_v38  ;;  %v3947_v47 = vsub.f32 %v9131_v36, %v3901_v38  ;;  %v9133_v49 = vld [vmem:[#allocation76_spill] sm:$0xff]  ;;  %v9135_v56 = vld [vmem:[#allocation79_spill] sm:$0xff] }
 0x605   : > { %v8300_v27 = vpop.eup %5999  ;;  %6019 = vpow2.f32 %v3436_v16  ;;  %v3978_v21 = vmul.f32 1.442695, %v3945_v33  ;;  %5395 = vmatpush3.bf16.msra.mxu0 %v9132_v57  ;;  %v3904_v15 = vpop.xlane.xlu0 %3903  ;;  %v8305_v2 = vadd.f32 %v8286_v18, %v8281_v52  ;;  %v3495_v35 = vpack.c.bf16 %v8286_v18, %v8272_v7  ;;  %v9134_v16 = vld [vmem:[#allocation77_spill] sm:$0xff] }
 0x606   : > { %v8309_v40 = vpop.eup %6001  ;;  %6021 = vpow2.f32 %v3976_v37  ;;  %v3980_v29 = vmul.f32 1.442695, %v3946_v17  ;;  %v3982_v25 = vmul.f32 1.442695, %v3947_v47  ;;  %5396 = vmatprep.subr.bf16.mxu0 %v9133_v49  ;;  %3442 = vadd.xlane.f32.xlu0 %v8215_v12  ;;  %v3948_v22 = vsub.f32 %v9134_v16, %v3904_v15  ;;  %v9136_v17 = vld [vmem:[#allocation80_spill] sm:$0xff]  ;;  %v9137_v47 = vld [vmem:[#allocation81_spill] sm:$0xff] }
 0x607   : > { %v8314_v44 = vpop.eup %6003  ;;  %6023 = vpow2.f32 %v3978_v21  ;;  %v3949_v8 = vsub.f32 %v9135_v56, %v3904_v15  ;;  %v3907_v33 = vpop.xlane.xlu1 %3906  ;;  %3454 = vadd.xlane.f32.xlu1 %v8253_v51  ;;  %v8320_v38 = vadd.f32 %v8300_v27, %v8296_v4  ;;  %v3496_v9 = vpack.c.bf16 %v8309_v40, %v8296_v4  ;;  %v9138_v15 = vld [vmem:[#allocation78_spill] sm:$0xff]  ;;  %v9140_v56 = vld [vmem:[#allocation84_spill] sm:$0xff] }
 0x608   : > { %v8324_v37 = vpop.eup %6005  ;;  %6025 = vpow2.f32 %v3980_v29  ;;  %v3984_v12 = vmul.f32 1.442695, %v3948_v22  ;;  %3551 = vmatmul.mubr.bf16.gmra.mrb[72].mxu0 %v3490_v55  ;;  %v3950_v36 = vsub.f32 %v9136_v17, %v3907_v33  ;;  %v3951_v21 = vsub.f32 %v9137_v47, %v3907_v33  ;;  %v9139_v22 = vld [vmem:[#allocation82_spill] sm:$0xff] }
 0x609   : > { %v8331_v51 = vpop.eup %6007  ;;  %6027 = vpow2.f32 %v3982_v25  ;;  %v3986_v57 = vmul.f32 1.442695, %v3949_v8  ;;  %5397 = vmatpush3.bf16.msra.mxu0 %v9138_v15  ;;  %3558 = vmatprep.mubr.bf16.mxu0 %v3493_v28  ;;  %v3910_v49 = vpop.xlane.xlu0 %3909  ;;  %v8336_v29 = vadd.f32 %v8314_v44, %v8309_v40  ;;  %v3497_v32 = vpack.c.bf16 %v8314_v44, %v8300_v27 }
 0x60a   : > { %v8340_v30 = vpop.eup %6009  ;;  %6029 = vpow2.f32 %v3984_v12  ;;  %v3988_v55 = vmul.f32 1.442695, %v3950_v36  ;;  %v3990_v16 = vmul.f32 1.442695, %v3951_v21  ;;  %5398 = vmatprep.subr.bf16.mxu0 %v9139_v22  ;;  %3448 = vadd.xlane.f32.xlu0 %v8232_v31  ;;  %v3952_v25 = vsub.f32 %v7980_v14, %v3910_v49 }
 0x60b   : > { %v8345_v28 = vpop.eup %6011  ;;  %6031 = vpow2.f32 %v3986_v57  ;;  %v3953_v8 = vsub.f32 %v9140_v56, %v3910_v49  ;;  %v3913_v33 = vpop.xlane.xlu1 %3912  ;;  %3460 = vadd.xlane.f32.xlu1 %v8279_v59  ;;  %v8351_v17 = vadd.f32 %v8331_v51, %v8324_v37  ;;  %v3498_v12 = vpack.c.bf16 %v8340_v30, %v8324_v37  ;;  %v9141_v59 = vld [vmem:[#allocation83_spill] sm:$0xff] }
 0x60c   : > { %v8355_v36 = vpop.eup %6013  ;;  %6033 = vpow2.f32 %v3988_v55  ;;  %v3992_v31 = vmul.f32 1.442695, %v3952_v25  ;;  %v3954_v14 = vsub.f32 %v7988_v41, %v3913_v33  ;;  %v3955_v47 = vsub.f32 %v7990_v0, %v3913_v33  ;;  %v9142_v25 = vld [vmem:[#allocation85_spill] sm:$0xff] }
 0x60d   : > { %v8359_v21 = vpop.eup %6015  ;;  %6035 = vpow2.f32 %v3990_v16  ;;  %v3994_v57 = vmul.f32 1.442695, %v3953_v8  ;;  %5399 = vmatpush3.bf16.msra.mxu0 %v9141_v59  ;;  %v3916_v15 = vpop.xlane.xlu0 %3915  ;;  %v3477_v49 = vadd.f32 %v8345_v28, %v8340_v30  ;;  %v3499_v22 = vpack.c.bf16 %v8345_v28, %v8331_v51 }
 0x60e   : > { %v8366_v56 = vpop.eup %6017  ;;  %6037 = vpow2.f32 %v3992_v31  ;;  %v3996_v55 = vmul.f32 1.442695, %v3954_v14  ;;  %v3998_v41 = vmul.f32 1.442695, %v3955_v47  ;;  %5400 = vmatprep.subr.bf16.mxu0 %v8176_v6  ;;  %3451 = vadd.xlane.f32.xlu0 %v8242_v46  ;;  %v3956_v0 = vsub.f32 %v7996_v23, %v3916_v15  ;;  %v9143_v23 = vld [vmem:[#allocation86_spill] sm:$0xff]  ;;  %v9144_v47 = vld [vmem:[#allocation87_spill] sm:$0xff] }
 0x60f   : > { %v8371_v16 = vpop.eup %6019  ;;  %6039 = vpow2.f32 %v3994_v57  ;;  %v3957_v8 = vsub.f32 %v9142_v25, %v3916_v15  ;;  %v3919_v33 = vpop.xlane.xlu1 %3918  ;;  %3466 = vadd.xlane.f32.xlu1 %v8305_v2  ;;  %v8377_v59 = vadd.f32 %v8359_v21, %v8355_v36  ;;  %v3500_v31 = vpack.c.bf16 %v8366_v56, %v8355_v36 }
 0x610   : > { %v8381_v6 = vpop.eup %6021  ;;  %6041 = vpow2.f32 %v3996_v55  ;;  %v4000_v46 = vmul.f32 1.442695, %v3956_v0  ;;  %3559 = vmatmul.mubr.bf16.gmra.mrb[76].mxu0 %v3492_v48  ;;  %v3958_v14 = vsub.f32 %v9143_v23, %v3919_v33  ;;  %v3959_v57 = vsub.f32 %v9144_v47, %v3919_v33 }
 0x611   : > { %v8388_v2 = vpop.eup %6023  ;;  %6043 = vpow2.f32 %v3998_v41  ;;  %v4002_v15 = vmul.f32 1.442695, %v3957_v8  ;;  %5401 = vmatpush3.bf16.msra.mxu0 %v8179_v45  ;;  %3566 = vmatprep.mubr.bf16.mxu0 %v3495_v35  ;;  %v3483_v55 = vadd.f32 %v8371_v16, %v8366_v56  ;;  %v3501_v62 = vpack.c.bf16 %v8371_v16, %v8359_v21  ;;  %v4151_v50 = vpop.permute.xlu0 %4150 }
 0x612   : > { %v8398_v48 = vpop.eup %6025  ;;  %6045 = vpow2.f32 %v4000_v46  ;;  %v4004_v0 = vmul.f32 1.442695, %v3958_v14  ;;  %v4006_v25 = vmul.f32 1.442695, %v3959_v57  ;;  %3457 = vadd.xlane.f32.xlu0 %v8266_v53  ;;  %v4040_v45 = vadd.f32 %v8388_v2, %v8381_v6  ;;  %5402 = vmatprep.subr.bf16.mxu0 %v4151_v50 }
 0x613   : > { %v6028_v7 = vpop.eup %6027  ;;  %6047 = vpow2.f32 %v4002_v15  ;;  %3472 = vadd.xlane.f32.xlu1 %v8336_v29  ;;  %v4135_v18 = vpop.permute.xlu1 %4134  ;;  %v4088_v35 = vpack.c.bf16 %v8398_v48, %v8381_v6 }
 0x614   : > { %v6030_v21 = vpop.eup %6029  ;;  %6049 = vpow2.f32 %v4004_v0  ;;  %v4043_v41 = vadd.f32 %v6028_v7, %v8398_v48  ;;  %v4089_v16 = vpack.c.bf16 %v6028_v7, %v8388_v2 }
 0x615   : > { %v6032_v8 = vpop.eup %6031  ;;  %6051 = vpow2.f32 %v4006_v25  ;;  %5403 = vmatpush3.bf16.msra.mxu0 %v4135_v18 }
 0x616   : > { %v6034_v53 = vpop.eup %6033  ;;  %3463 = vadd.xlane.f32.xlu0 %v8292_v43  ;;  %v4046_v33 = vadd.f32 %v6032_v8, %v6030_v21 }
 0x617   : > { %v6036_v46 = vpop.eup %6035  ;;  %3478 = vadd.xlane.f32.xlu1 %v3477_v49  ;;  %v4090_v29 = vpack.c.bf16 %v6034_v53, %v6030_v21 }
 0x618   : > { %v6038_v23 = vpop.eup %6037  ;;  %3567 = vmatmul.mubr.bf16.gmra.mrb[80].mxu0 %v3494_v20  ;;  %v4049_v6 = vadd.f32 %v6036_v46, %v6034_v53  ;;  %v4091_v14 = vpack.c.bf16 %v6036_v46, %v6032_v8 }
 0x619   : > { %v6040_v47 = vpop.eup %6039  ;;  %3574 = vmatprep.mubr.bf16.mxu0 %v3497_v32 }
 0x61a   : > { %v6042_v57 = vpop.eup %6041  ;;  %3469 = vadd.xlane.f32.xlu0 %v8320_v38  ;;  %v4052_v43 = vadd.f32 %v6040_v47, %v6038_v23 }
 0x61b   : > { %v6044_v2 = vpop.eup %6043  ;;  %3484 = vadd.xlane.f32.xlu1 %v3483_v55  ;;  %v4092_v49 = vpack.c.bf16 %v6042_v57, %v6038_v23 }
 0x61c   : > { %v8416_v15 = vpop.eup %6045  ;;  %v4055_v50 = vadd.f32 %v6044_v2, %v6042_v57  ;;  %v4093_v48 = vpack.c.bf16 %v6044_v2, %v6040_v47 }
 0x61d   : > { %v6048_v39 = vpop.eup %6047 }
 0x61e   : > { %v8418_v52 = vpop.eup %6049  ;;  %3475 = vadd.xlane.f32.xlu0 %v8351_v17  ;;  %v4058_v20 = vadd.f32 %v6048_v39, %v8416_v15 }
 0x61f   : > { %v6052_v27 = vpop.eup %6051  ;;  %4044 = vadd.xlane.f32.xlu1 %v4043_v41  ;;  %v4094_v44 = vpack.c.bf16 %v8418_v52, %v8416_v15 }
 0x620   : > { %3575 = vmatmul.mubr.bf16.gmra.mrb[84].mxu0 %v3496_v9  ;;  %v4061_v38 = vadd.f32 %v6052_v27, %v8418_v52  ;;  %v4095_v32 = vpack.c.bf16 %v6052_v27, %v6048_v39 }
 0x621   : > { %3582 = vmatprep.mubr.bf16.mxu0 %v3499_v22 }
 0x622   : > { %3481 = vadd.xlane.f32.xlu0 %v8377_v59 }
 0x623   : > { %4050 = vadd.xlane.f32.xlu1 %v4049_v6 }
 0x626   : > { %4041 = vadd.xlane.f32.xlu0 %v4040_v45 }
 0x627   : > { %4056 = vadd.xlane.f32.xlu1 %v4055_v50 }
 0x628   : > { %3583 = vmatmul.mubr.bf16.gmra.mrb[88].mxu0 %v3498_v12 }
 0x629   : > { %3590 = vmatprep.mubr.bf16.mxu0 %v3501_v62 }
 0x62a   : > { %4047 = vadd.xlane.f32.xlu0 %v4046_v33 }
 0x62b   : > { %4062 = vadd.xlane.f32.xlu1 %v4061_v38 }
 0x62e   : > { %4053 = vadd.xlane.f32.xlu0 %v4052_v43 }
 0x630   : > { %3591 = vmatmul.mubr.bf16.gmra.mrb[92].mxu0 %v3500_v31 }
 0x631   : > { %4200 = vmatprep.mubr.bf16.mxu0 %v4089_v16 }
 0x632   : > { %4059 = vadd.xlane.f32.xlu0 %v4058_v20 }
 0x638   : > { %4201 = vmatmul.mubr.bf16.vlgmr.msra.gmra.mrb[96].mxu0 %v4088_v35 }
 0x639   : > { %4208 = vmatprep.mubr.bf16.mxu0 %v4091_v14 }
 0x640   : > { %4209 = vmatmul.mubr.bf16.gmra.mrb[100].mxu0 %v4090_v29 }
 0x641   : > { %4216 = vmatprep.mubr.bf16.mxu0 %v4093_v48 }
 0x642   : > { %v3922_v4 = vpop.xlane.xlu0 %3921 }
 0x643   : > { %v3960_v40 = vsub.f32 %v8012_v10, %v3922_v4  ;;  %v3961_v9 = vsub.f32 %v8014_v54, %v3922_v4 }
 0x644   : > { %v3925_v37 = vpop.xlane.xlu1 %3924 }
 0x645   : > { %v4008_v51 = vmul.f32 1.442695, %v3960_v40  ;;  %v4010_v30 = vmul.f32 1.442695, %v3961_v9  ;;  %v3962_v28 = vsub.f32 %v8020_v13, %v3925_v37  ;;  %v3963_v17 = vsub.f32 %v8024_v63, %v3925_v37 }
 0x646   : > { %v3928_v12 = vpop.xlane.xlu0 %3927 }
 0x647   : > { %6053 = vpow2.f32 %v4008_v51  ;;  %v4012_v36 = vmul.f32 1.442695, %v3962_v28  ;;  %v4014_v22 = vmul.f32 1.442695, %v3963_v17  ;;  %v3964_v56 = vsub.f32 %v8032_v26, %v3928_v12 }
 0x648   : > { %6055 = vpow2.f32 %v4010_v30  ;;  %4217 = vmatmul.mubr.bf16.gmra.mrb[104].mxu0 %v4092_v49  ;;  %v3965_v59 = vsub.f32 %v8035_v3, %v3928_v12  ;;  %v3937_v10 = vpop.xlane.xlu1 %3936 }
 0x649   : > { %6057 = vpow2.f32 %v4012_v36  ;;  %v4016_v54 = vmul.f32 1.442695, %v3964_v56  ;;  %4224 = vmatprep.mubr.bf16.mxu0 %v4095_v32  ;;  %v3970_v31 = vsub.f32 %v8072_v61, %v3937_v10  ;;  %v3971_v13 = vsub.f32 %v8078_v5, %v3937_v10 }
 0x64a   : > { %6059 = vpow2.f32 %v4014_v22  ;;  %v4018_v63 = vmul.f32 1.442695, %v3965_v59  ;;  %v3931_v55 = vpop.xlane.xlu0 %3930 }
 0x64b   : > { %6061 = vpow2.f32 %v4016_v54  ;;  %v4028_v62 = vmul.f32 1.442695, %v3970_v31  ;;  %v4030_v0 = vmul.f32 1.442695, %v3971_v13  ;;  %v3966_v26 = vsub.f32 %v8042_v19, %v3931_v55 }
 0x64c   : > { %6063 = vpow2.f32 %v4018_v63  ;;  %v3967_v25 = vsub.f32 %v8046_v34, %v3931_v55  ;;  %v3943_v3 = vpop.xlane.xlu1 %3942 }
 0x64d   : > { %6065 = vpow2.f32 %v4028_v62  ;;  %v4020_v45 = vmul.f32 1.442695, %v3966_v26  ;;  %v3974_v7 = vsub.f32 %v8098_v42, %v3943_v3  ;;  %v3975_v61 = vsub.f32 %v8102_v11, %v3943_v3 }
 0x64e   : > { %6067 = vpow2.f32 %v4030_v0  ;;  %v4022_v5 = vmul.f32 1.442695, %v3967_v25  ;;  %v3934_v18 = vpop.xlane.xlu0 %3933 }
 0x64f   : > { %6069 = vpow2.f32 %v4020_v45  ;;  %v4036_v35 = vmul.f32 1.442695, %v3974_v7  ;;  %v4038_v21 = vmul.f32 1.442695, %v3975_v61  ;;  %v3968_v41 = vsub.f32 %v8062_v60, %v3934_v18 }
 0x650   : > { %6071 = vpow2.f32 %v4022_v5  ;;  %4225 = vmatmul.mubr.bf16.gmra.mrb[108].mxu0 %v4094_v44  ;;  %v3969_v19 = vsub.f32 %v8065_v1, %v3934_v18  ;;  %v8455_v34 = vpop.xlane.xlu1 %2828 }
 0x651   : > { %v6054_v42 = vpop.eup %6053  ;;  %6073 = vpow2.f32 %v4036_v35  ;;  %v4024_v11 = vmul.f32 1.442695, %v3968_v41 }
 0x652   : > { %v6056_v16 = vpop.eup %6055  ;;  %6075 = vpow2.f32 %v4038_v21  ;;  %v4026_v8 = vmul.f32 1.442695, %v3969_v19  ;;  %v3940_v53 = vpop.xlane.xlu0 %3939 }
 0x653   : > { %v6058_v33 = vpop.eup %6057  ;;  %6077 = vpow2.f32 %v4024_v11  ;;  %v3972_v60 = vsub.f32 %v8088_v24, %v3940_v53  ;;  %v3973_v46 = vsub.f32 %v8091_v58, %v3940_v53  ;;  %v4064_v29 = vadd.f32 %v6056_v16, %v6054_v42 }
 0x654   : > { %v6060_v23 = vpop.eup %6059  ;;  %6079 = vpow2.f32 %v4026_v8  ;;  %v8459_v6 = vpop.xlane.xlu1 %2834  ;;  %v4096_v1 = vpack.c.bf16 %v6058_v33, %v6054_v42 }
 0x655   : > { %v6062_v14 = vpop.eup %6061  ;;  %v4032_v47 = vmul.f32 1.442695, %v3972_v60  ;;  %v4034_v57 = vmul.f32 1.442695, %v3973_v46  ;;  %4065 = vadd.xlane.f32.xlu0 %v4064_v29  ;;  %v4067_v43 = vadd.f32 %v6060_v23, %v6058_v33  ;;  %v4097_v49 = vpack.c.bf16 %v6060_v23, %v6056_v16  ;;  %v9145_v29 = vld [vmem:[#allocation8_spill] sm:$0xff] }
 0x656   : > { %v6064_v2 = vpop.eup %6063  ;;  %v2826_v15 = vpop.xlane.xlu0 %2825 }
 0x657   : > { %v8461_v50 = vpop.eup %6065  ;;  %6081 = vpow2.f32 %v4032_v47  ;;  %4068 = vadd.xlane.f32.xlu1 %v4067_v43  ;;  %v4070_v24 = vadd.f32 %v6064_v2, %v6062_v14  ;;  %4232 = vmatprep.mubr.bf16.mxu0 %v4097_v49 }
 0x658   : > { %v6068_v58 = vpop.eup %6067  ;;  %6083 = vpow2.f32 %v4034_v57  ;;  %v2817_v48 = vpop.xlane.xlu1 %2816  ;;  %4233 = vmatmul.mubr.bf16.gmra.mrb[112].mxu0 %v4096_v1 }
 0x659   : > { %v6070_v39 = vpop.eup %6069  ;;  %4071 = vadd.xlane.f32.xlu0 %v4070_v24  ;;  %v4079_v52 = vadd.f32 %v6068_v58, %v8461_v50  ;;  %6085 = vrcp.f32 %v2817_v48  ;;  %v9146_v48 = vld [vmem:[#allocation9_spill] sm:$0xff] }
 0x65a   : > { %v6072_v20 = vpop.eup %6071  ;;  %v8464_v27 = vpop.xlane.xlu0 %2831  ;;  %v4098_v44 = vpack.c.bf16 %v6070_v39, %v6062_v14 }
 0x65b   : > { %v8466_v38 = vpop.eup %6073  ;;  %v4099_v32 = vpack.c.bf16 %v6072_v20, %v6064_v2  ;;  %v4073_v4 = vadd.f32 %v6072_v20, %v6070_v39 }
 0x65c   : > { %v6076_v40 = vpop.eup %6075  ;;  %v2823_v9 = vpop.xlane.xlu1 %2822 }
 0x65d   : > { %v6078_v37 = vpop.eup %6077  ;;  %4240 = vmatprep.mubr.bf16.mxu0 %v4099_v32  ;;  %4074 = vadd.xlane.f32.xlu1 %v4073_v4  ;;  %v4085_v51 = vadd.f32 %v6076_v40, %v8466_v38  ;;  %v5212_v28 = vpop.f32.mrb[32].mxu0  ;;  %v9147_v32 = vld [vmem:[#allocation6_spill] sm:$0xff] }
 0x65e   : > { %v6080_v30 = vpop.eup %6079  ;;  %v2814_v17 = vpop.xlane.xlu0 %2813  ;;  %v4100_v12 = vpack.c.bf16 %v8461_v50, %v6078_v37 }
 0x65f   : > { %v5213_v36 = vpop.f32.mrb[33].mxu0  ;;  %6087 = vrcp.f32 %v2814_v17  ;;  %v4101_v22 = vpack.c.bf16 %v6068_v58, %v6080_v30  ;;  %v4076_v56 = vadd.f32 %v6080_v30, %v6078_v37  ;;  %v9148_v30 = vld [vmem:[#allocation11_spill] sm:$0xff] }
 0x660   : > { %6089 = vrcp.f32 %v2823_v9  ;;  %v5214_v59 = vadd.f32 %v5213_v36, %v5212_v28  ;;  %v5215_v10 = vpop.f32.mrb[34].mxu0  ;;  %v2227_v54 = vpop.xlane.xlu1 %2226  ;;  %4241 = vmatmul.mubr.bf16.gmra.mrb[116].mxu0 %v4098_v44 }
 0x661   : > { %v6082_v31 = vpop.eup %6081  ;;  %v5216_v13 = vpop.f32.mrb[35].mxu0  ;;  %6091 = vrcp.f32 %v2227_v54  ;;  %4080 = vadd.xlane.f32.xlu1 %v4079_v52  ;;  %4248 = vmatprep.mubr.bf16.mxu0 %v4101_v22 }
 0x662   : > { %v6084_v63 = vpop.eup %6083  ;;  %v5217_v55 = vadd.f32 %v5216_v13, %v5215_v10  ;;  %4077 = vadd.xlane.f32.xlu0 %v4076_v56  ;;  %v2820_v62 = vpop.xlane.xlu0 %2819  ;;  %v4102_v0 = vpack.c.bf16 %v8466_v38, %v6082_v31  ;;  %v9149_v56 = vld [vmem:[#allocation10_spill] sm:$0xff] }
 0x663   : > { %6093 = vrcp.f32 %v2820_v62  ;;  %v4082_v26 = vadd.f32 %v6084_v63, %v6082_v31  ;;  %v4103_v25 = vpack.c.bf16 %v6076_v40, %v6084_v63  ;;  %v6086_v3 = vpop.eup %6085 }
 0x664   : > { %v2233_v45 = vpop.xlane.xlu1 %2232  ;;  %v8471_v7 = vmul.f32 %v6086_v3, %v5217_v55 }
 0x665   : > { %6095 = vrcp.f32 %v2233_v45  ;;  %4086 = vadd.xlane.f32.xlu1 %v4085_v51  ;;  %v5218_v61 = vpop.f32.mrb[36].mxu0 }
 0x666   : > { %6097 = vrcp.f32 %v8455_v34  ;;  %4083 = vadd.xlane.f32.xlu0 %v4082_v26  ;;  %v2224_v5 = vpop.xlane.xlu0 %2223  ;;  %v5219_v18 = vpop.f32.mrb[37].mxu0 }
 0x667   : > { %6099 = vrcp.f32 %v2224_v5  ;;  %v5220_v35 = vadd.f32 %v5219_v18, %v5218_v61  ;;  %v5221_v21 = vpop.f32.mrb[38].mxu0  ;;  %v9151_v18 = vld [vmem:[#allocation12_spill] sm:$0xff] }
 0x668   : > { %6101 = vrcp.f32 %v2826_v15  ;;  %v2239_v41 = vpop.xlane.xlu1 %2238  ;;  %v5222_v42 = vpop.f32.mrb[39].mxu0  ;;  %4249 = vmatmul.mubr.bf16.gmra.mrb[120].mxu0 %v4100_v12 }
 0x669   : > { %v6088_v19 = vpop.eup %6087  ;;  %6103 = vrcp.f32 %v2239_v41  ;;  %v5223_v8 = vadd.f32 %v5222_v42, %v5221_v21  ;;  %4256 = vmatprep.mubr.bf16.mxu0 %v4103_v25 }
 0x66a   : > { %v6090_v11 = vpop.eup %6089  ;;  %v8474_v16 = vmul.f32 %v6088_v19, %v5214_v59  ;;  %v2230_v53 = vpop.xlane.xlu0 %2229 }
 0x66b   : > { %v6092_v34 = vpop.eup %6091  ;;  %6105 = vrcp.f32 %v2230_v53  ;;  %v8478_v60 = vmul.f32 %v6090_v11, %v5223_v8  ;;  %v9152_v8 = vld [vmem:[#allocation5_spill] sm:$0xff] }
 0x66c   : > { %v2245_v46 = vpop.xlane.xlu1 %2244  ;;  %v8481_v23 = vmul.f32 %v6092_v34, %v9145_v29 }
 0x66d   : > { %v6094_v1 = vpop.eup %6093  ;;  %6107 = vrcp.f32 %v2245_v46 }
 0x66e   : > { %6109 = vrcp.f32 %v8459_v6  ;;  %v8484_v14 = vmul.f32 %v6094_v1, %v5220_v35  ;;  %v5224_v47 = vpop.f32.mrb[40].mxu0  ;;  %v2236_v57 = vpop.xlane.xlu0 %2235 }
 0x66f   : > { %v6096_v43 = vpop.eup %6095  ;;  %v5225_v2 = vpop.f32.mrb[41].mxu0  ;;  %6111 = vrcp.f32 %v2236_v57 }
 0x670   : > { %v6098_v49 = vpop.eup %6097  ;;  %6113 = vrcp.f32 %v8464_v27  ;;  %v5226_v50 = vadd.f32 %v5225_v2, %v5224_v47  ;;  %v5227_v24 = vpop.f32.mrb[42].mxu0  ;;  %v8490_v39 = vmul.f32 %v6096_v43, %v9146_v48  ;;  %4257 = vmatmul.mubr.bf16.gmra.mrb[124].mxu0 %v4102_v0  ;;  %v9150_v0 = vld [vmem:[#allocation30_spill] sm:$0xff]  ;;  %v9153_v47 = vld [vmem:[#allocation13_spill] sm:$0xff]  ;;  %v9154_v48 = vld [vmem:[#allocation32_spill] sm:$0xff] }
 0x671   : > { %v2215_v58 = vpop.xlane.xlu1 %2214  ;;  %v6100_v6 = vpop.eup %6099 }
 0x672   : > { %v5228_v52 = vpop.f32.mrb[43].mxu0  ;;  %6115 = vrcp.f32 %v2215_v58  ;;  %v6102_v20 = vpop.eup %6101  ;;  %v8493_v4 = vmul.f32 %v6100_v6, %v9147_v32  ;;  %v9155_v32 = vld [vmem:[#allocation3_spill] sm:$0xff] }
 0x673   : > { %v5229_v44 = vadd.f32 %v5228_v52, %v5227_v24  ;;  %v2242_v38 = vpop.xlane.xlu0 %2241  ;;  %v6104_v27 = vpop.eup %6103  ;;  %v3057_v40 = vmul.f32 %v6102_v20, %v5226_v50 }
 0x674   : > { %6117 = vrcp.f32 %v2242_v38  ;;  %v8498_v28 = vmul.f32 %v6104_v27, %v9148_v30 }
 0x675   : > { %v3058_v9 = vmul.f32 %v6098_v49, %v5229_v44  ;;  %v2251_v37 = vpop.xlane.xlu1 %2250  ;;  %v6106_v17 = vpop.eup %6105 }
 0x676   : > { %6119 = vrcp.f32 %v2251_v37  ;;  %v5230_v36 = vpop.f32.mrb[44].mxu0  ;;  %v8501_v59 = vmul.f32 %v6106_v17, %v9149_v56  ;;  %v9156_v17 = vld [vmem:[#allocation31_spill] sm:$0xff] }
 0x677   : > { %v3071_v12 = vpack.c.bf16 %v3058_v9, %v3057_v40  ;;  %v2212_v22 = vpop.xlane.xlu0 %2211  ;;  %v6108_v10 = vpop.eup %6107 }
 0x678   : > { %v5231_v54 = vpop.f32.mrb[45].mxu0  ;;  %6121 = vrcp.f32 %v2212_v22  ;;  %v6110_v31 = vpop.eup %6109  ;;  %v8507_v26 = vmul.f32 %v6108_v10, %v9150_v0  ;;  %v9157_v0 = vld [vmem:[#allocation4_spill] sm:$0xff] }
 0x679   : > { %v5232_v13 = vadd.f32 %v5231_v54, %v5230_v36  ;;  %v5233_v63 = vpop.f32.mrb[46].mxu0  ;;  %4317 = vrot.lane.b32.xlu1 %v3071_v12, %s6253_s26  ;;  %v2841_v55 = vpop.xlane.xlu1 %2840 }
 0x67a   : > { %v6112_v25 = vpop.eup %6111  ;;  %v5234_v3 = vpop.f32.mrb[47].mxu0 }
 0x67b   : > { %v6114_v45 = vpop.eup %6113  ;;  %v5235_v61 = vadd.f32 %v5234_v3, %v5233_v63  ;;  %v2248_v5 = vpop.xlane.xlu0 %2247  ;;  %v8510_v35 = vmul.f32 %v6112_v25, %v9151_v18 }
 0x67c   : > { %v6116_v21 = vpop.eup %6115  ;;  %6123 = vrcp.f32 %v2248_v5  ;;  %v3059_v41 = vmul.f32 %v6114_v45, %v5232_v13 }
 0x67d   : > { %v3060_v19 = vmul.f32 %v6110_v31, %v5235_v61  ;;  %v2847_v42 = vpop.xlane.xlu1 %2846  ;;  %v8515_v53 = vmul.f32 %v6116_v21, %v9152_v8 }
 0x67e   : > { %v6118_v34 = vpop.eup %6117  ;;  %v5236_v29 = vpop.f32.mrb[48].mxu0 }
 0x67f   : > { %v3072_v46 = vpack.c.bf16 %v3060_v19, %v3059_v41  ;;  %v2218_v1 = vpop.xlane.xlu0 %2217  ;;  %v8518_v57 = vmul.f32 %v6118_v34, %v9153_v47  ;;  %v5237_v2 = vpop.f32.mrb[49].mxu0 }
 0x680   : > { %v6120_v43 = vpop.eup %6119  ;;  %6125 = vrcp.f32 %v2218_v1  ;;  %v5238_v49 = vadd.f32 %v5237_v2, %v5236_v29  ;;  %v5239_v50 = vpop.f32.mrb[50].mxu0 }
 0x681   : > { %4319 = vrot.lane.b32.xlu1 %v3072_v46, %s6253_s26  ;;  %v2853_v24 = vpop.xlane.xlu1 %2852  ;;  %v8524_v6 = vmul.f32 %v6120_v43, %v9154_v48  ;;  %6127 = vrcp.f32 %v2841_v55  ;;  %v5240_v20 = vpop.f32.mrb[51].mxu0 }
 0x682   : > { %v6122_v52 = vpop.eup %6121  ;;  %6129 = vrcp.f32 %v2847_v42  ;;  %v5241_v44 = vadd.f32 %v5240_v20, %v5239_v50 }
 0x683   : > { %v2838_v38 = vpop.xlane.xlu0 %2837  ;;  %v8527_v27 = vmul.f32 %v6122_v52, %v9155_v32 }
 0x684   : > { %6131 = vrcp.f32 %v2838_v38 }
 0x685   : > { %v2859_v40 = vpop.xlane.xlu1 %2858 }
 0x686   : > { %v6124_v37 = vpop.eup %6123 }
 0x687   : > { %v2844_v30 = vpop.xlane.xlu0 %2843  ;;  %v8532_v12 = vmul.f32 %v6124_v37, %v9156_v17  ;;  %v5242_v36 = vpop.f32.mrb[52].mxu0 }
 0x688   : > { %6133 = vrcp.f32 %v2844_v30  ;;  %v5243_v22 = vpop.f32.mrb[53].mxu0 }
 0x689   : > { %v3440_v56 = vpop.xlane.xlu1 %3439  ;;  %v5244_v31 = vadd.f32 %v5243_v22, %v5242_v36  ;;  %v5245_v13 = vpop.f32.mrb[54].mxu0  ;;  %6135 = vrcp.f32 %v2853_v24 }
 0x68a   : > { %v6126_v54 = vpop.eup %6125  ;;  %v5246_v63 = vpop.f32.mrb[55].mxu0 }
 0x68b   : > { %v2850_v55 = vpop.xlane.xlu0 %2849  ;;  %v8537_v25 = vmul.f32 %v6126_v54, %v9157_v0  ;;  %v6128_v3 = vpop.eup %6127  ;;  %v5247_v45 = vadd.f32 %v5246_v63, %v5245_v13  ;;  %v9158_v63 = vld [vmem:[#allocation7_spill] sm:$0xff] }
 0x68c   : > { %6137 = vrcp.f32 %v2850_v55  ;;  %v6130_v61 = vpop.eup %6129  ;;  %v3062_v41 = vmul.f32 %v6128_v3, %v5241_v44 }
 0x68d   : > { %v3446_v5 = vpop.xlane.xlu1 %3445  ;;  %v8539_v21 = vmul.f32 %v6130_v61, %v5247_v45  ;;  %v9159_v61 = vld [vmem:[#allocation29_spill] sm:$0xff] }
 0x68e   : > { %v6132_v18 = vpop.eup %6131 }
 0x68f   : > { %v3061_v19 = vmul.f32 %v6132_v18, %v5238_v49  ;;  %v5248_v42 = vpop.f32.mrb[56].mxu0  ;;  %v2856_v8 = vpop.xlane.xlu0 %2855 }
 0x690   : > { %6139 = vrcp.f32 %v2856_v8  ;;  %v5249_v34 = vpop.f32.mrb[57].mxu0 }
 0x691   : > { %v2221_v46 = vpop.xlane.xlu1 %2220  ;;  %v3073_v29 = vpack.c.bf16 %v3062_v41, %v3061_v19  ;;  %v5250_v47 = vadd.f32 %v5249_v34, %v5248_v42  ;;  %v5251_v43 = vpop.f32.mrb[58].mxu0 }
 0x692   : > { %v6134_v1 = vpop.eup %6133  ;;  %6141 = vrcp.f32 %v2221_v46  ;;  %v5252_v50 = vpop.f32.mrb[59].mxu0 }
 0x693   : > { %6143 = vrcp.f32 %v2859_v40  ;;  %v8541_v2 = vmul.f32 %v6134_v1, %v5244_v31  ;;  %v5253_v24 = vadd.f32 %v5252_v50, %v5251_v43  ;;  %v6136_v48 = vpop.eup %6135  ;;  %v3443_v18 = vpop.xlane.xlu0 %3442 }
 0x694   : > { %6145 = vrcp.f32 %v3440_v56  ;;  %v5781_v56 = vld [vmem:[%s8907_s3] ss:$8 sps:$4 sm:$0xff]  }
 0x695   : > { %v8545_v20 = vmul.f32 %v6136_v48, %v5253_v24  ;;  %6147 = vrcp.f32 %v3443_v18 }
 0x696   : > { %v6138_v49 = vpop.eup %6137  ;;  %6149 = vrcp.f32 %v3446_v5  ;;  %v5783_v5 = vld [vmem:[%s8907_s3 + $0x4] ss:$8 sps:$4 sm:$0xff]  }
 0x697   : > { %v8547_v44 = vmul.f32 %v6138_v49, %v5250_v47  ;;  %v5254_v38 = vpop.f32.mrb[60].mxu0  ;;  %v3449_v41 = vpop.xlane.xlu0 %3448  ;;  %5484 = vmatprep.subr.bf16.mxu1 %v5783_v5  ;;  %4621 = vmatprep.subr.bf16.mxu0 %v5783_v5 }
 0x698   : > { %v5255_v37 = vpop.f32.mrb[61].mxu0  ;;  %6151 = vrcp.f32 %v3449_v41  ;;  %5500 = vmatpush1.bf16.msra.mxu1 %v5781_v56  ;;  %4622 = vmatpush1.bf16.msra.mxu0 %v5781_v56 }
 0x699   : > { %v5256_v30 = vadd.f32 %v5255_v37, %v5254_v38  ;;  %v5257_v40 = vpop.f32.mrb[62].mxu0  ;;  %v5786_v37 = vld [vmem:[%s8907_s3 + $0x14] ss:$8 sps:$4 sm:$0xff]  }
 0x69a   : > { %v6140_v17 = vpop.eup %6139  ;;  %v5258_v36 = vpop.f32.mrb[63].mxu0  ;;  %5485 = vmatprep.subr.bf16.mxu1 %v5786_v37  ;;  %4623 = vmatprep.subr.bf16.mxu0 %v5786_v37 }
 0x69b   : > { %v8551_v54 = vmul.f32 %v6140_v17, %v5256_v30  ;;  %v5259_v31 = vadd.f32 %v5258_v36, %v5257_v40  ;;  %v3452_v24 = vpop.xlane.xlu0 %3451  ;;  %v5784_v36 = vld [vmem:[%s8907_s3 + $0x10] ss:$8 sps:$4 sm:$0xff]  }
 0x69c   : > { %v6142_v22 = vpop.eup %6141  ;;  %6153 = vrcp.f32 %v3452_v24  ;;  %5501 = vmatpush1.bf16.msra.mxu1 %v5784_v36  ;;  %4624 = vmatpush1.bf16.msra.mxu0 %v5784_v36 }
 0x69d   : > { %v6144_v13 = vpop.eup %6143  ;;  %v8554_v55 = vmul.f32 %v6142_v22, %v9158_v63 }
 0x69e   : > { %v8556_v0 = vmul.f32 %v6144_v13, %v5259_v31  ;;  %v6146_v46 = vpop.eup %6145  ;;  %v5789_v13 = vld [vmem:[%s8907_s3 + $0x24] ss:$8 sps:$4 sm:$0xff]  }
 0x69f   : > { %v6148_v50 = vpop.eup %6147  ;;  %v3458_v41 = vpop.xlane.xlu0 %3457  ;;  %5486 = vmatprep.subr.bf16.mxu1 %v5789_v13  ;;  %4625 = vmatprep.subr.bf16.mxu0 %v5789_v13 }
 0x6a0   : > { %v6150_v22 = vpop.eup %6149 }
 0x6a2   : > { %v6152_v18 = vpop.eup %6151 }
 0x6a3   : > { %v3464_v37 = vpop.xlane.xlu0 %3463 }
 0x6a5   : > { %2256 = vadd.xlane.f32.xlu1 %v9159_v61 }
 0x6a6   : > { %v6154_v24 = vpop.eup %6153 }
 0x6b6   : > { %4321 = vrot.lane.b32.xlu1 %v3073_v29, %s6253_s26  ;;  %v3455_v29 = vpop.xlane.xlu1 %3454 }
 0x6b7   : > { %6155 = vrcp.f32 %v3455_v29 }
 0x6b8   : > { %6157 = vrcp.f32 %v3458_v41 }
 0x6cb   : > { %v5308_v19 = vpop.f32.mrb[64].mxu0 }
 0x6cc   : > { %v5309_v42 = vpop.f32.mrb[65].mxu0 }
 0x6cd   : > { %v5310_v8 = vadd.f32 %v5309_v42, %v5308_v19  ;;  %v5311_v34 = vpop.f32.mrb[66].mxu0  ;;  %v5787_v42 = vld [vmem:[%s8907_s3 + $0x20] ss:$8 sps:$4 sm:$0xff]  }
 0x6ce   : > { %v5312_v1 = vpop.f32.mrb[67].mxu0  ;;  %5502 = vmatpush1.bf16.msra.mxu1 %v5787_v42  ;;  %4626 = vmatpush1.bf16.msra.mxu0 %v5787_v42 }
 0x6cf   : > { %v8564_v47 = vmul.f32 %v6146_v46, %v5310_v8  ;;  %v5313_v43 = vadd.f32 %v5312_v1, %v5311_v34  ;;  %v3461_v8 = vpop.xlane.xlu1 %3460 }
 0x6d0   : > { %6159 = vrcp.f32 %v3461_v8  ;;  %v5793_v8 = vld [vmem:[%s8907_s3 + $0x40] ss:$8 sps:$4 sm:$0xff]  }
 0x6d1   : > { %v8566_v48 = vmul.f32 %v6148_v50, %v5313_v43  ;;  %6161 = vrcp.f32 %v3464_v37 }
 0x6d3   : > { %v5314_v38 = vpop.f32.mrb[68].mxu0  ;;  %v3467_v36 = vpop.xlane.xlu1 %3466 }
 0x6d4   : > { %v5315_v30 = vpop.f32.mrb[69].mxu0  ;;  %6163 = vrcp.f32 %v3467_v36 }
 0x6d5   : > { %v5316_v40 = vadd.f32 %v5315_v30, %v5314_v38  ;;  %v5317_v17 = vpop.f32.mrb[70].mxu0  ;;  %v6156_v38 = vpop.eup %6155 }
 0x6d6   : > { %v5318_v31 = vpop.f32.mrb[71].mxu0  ;;  %v6158_v41 = vpop.eup %6157 }
 0x6d7   : > { %v8585_v63 = vmul.f32 %v6150_v22, %v5316_v40  ;;  %v5319_v61 = vadd.f32 %v5318_v31, %v5317_v17  ;;  %v5790_v40 = vld [vmem:[%s8907_s3 + $0x30] ss:$8 sps:$4 sm:$0xff]   ;;  %v5792_v17 = vld [vmem:[%s8907_s3 + $0x34] ss:$8 sps:$4 sm:$0xff]   ;;  %v3473_v37 = vpop.xlane.xlu1 %3472 }
 0x6d8   : > { %5487 = vmatprep.subr.bf16.mxu1 %v5792_v17  ;;  %4627 = vmatprep.subr.bf16.mxu0 %v5792_v17 }
 0x6d9   : > { %v8587_v19 = vmul.f32 %v6152_v18, %v5319_v61  ;;  %5503 = vmatpush1.bf16.msra.mxu1 %v5790_v40  ;;  %4628 = vmatpush1.bf16.msra.mxu0 %v5790_v40 }
 0x6db   : > { %v5320_v46 = vpop.f32.mrb[72].mxu0 }
 0x6dc   : > { %v5321_v1 = vpop.f32.mrb[73].mxu0 }
 0x6dd   : > { %v5322_v43 = vadd.f32 %v5321_v1, %v5320_v46  ;;  %v5323_v50 = vpop.f32.mrb[74].mxu0  ;;  %v5795_v46 = vld [vmem:[%s8907_s3 + $0x44] ss:$8 sps:$4 sm:$0xff]  }
 0x6de   : > { %v5324_v56 = vpop.f32.mrb[75].mxu0  ;;  %5488 = vmatprep.subr.bf16.mxu1 %v5795_v46  ;;  %4629 = vmatprep.subr.bf16.mxu0 %v5795_v46 }
 0x6df   : > { %v8594_v5 = vmul.f32 %v6154_v24, %v5322_v43  ;;  %v5325_v29 = vadd.f32 %v5324_v56, %v5323_v50  ;;  %v6160_v50 = vpop.eup %6159  ;;  %v3470_v24 = vpop.xlane.xlu0 %3469  ;;  %5504 = vmatpush1.bf16.msra.mxu1 %v5793_v8  ;;  %4630 = vmatpush1.bf16.msra.mxu0 %v5793_v8 }
 0x6e0   : > { %6165 = vrcp.f32 %v3470_v24 }
 0x6e1   : > { %v8596_v30 = vmul.f32 %v6156_v38, %v5325_v29  ;;  %v5796_v29 = vld [vmem:[%s8907_s3 + $0x50] ss:$8 sps:$4 sm:$0xff]   ;;  %v5798_v38 = vld [vmem:[%s8907_s3 + $0x54] ss:$8 sps:$4 sm:$0xff]   ;;  %6167 = vrcp.f32 %v3473_v37  ;;  %v3479_v37 = vpop.xlane.xlu1 %3478 }
 0x6e2   : > { %5489 = vmatprep.subr.bf16.mxu1 %v5798_v38  ;;  %4631 = vmatprep.subr.bf16.mxu0 %v5798_v38  ;;  %v5804_v38 = vld [vmem:[%s8907_s3 + $0x74] ss:$8 sps:$4 sm:$0xff]  }
 0x6e3   : > { %v5326_v31 = vpop.f32.mrb[76].mxu0  ;;  %5505 = vmatpush1.bf16.msra.mxu1 %v5796_v29  ;;  %4632 = vmatpush1.bf16.msra.mxu0 %v5796_v29  ;;  %v5802_v29 = vld [vmem:[%s8907_s3 + $0x70] ss:$8 sps:$4 sm:$0xff]  }
 0x6e4   : > { %v5327_v13 = vpop.f32.mrb[77].mxu0 }
 0x6e5   : > { %v5328_v61 = vadd.f32 %v5327_v13, %v5326_v31  ;;  %v5329_v18 = vpop.f32.mrb[78].mxu0 }
 0x6e6   : > { %v5330_v42 = vpop.f32.mrb[79].mxu0 }
 0x6e7   : > { %v8612_v1 = vmul.f32 %v6158_v41, %v5328_v61  ;;  %v5331_v43 = vadd.f32 %v5330_v42, %v5329_v18  ;;  %v6162_v61 = vpop.eup %6161  ;;  %v5799_v41 = vld [vmem:[%s8907_s3 + $0x60] ss:$8 sps:$4 sm:$0xff]   ;;  %v5801_v42 = vld [vmem:[%s8907_s3 + $0x64] ss:$8 sps:$4 sm:$0xff]  }
 0x6e8   : > { %5490 = vmatprep.subr.bf16.mxu1 %v5801_v42  ;;  %4633 = vmatprep.subr.bf16.mxu0 %v5801_v42 }
 0x6e9   : > { %v8614_v56 = vmul.f32 %v6160_v50, %v5331_v43  ;;  %v6164_v43 = vpop.eup %6163  ;;  %v3476_v50 = vpop.xlane.xlu0 %3475  ;;  %5506 = vmatpush1.bf16.msra.mxu1 %v5799_v41  ;;  %4634 = vmatpush1.bf16.msra.mxu0 %v5799_v41  ;;  %v5805_v41 = vld [vmem:[%s8907_s3 + $0x80] ss:$8 sps:$4 sm:$0xff]  }
 0x6ea   : > { %6169 = vrcp.f32 %v3476_v50  ;;  %5491 = vmatprep.subr.bf16.mxu1 %v5804_v38  ;;  %4635 = vmatprep.subr.bf16.mxu0 %v5804_v38  ;;  %v6166_v42 = vpop.eup %6165 }
 0x6eb   : > { %v5332_v17 = vpop.f32.mrb[80].mxu0  ;;  %6171 = vrcp.f32 %v3479_v37  ;;  %v5813_v37 = vld [vmem:[%s8907_s3 + $0xa4] ss:$8 sps:$4 sm:$0xff]  }
 0x6ec   : > { %v5333_v36 = vpop.f32.mrb[81].mxu0 }
 0x6ed   : > { %v5334_v31 = vadd.f32 %v5333_v36, %v5332_v17  ;;  %v5335_v13 = vpop.f32.mrb[82].mxu0  ;;  %5507 = vmatpush1.bf16.msra.mxu1 %v5802_v29  ;;  %4636 = vmatpush1.bf16.msra.mxu0 %v5802_v29  ;;  %v5808_v29 = vld [vmem:[%s8907_s3 + $0x90] ss:$8 sps:$4 sm:$0xff]  }
 0x6ee   : > { %v5336_v18 = vpop.f32.mrb[83].mxu0 }
 0x6ef   : > { %v8630_v8 = vmul.f32 %v6162_v61, %v5334_v31  ;;  %v5337_v46 = vadd.f32 %v5336_v18, %v5335_v13  ;;  %v5807_v31 = vld [vmem:[%s8907_s3 + $0x84] ss:$8 sps:$4 sm:$0xff]  }
 0x6f0   : > { %5492 = vmatprep.subr.bf16.mxu1 %v5807_v31  ;;  %4637 = vmatprep.subr.bf16.mxu0 %v5807_v31  ;;  %v3485_v31 = vpop.xlane.xlu1 %3484 }
 0x6f1   : > { %v8632_v24 = vmul.f32 %v6164_v43, %v5337_v46  ;;  %v5810_v43 = vld [vmem:[%s8907_s3 + $0x94] ss:$8 sps:$4 sm:$0xff]   ;;  %5508 = vmatpush1.bf16.msra.mxu1 %v5805_v41  ;;  %4638 = vmatpush1.bf16.msra.mxu0 %v5805_v41  ;;  %v5811_v41 = vld [vmem:[%s8907_s3 + $0xa0] ss:$8 sps:$4 sm:$0xff]  }
 0x6f2   : > { %5493 = vmatprep.subr.bf16.mxu1 %v5810_v43  ;;  %4639 = vmatprep.subr.bf16.mxu0 %v5810_v43  ;;  %v5816_v43 = vld [vmem:[%s8907_s3 + $0xb4] ss:$8 sps:$4 sm:$0xff]  }
 0x6f3   : > { %v5338_v36 = vpop.f32.mrb[84].mxu0 }
 0x6f4   : > { %v5339_v13 = vpop.f32.mrb[85].mxu0 }
 0x6f5   : > { %v5340_v61 = vadd.f32 %v5339_v13, %v5338_v36  ;;  %v5341_v18 = vpop.f32.mrb[86].mxu0  ;;  %v6168_v36 = vpop.eup %6167  ;;  %5509 = vmatpush1.bf16.msra.mxu1 %v5808_v29  ;;  %4640 = vmatpush1.bf16.msra.mxu0 %v5808_v29  ;;  %v5814_v29 = vld [vmem:[%s8907_s3 + $0xb0] ss:$8 sps:$4 sm:$0xff]  }
 0x6f6   : > { %v5342_v46 = vpop.f32.mrb[87].mxu0  ;;  %v3482_v13 = vpop.xlane.xlu0 %3481  ;;  %5494 = vmatprep.subr.bf16.mxu1 %v5813_v37  ;;  %4641 = vmatprep.subr.bf16.mxu0 %v5813_v37 }
 0x6f7   : > { %v8651_v50 = vmul.f32 %v6166_v42, %v5340_v61  ;;  %v5343_v38 = vadd.f32 %v5342_v46, %v5341_v18  ;;  %6173 = vrcp.f32 %v3482_v13  ;;  %v4045_v37 = vpop.xlane.xlu1 %4044 }
 0x6f8   : > { %6175 = vrcp.f32 %v3485_v31  ;;  %v5819_v31 = vld [vmem:[%s8907_s3 + $0xc4] ss:$8 sps:$4 sm:$0xff]  }
 0x6f9   : > { %v8653_v10 = vmul.f32 %v6168_v36, %v5343_v38  ;;  %v6170_v36 = vpop.eup %6169  ;;  %5510 = vmatpush1.bf16.msra.mxu1 %v5811_v41  ;;  %4642 = vmatpush1.bf16.msra.mxu0 %v5811_v41  ;;  %v5817_v41 = vld [vmem:[%s8907_s3 + $0xc0] ss:$8 sps:$4 sm:$0xff]  }
 0x6fa   : > { %5495 = vmatprep.subr.bf16.mxu1 %v5816_v43  ;;  %4643 = vmatprep.subr.bf16.mxu0 %v5816_v43  ;;  %v5822_v43 = vld [vmem:[%s8907_s3 + $0xd4] ss:$8 sps:$4 sm:$0xff]  }
 0x6fb   : > { %v5344_v18 = vpop.f32.mrb[88].mxu0 }
 0x6fc   : > { %v5345_v42 = vpop.f32.mrb[89].mxu0 }
 0x6fd   : > { %v5346_v46 = vadd.f32 %v5345_v42, %v5344_v18  ;;  %v5347_v38 = vpop.f32.mrb[90].mxu0  ;;  %v6172_v18 = vpop.eup %6171  ;;  %5511 = vmatpush1.bf16.msra.mxu1 %v5814_v29  ;;  %4644 = vmatpush1.bf16.msra.mxu0 %v5814_v29  ;;  %v5820_v29 = vld [vmem:[%s8907_s3 + $0xd0] ss:$8 sps:$4 sm:$0xff]  }
 0x6fe   : > { %v5348_v3 = vpop.f32.mrb[91].mxu0  ;;  %v4042_v42 = vpop.xlane.xlu0 %4041  ;;  %5496 = vmatprep.subr.bf16.mxu1 %v5819_v31  ;;  %4645 = vmatprep.subr.bf16.mxu0 %v5819_v31 }
 0x6ff   : > { %v8669_v34 = vmul.f32 %v6170_v36, %v5346_v46  ;;  %v5349_v13 = vadd.f32 %v5348_v3, %v5347_v38  ;;  %6177 = vrcp.f32 %v4042_v42  ;;  %v4051_v31 = vpop.xlane.xlu1 %4050 }
 0x700   : > { %6179 = vrcp.f32 %v4045_v37  ;;  %v5825_v37 = vld [vmem:[%s8907_s3 + $0xe4] ss:$8 sps:$4 sm:$0xff]  }
 0x701   : > { %v8671_v58 = vmul.f32 %v6172_v18, %v5349_v13  ;;  %v6174_v18 = vpop.eup %6173  ;;  %5512 = vmatpush1.bf16.msra.mxu1 %v5817_v41  ;;  %4646 = vmatpush1.bf16.msra.mxu0 %v5817_v41  ;;  %v5823_v41 = vld [vmem:[%s8907_s3 + $0xe0] ss:$8 sps:$4 sm:$0xff]  }
 0x702   : > { %5497 = vmatprep.subr.bf16.mxu1 %v5822_v43  ;;  %4647 = vmatprep.subr.bf16.mxu0 %v5822_v43  ;;  %v5828_v43 = vld [vmem:[%s8907_s3 + $0xf4] ss:$8 sps:$4 sm:$0xff]  }
 0x703   : > { %v5350_v46 = vpop.f32.mrb[92].mxu0 }
 0x704   : > { %v5351_v38 = vpop.f32.mrb[93].mxu0 }
 0x705   : > { %v5352_v36 = vadd.f32 %v5351_v38, %v5350_v46  ;;  %v5353_v13 = vpop.f32.mrb[94].mxu0  ;;  %v6176_v46 = vpop.eup %6175  ;;  %5513 = vmatpush1.bf16.msra.mxu1 %v5820_v29  ;;  %4648 = vmatpush1.bf16.msra.mxu0 %v5820_v29  ;;  %v5826_v29 = vld [vmem:[%s8907_s3 + $0xf0] ss:$8 sps:$4 sm:$0xff]  }
 0x706   : > { %v5354_v9 = vpop.f32.mrb[95].mxu0  ;;  %v4048_v38 = vpop.xlane.xlu0 %4047  ;;  %5498 = vmatprep.subr.bf16.mxu1 %v5825_v37  ;;  %4649 = vmatprep.subr.bf16.mxu0 %v5825_v37 }
 0x707   : > { %v8687_v3 = vmul.f32 %v6174_v18, %v5352_v36  ;;  %v5355_v42 = vadd.f32 %v5354_v9, %v5353_v13  ;;  %6181 = vrcp.f32 %v4048_v38 }
 0x708   : > { %6183 = vrcp.f32 %v4051_v31  ;;  %v4057_v31 = vpop.xlane.xlu1 %4056 }
 0x709   : > { %9160 = vst [vmem:[#allocation35_spill] sm:$0xff] %v8687_v3  ;;  %v8689_v49 = vmul.f32 %v6176_v46, %v5355_v42  ;;  %v6178_v46 = vpop.eup %6177  ;;  %5514 = vmatpush1.bf16.msra.mxu1 %v5823_v41  ;;  %4650 = vmatpush1.bf16.msra.mxu0 %v5823_v41  ;;  %6185 = vrcp.f32 %v4057_v31 }
 0x70a   : > { %5499 = vmatprep.subr.bf16.mxu1 %v5828_v43  ;;  %4651 = vmatprep.subr.bf16.mxu0 %v5828_v43  ;;  %v4054_v11 = vpop.xlane.xlu0 %4053 }
 0x70b   : > { %9161 = vst [vmem:[#allocation36_spill] sm:$0xff] %v8689_v49  ;;  %v5404_v36 = vpop.f32.mrb[96].mxu0  ;;  %6187 = vrcp.f32 %v4054_v11 }
 0x70c   : > { %v5405_v13 = vpop.f32.mrb[97].mxu0  ;;  %v4063_v43 = vpop.xlane.xlu1 %4062 }
 0x70d   : > { %v5406_v18 = vadd.f32 %v5405_v13, %v5404_v36  ;;  %v5407_v42 = vpop.f32.mrb[98].mxu0  ;;  %v6180_v36 = vpop.eup %6179  ;;  %5515 = vmatpush1.bf16.msra.mxu1 %v5826_v29  ;;  %4652 = vmatpush1.bf16.msra.mxu0 %v5826_v29  ;;  %6189 = vrcp.f32 %v4063_v43 }
 0x70e   : > { %v5408_v61 = vpop.f32.mrb[99].mxu0  ;;  %v4060_v51 = vpop.xlane.xlu0 %4059 }
 0x70f   : > { %v8705_v9 = vmul.f32 %v6178_v46, %v5406_v18  ;;  %v5409_v38 = vadd.f32 %v5408_v61, %v5407_v42  ;;  %6191 = vrcp.f32 %v4060_v51 }
 0x710   : > { %v4069_v17 = vpop.xlane.xlu1 %4068 }
 0x711   : > { %v8707_v13 = vmul.f32 %v6180_v36, %v5409_v38  ;;  %v6182_v46 = vpop.eup %6181 }
 0x712   : > { %v6184_v62 = vpop.eup %6183 }
 0x713   : > { %v5410_v37 = vpop.f32.mrb[100].mxu0  ;;  %v6186_v11 = vpop.eup %6185 }
 0x714   : > { %v5411_v18 = vpop.f32.mrb[101].mxu0 }
 0x715   : > { %v5412_v61 = vadd.f32 %v5411_v18, %v5410_v37  ;;  %v5413_v42 = vpop.f32.mrb[102].mxu0 }
 0x716   : > { %v5414_v38 = vpop.f32.mrb[103].mxu0 }
 0x717   : > { %v8714_v36 = vmul.f32 %v6182_v46, %v5412_v61  ;;  %v5415_v41 = vadd.f32 %v5414_v38, %v5413_v42  ;;  %v6188_v61 = vpop.eup %6187  ;;  %v4066_v38 = vpop.xlane.xlu0 %4065 }
 0x718   : > { %6193 = vrcp.f32 %v4066_v38 }
 0x719   : > { %v8716_v40 = vmul.f32 %v6184_v62, %v5415_v41  ;;  %6195 = vrcp.f32 %v4069_v17 }
 0x71b   : > { %v5416_v15 = vpop.f32.mrb[104].mxu0 }
 0x71c   : > { %v5417_v31 = vpop.f32.mrb[105].mxu0 }
 0x71d   : > { %v5418_v37 = vadd.f32 %v5417_v31, %v5416_v15  ;;  %v5419_v18 = vpop.f32.mrb[106].mxu0  ;;  %v6190_v15 = vpop.eup %6189 }
 0x71e   : > { %v5420_v29 = vpop.f32.mrb[107].mxu0  ;;  %v6192_v31 = vpop.eup %6191 }
 0x71f   : > { %v5421_v33 = vadd.f32 %v5420_v29, %v5419_v18  ;;  %v4285_v46 = vmul.f32 %v6188_v61, %v5418_v37  ;;  %v4072_v29 = vpop.xlane.xlu0 %4071 }
 0x720   : > { %6197 = vrcp.f32 %v4072_v29 }
 0x721   : > { %v4286_v42 = vmul.f32 %v6186_v11, %v5421_v33  ;;  %v4075_v33 = vpop.xlane.xlu1 %4074 }
 0x722   : > { %6199 = vrcp.f32 %v4075_v33  ;;  %v6194_v38 = vpop.eup %6193 }
 0x723   : > { %v4299_v62 = vpack.c.bf16 %v4286_v42, %v4285_v46  ;;  %v5422_v41 = vpop.f32.mrb[108].mxu0 }
 0x724   : > { %v5423_v45 = vpop.f32.mrb[109].mxu0 }
 0x725   : > { %v5424_v32 = vadd.f32 %v5423_v45, %v5422_v41  ;;  %v5425_v52 = vpop.f32.mrb[110].mxu0  ;;  %4341 = vrot.lane.b32.xlu0 %v4299_v62, %s6253_s26  ;;  %v6196_v41 = vpop.eup %6195 }
 0x726   : > { %v5426_v43 = vpop.f32.mrb[111].mxu0 }
 0x727   : > { %v5427_v51 = vadd.f32 %v5426_v43, %v5425_v52  ;;  %v4287_v22 = vmul.f32 %v6192_v31, %v5424_v32  ;;  %v4081_v43 = vpop.xlane.xlu1 %4080  ;;  %v4078_v32 = vpop.xlane.xlu0 %4077 }
 0x728   : > { %6201 = vrcp.f32 %v4081_v43 }
 0x729   : > { %v4288_v18 = vmul.f32 %v6190_v15, %v5427_v51  ;;  %6203 = vrcp.f32 %v4078_v32 }
 0x72a   : > { %v6198_v29 = vpop.eup %6197 }
 0x72b   : > { %v4300_v37 = vpack.c.bf16 %v4288_v18, %v4287_v22  ;;  %v5428_v11 = vpop.f32.mrb[112].mxu0  ;;  %v4087_v49 = vpop.xlane.xlu1 %4086 }
 0x72c   : > { %v5429_v61 = vpop.f32.mrb[113].mxu0  ;;  %6205 = vrcp.f32 %v4087_v49 }
 0x72d   : > { %4343 = vrot.lane.b32.xlu0 %v4300_v37, %s6253_s26  ;;  %v5430_v45 = vadd.f32 %v5429_v61, %v5428_v11  ;;  %v5431_v46 = vpop.f32.mrb[114].mxu0  ;;  %v6200_v61 = vpop.eup %6199 }
 0x72e   : > { %v5432_v42 = vpop.f32.mrb[115].mxu0 }
 0x72f   : > { %v5433_v62 = vadd.f32 %v5432_v42, %v5431_v46  ;;  %v4289_v17 = vmul.f32 %v6194_v38, %v5430_v45  ;;  %v4084_v46 = vpop.xlane.xlu0 %4083 }
 0x730   : > { %6207 = vrcp.f32 %v4084_v46 }
 0x731   : > { %v4290_v52 = vmul.f32 %v6196_v41, %v5433_v62 }
 0x733   : > { %v4301_v15 = vpack.c.bf16 %v4290_v52, %v4289_v17  ;;  %v5434_v51 = vpop.f32.mrb[116].mxu0  ;;  %v6202_v52 = vpop.eup %6201 }
 0x734   : > { %v5435_v22 = vpop.f32.mrb[117].mxu0  ;;  %v6204_v32 = vpop.eup %6203 }
 0x735   : > { %v5436_v31 = vadd.f32 %v5435_v22, %v5434_v51  ;;  %v5437_v18 = vpop.f32.mrb[118].mxu0 }
 0x736   : > { %v5438_v37 = vpop.f32.mrb[119].mxu0 }
 0x737   : > { %v5439_v11 = vadd.f32 %v5438_v37, %v5437_v18  ;;  %v4291_v33 = vmul.f32 %v6198_v29, %v5436_v31  ;;  %v9162_v31 = vpack.c.bf16 %v8539_v21, %v8541_v2  ;;  %v9164_v2 = vld [vmem:[#allocation28_spill] sm:$0xff] }
 0x739   : > { %v4292_v3 = vmul.f32 %v6200_v61, %v5439_v11  ;;  %v6206_v61 = vpop.eup %6205 }
 0x73a   : > { %v6208_v46 = vpop.eup %6207 }
 0x73b   : > { %v4302_v42 = vpack.c.bf16 %v4292_v3, %v4291_v33  ;;  %v5440_v45 = vpop.f32.mrb[120].mxu0 }
 0x73c   : > { %v5441_v38 = vpop.f32.mrb[121].mxu0 }
 0x73d   : > { %v5442_v62 = vadd.f32 %v5441_v38, %v5440_v45  ;;  %v5443_v41 = vpop.f32.mrb[122].mxu0  ;;  %4347 = vrot.lane.b32.xlu1 %v4302_v42, %s6253_s26  ;;  %v9163_v38 = vpack.c.bf16 %v8545_v20, %v8547_v44  ;;  %v9167_v20 = vpack.c.bf16 %v8471_v7, %v8474_v16  ;;  %v9168_v44 = vpack.c.bf16 %v8716_v40, %v8714_v36 }
 0x73e   : > { %v5444_v17 = vpop.f32.mrb[123].mxu0  ;;  %v9171_v7 = vpack.c.bf16 %v8481_v23, %v8493_v4 }
 0x73f   : > { %v5445_v43 = vadd.f32 %v5444_v17, %v5443_v41  ;;  %v4293_v51 = vmul.f32 %v6204_v32, %v5442_v62  ;;  %v9165_v62 = vpack.c.bf16 %v8556_v0, %v8551_v54  ;;  %v9166_v41 = vpack.c.bf16 %v8707_v13, %v8705_v9  ;;  %v4318_v0 = vpop.permute.xlu1 %4317 }
 0x740   : > { %v9169_v54 = vpack.c.bf16 %v8478_v60, %v8484_v14  ;;  %v9170_v9 = vpack.c.bf16 %v8596_v30, %v8594_v5  ;;  %v4363_v16 = vsel %vm1880_vm0, %v9171_v7, %v4318_v0  ;;  %v9172_v60 = vpack.c.bf16 %v8614_v56, %v8612_v1 }
 0x741   : > { %v4294_v22 = vmul.f32 %v6202_v52, %v5445_v43  ;;  %4323 = vrot.lane.b32.xlu1 %v9162_v31, %s6253_s26  ;;  %v9173_v5 = vpack.c.bf16 %v8490_v39, %v8501_v59  ;;  %v9174_v1 = vpack.c.bf16 %v8632_v24, %v8630_v8  ;;  %v9175_v39 = vpack.c.bf16 %v8498_v28, %v8510_v35  ;;  %v9178_v35 = vld [vmem:[#allocation33_spill] sm:$0xff] }
 0x742   : > { %v9177_v8 = vpack.c.bf16 %v8566_v48, %v8564_v47 }
 0x743   : > { %v4303_v3 = vpack.c.bf16 %v4294_v22, %v4293_v51  ;;  %v5446_v18 = vpop.f32.mrb[124].mxu0  ;;  %v4320_v40 = vpop.permute.xlu1 %4319  ;;  %v9176_v51 = vpack.c.bf16 %v8653_v10, %v8651_v50  ;;  %v9180_v10 = vpack.c.bf16 %v8515_v53, %v8527_v27  ;;  %v9183_v53 = vpack.c.bf16 %v8587_v19, %v8585_v63 }
 0x744   : > { %v5447_v37 = vpop.f32.mrb[125].mxu0  ;;  %v4367_v30 = vsel %vm1880_vm0, %v9173_v5, %v4320_v40 }
 0x745   : > { %v5448_v49 = vadd.f32 %v5447_v37, %v5446_v18  ;;  %v5449_v29 = vpop.f32.mrb[126].mxu0  ;;  %4349 = vrot.lane.b32.xlu1 %v4303_v3, %s6253_s26 }
 0x746   : > { %v5450_v11 = vpop.f32.mrb[127].mxu0 }
 0x747   : > { %v5451_v33 = vadd.f32 %v5450_v11, %v5449_v29  ;;  %v4295_v42 = vmul.f32 %v6208_v46, %v5448_v49  ;;  %v2257_v17 = vpop.xlane.xlu1 %2256  ;;  %v9179_v29 = vld [vmem:[#allocation34_spill] sm:$0xff]  ;;  %v9182_v46 = vpack.c.bf16 %v8671_v58, %v8669_v34  ;;  %v9185_v58 = vpack.c.bf16 %v8524_v6, %v8532_v12  ;;  %v4449_v6 = vld [vmem:[%s8908_s4] sm:$0x3] }
 0x748   : > { %6209 = vrcp.f32 %v2257_v17 }
 0x749   : > { %v4296_v45 = vmul.f32 %v6206_v61, %v5451_v33  ;;  %4325 = vrot.lane.b32.xlu1 %v9163_v38, %s6253_s26  ;;  %v9181_v33 = vpack.c.bf16 %v8507_v26, %v8518_v57  ;;  %v9184_v26 = vpack.c.bf16 %v8554_v55, %v8537_v25  ;;  %v4451_v25 = vlaneseq }
 0x74b   : > { %v4304_v21 = vpack.c.bf16 %v4296_v45, %v4295_v42  ;;  %v4322_v23 = vpop.permute.xlu1 %4321  ;;  %v4452_v55 = vshrl.u32 %v4451_v25, 7 }
 0x74c   : > { %2253 = vadd.xlane.f32.xlu0 %v9164_v2  ;;  %v4371_v59 = vsel %vm1880_vm0, %v9175_v39, %v4322_v23  ;;  %v9186_v2 = vld [vmem:[#allocation36_spill] sm:$0xff] }
 0x74d   : > { %4351 = vrot.lane.b32.xlu1 %v4304_v21, %s6253_s26  ;;  %v4457_v12 = vsub.s32 1, %v4452_v55 }
 0x74f   : > { %v8823_v0 = vrot.slane %v4449_v6, %v4457_v12 }
 0x751   : > { %4327 = vrot.lane.b32.xlu1 %v9165_v62, %s6253_s26  ;;  %v9187_v62 = vld [vmem:[#allocation35_spill] sm:$0xff] }
 0x752   : > { %v6210_v18 = vpop.eup %6209  ;;  %v9188_v63 = vpack.c.bf16 %v9186_v2, %v9187_v62 }
 0x753   : > { %v2402_v11 = vmul.f32 %v6210_v18, %v9179_v29 }
 0x762   : > { %4345 = vrot.lane.b32.xlu0 %v4301_v15, %s6253_s26 }
 0x766   : > { %4337 = vrot.lane.b32.xlu0 %v9166_v41, %s6253_s26 }
 0x76a   : > { %4313 = vrot.lane.b32.xlu0 %v9167_v20, %s6253_s26 }
 0x76e   : > { %4339 = vrot.lane.b32.xlu0 %v9168_v44, %s6253_s26  ;;  %v4453_v44 = vsub.s32 0, %v4452_v55 }
 0x772   : > { %4315 = vrot.lane.b32.xlu0 %v9169_v54, %s6253_s26  ;;  %v8821_v54 = vrot.slane %v4449_v6, %v4453_v44 }
 0x797   : > { %v4342_v15 = vpop.permute.xlu0 %4341 }
 0x798   : > { %v4395_v13 = vsel %vm1880_vm0, %v9170_v9, %v4342_v15 }
 0x799   : > { %4673 = vmatprep.mubr.bf16.mxu1 %v4395_v13 }
 0x79a   : > { %4674 = vmatmul.mubr.bf16.vlgmr.msra.gmra.mrb[128].mxu1 %v4363_v16 }
 0x79f   : > { %v4344_v36 = vpop.permute.xlu0 %4343 }
 0x7a0   : > { %v4399_v14 = vsel %vm1880_vm0, %v9172_v60, %v4344_v36 }
 0x7a1   : > { %4683 = vmatprep.mubr.bf16.mxu1 %v4399_v14 }
 0x7a2   : > { %4684 = vmatmul.mubr.bf16.gmra.mrb[132].mxu1 %v4367_v30 }
 0x7af   : > { %v4348_v4 = vpop.permute.xlu1 %4347 }
 0x7b0   : > { %v4407_v22 = vsel %vm1880_vm0, %v9176_v51, %v4348_v4 }
 0x7b3   : > { %v4324_v43 = vpop.permute.xlu1 %4323 }
 0x7b4   : > { %v4375_v47 = vsel %vm1880_vm0, %v9181_v33, %v4324_v43 }
 0x7b7   : > { %v4350_v31 = vpop.permute.xlu1 %4349 }
 0x7b8   : > { %v4411_v42 = vsel %vm1880_vm0, %v9182_v46, %v4350_v31 }
 0x7bb   : > { %v4326_v61 = vpop.permute.xlu1 %4325 }
 0x7bc   : > { %v4379_v34 = vsel %vm1880_vm0, %v9185_v58, %v4326_v61 }
 0x7bf   : > { %v4352_v38 = vpop.permute.xlu1 %4351 }
 0x7c0   : > { %v4415_v19 = vsel %vm1880_vm0, %v9188_v63, %v4352_v38 }
 0x7c3   : > { %v4328_v41 = vpop.permute.xlu1 %4327 }
 0x7d9   : > { %v2254_v52 = vpop.xlane.xlu0 %2253 }
 0x7da   : > { %6211 = vrcp.f32 %v2254_v52 }
 0x7dd   : > { %v4346_v32 = vpop.permute.xlu0 %4345 }
 0x7de   : > { %v4403_v56 = vsel %vm1880_vm0, %v9174_v1, %v4346_v32 }
 0x7df   : > { %4693 = vmatprep.mubr.bf16.mxu1 %v4403_v56 }
 0x7e0   : > { %4694 = vmatmul.mubr.bf16.gmra.mrb[136].mxu1 %v4371_v59 }
 0x7e1   : > { %4703 = vmatprep.mubr.bf16.mxu1 %v4407_v22  ;;  %v4338_v3 = vpop.permute.xlu0 %4337 }
 0x7e2   : > { %v4387_v24 = vsel %vm1880_vm0, %v9177_v8, %v4338_v3 }
 0x7e3   : > { %4653 = vmatprep.mubr.bf16.mxu0 %v4387_v24 }
 0x7e4   : > { %v6212_v37 = vpop.eup %6211 }
 0x7e5   : > { %v4314_v28 = vpop.permute.xlu0 %4313  ;;  %v2401_v49 = vmul.f32 %v6212_v37, %v9178_v35 }
 0x7e6   : > { %v4355_v50 = vsel %vm1880_vm0, %v9180_v10, %v4314_v28 }
 0x7e7   : > { %4654 = vmatmul.mubr.bf16.vlgmr.msra.gmra.mrb[128].mxu0 %v4355_v50  ;;  %v2410_v48 = vpack.c.bf16 %v2402_v11, %v2401_v49 }
 0x7e8   : > { %4704 = vmatmul.mubr.bf16.gmra.mrb[140].mxu1 %v4375_v47 }
 0x7e9   : > { %4713 = vmatprep.mubr.bf16.mxu1 %v4411_v42  ;;  %v4340_v45 = vpop.permute.xlu0 %4339  ;;  %v4383_v20 = vsel %vm1880_vm0, %v2410_v48, %v4328_v41 }
 0x7ea   : > { %v4391_v27 = vsel %vm1880_vm0, %v9183_v53, %v4340_v45 }
 0x7eb   : > { %4663 = vmatprep.mubr.bf16.mxu0 %v4391_v27 }
 0x7ed   : > { %v4316_v21 = vpop.permute.xlu0 %4315 }
 0x7ee   : > { %v4359_v57 = vsel %vm1880_vm0, %v9184_v26, %v4316_v21 }
 0x7ef   : > { %4664 = vmatmul.mubr.bf16.gmra.mrb[132].mxu0 %v4359_v57 }
 0x7f0   : > { %4714 = vmatmul.mubr.bf16.gmra.mrb[144].mxu1 %v4379_v34 }
 0x7f1   : > { %4723 = vmatprep.mubr.bf16.mxu1 %v4415_v19 }
 0x7f8   : > { %4724 = vmatmul.mubr.bf16.gmra.mrb[148].mxu1 %v4383_v20 }
 0x86d   : > { %v4675_v15 = vpop.f32.mrb[128].mxu1 }
 0x86e   : > { %v4676_v9 = vadd.f32 %v4675_v15, %v8821_v54  ;;  %v4677_v13 = vpop.f32.mrb[129].mxu1 }
 0x86f   : > { %v4678_v7 = vadd.f32 %v4677_v13, %v8823_v0  ;;  %v4679_v16 = vpop.f32.mrb[130].mxu1 }
 0x870   : > { %4742 = vst [vmem:[%s6325_s11 + $0x40] sm:$0xff] %v4676_v9  ;;  %v4680_v40 = vadd.f32 %v4679_v16, %v8821_v54  ;;  %v4681_v36 = vpop.f32.mrb[131].mxu1 }
 0x871   : > { %4743 = vst [vmem:[%s6325_s11 + $0x48] sm:$0xff] %v4678_v7  ;;  %v4682_v60 = vadd.f32 %v4681_v36, %v8823_v0 }
 0x872   : > { %4744 = vst [vmem:[%s6325_s11 + $0x50] sm:$0xff] %v4680_v40 }
 0x873   : > { %4745 = vst [vmem:[%s6325_s11 + $0x58] sm:$0xff] %v4682_v60 }
 0x875   : > { %v4685_v14 = vpop.f32.mrb[132].mxu1 }
 0x876   : > { %v4686_v5 = vadd.f32 %v4685_v14, %v8821_v54  ;;  %v4687_v30 = vpop.f32.mrb[133].mxu1 }
 0x877   : > { %v4688_v17 = vadd.f32 %v4687_v30, %v8823_v0  ;;  %v4689_v23 = vpop.f32.mrb[134].mxu1 }
 0x878   : > { %4746 = vst [vmem:[%s6325_s11 + $0x60] sm:$0xff] %v4686_v5  ;;  %v4690_v4 = vadd.f32 %v4689_v23, %v8821_v54  ;;  %v4691_v52 = vpop.f32.mrb[135].mxu1 }
 0x879   : > { %4747 = vst [vmem:[%s6325_s11 + $0x68] sm:$0xff] %v4688_v17  ;;  %v4692_v43 = vadd.f32 %v4691_v52, %v8823_v0 }
 0x87a   : > { %4748 = vst [vmem:[%s6325_s11 + $0x70] sm:$0xff] %v4690_v4 }
 0x87b   : > { %4749 = vst [vmem:[%s6325_s11 + $0x78] sm:$0xff] %v4692_v43 }
 0x8b3   : > { %v4695_v32 = vpop.f32.mrb[136].mxu1 }
 0x8b4   : > { %v4696_v1 = vadd.f32 %v4695_v32, %v8821_v54  ;;  %v4697_v56 = vpop.f32.mrb[137].mxu1 }
 0x8b5   : > { %v4698_v39 = vadd.f32 %v4697_v56, %v8823_v0  ;;  %v4699_v59 = vpop.f32.mrb[138].mxu1 }
 0x8b6   : > { %4750 = vst [vmem:[%s6325_s11 + $0x80] sm:$0xff] %v4696_v1  ;;  %v4700_v51 = vadd.f32 %v4699_v59, %v8821_v54  ;;  %v4701_v22 = vpop.f32.mrb[139].mxu1 }
 0x8b7   : > { %4751 = vst [vmem:[%s6325_s11 + $0x88] sm:$0xff] %v4698_v39  ;;  %v4702_v31 = vadd.f32 %v4701_v22, %v8823_v0 }
 0x8b8   : > { %4752 = vst [vmem:[%s6325_s11 + $0x90] sm:$0xff] %v4700_v51 }
 0x8b9   : > { %4753 = vst [vmem:[%s6325_s11 + $0x98] sm:$0xff] %v4702_v31 }
 0x8ba   : > { %v4655_v3 = vpop.f32.mrb[128].mxu0 }
 0x8bb   : > { %v4656_v18 = vadd.f32 %v4655_v3, %v8821_v54  ;;  %v4657_v8 = vpop.f32.mrb[129].mxu0  ;;  %v4705_v24 = vpop.f32.mrb[140].mxu1 }
 0x8bc   : > { %v4658_v37 = vadd.f32 %v4657_v8, %v8823_v0  ;;  %v4706_v28 = vadd.f32 %v4705_v24, %v8821_v54  ;;  %v4659_v35 = vpop.f32.mrb[130].mxu0  ;;  %v4707_v49 = vpop.f32.mrb[141].mxu1 }
 0x8bd   : > { %4734 = vst [vmem:[%s6325_s11] sm:$0xff] %v4656_v18  ;;  %v4660_v29 = vadd.f32 %v4659_v35, %v8821_v54  ;;  %v4708_v11 = vadd.f32 %v4707_v49, %v8823_v0  ;;  %v4661_v10 = vpop.f32.mrb[131].mxu0  ;;  %v4709_v50 = vpop.f32.mrb[142].mxu1 }
 0x8be   : > { %4735 = vst [vmem:[%s6325_s11 + $0x8] sm:$0xff] %v4658_v37  ;;  %4754 = vst [vmem:[%s6325_s11 + $0xa0] sm:$0xff] %v4706_v28  ;;  %v4662_v61 = vadd.f32 %v4661_v10, %v8823_v0  ;;  %v4710_v33 = vadd.f32 %v4709_v50, %v8821_v54  ;;  %v4711_v47 = vpop.f32.mrb[143].mxu1 }
 0x8bf   : > { %4736 = vst [vmem:[%s6325_s11 + $0x10] sm:$0xff] %v4660_v29  ;;  %4755 = vst [vmem:[%s6325_s11 + $0xa8] sm:$0xff] %v4708_v11  ;;  %v4712_v48 = vadd.f32 %v4711_v47, %v8823_v0 }
 0x8c0   : > { %4737 = vst [vmem:[%s6325_s11 + $0x18] sm:$0xff] %v4662_v61  ;;  %4756 = vst [vmem:[%s6325_s11 + $0xb0] sm:$0xff] %v4710_v33 }
 0x8c1   : > { %4757 = vst [vmem:[%s6325_s11 + $0xb8] sm:$0xff] %v4712_v48 }
 0x8c2   : > { %v4665_v46 = vpop.f32.mrb[132].mxu0 }
 0x8c3   : > { %v4666_v42 = vadd.f32 %v4665_v46, %v8821_v54  ;;  %v4667_v45 = vpop.f32.mrb[133].mxu0  ;;  %v4715_v53 = vpop.f32.mrb[144].mxu1 }
 0x8c4   : > { %v4668_v27 = vadd.f32 %v4667_v45, %v8823_v0  ;;  %v4716_v38 = vadd.f32 %v4715_v53, %v8821_v54  ;;  %v4669_v21 = vpop.f32.mrb[134].mxu0  ;;  %v4717_v26 = vpop.f32.mrb[145].mxu1 }
 0x8c5   : > { %4738 = vst [vmem:[%s6325_s11 + $0x20] sm:$0xff] %v4666_v42  ;;  %v4670_v57 = vadd.f32 %v4669_v21, %v8821_v54  ;;  %v4718_v58 = vadd.f32 %v4717_v26, %v8823_v0  ;;  %v4671_v34 = vpop.f32.mrb[135].mxu0  ;;  %v4719_v2 = vpop.f32.mrb[146].mxu1 }
 0x8c6   : > { %4739 = vst [vmem:[%s6325_s11 + $0x28] sm:$0xff] %v4668_v27  ;;  %4758 = vst [vmem:[%s6325_s11 + $0xc0] sm:$0xff] %v4716_v38  ;;  %v4672_v62 = vadd.f32 %v4671_v34, %v8823_v0  ;;  %v4720_v63 = vadd.f32 %v4719_v2, %v8821_v54  ;;  %v4721_v19 = vpop.f32.mrb[147].mxu1 }
 0x8c7   : > { %4740 = vst [vmem:[%s6325_s11 + $0x30] sm:$0xff] %v4670_v57  ;;  %4759 = vst [vmem:[%s6325_s11 + $0xc8] sm:$0xff] %v4718_v58  ;;  %v4722_v41 = vadd.f32 %v4721_v19, %v8823_v0 }
 0x8c8   : > { %4741 = vst [vmem:[%s6325_s11 + $0x38] sm:$0xff] %v4672_v62  ;;  %4760 = vst [vmem:[%s6325_s11 + $0xd0] sm:$0xff] %v4720_v63 }
 0x8c9   : > { %4761 = vst [vmem:[%s6325_s11 + $0xd8] sm:$0xff] %v4722_v41 }
 0x8cb   : > { %v4725_v20 = vpop.f32.mrb[148].mxu1 }
 0x8cc   : > { %v4726_v25 = vadd.f32 %v4725_v20, %v8821_v54  ;;  %v4727_v55 = vpop.f32.mrb[149].mxu1 }
 0x8cd   : > { %v4728_v44 = vadd.f32 %v4727_v55, %v8823_v0  ;;  %v4729_v6 = vpop.f32.mrb[150].mxu1 }
 0x8ce   : > { %4762 = vst [vmem:[%s6325_s11 + $0xe0] sm:$0xff] %v4726_v25  ;;  %v4730_v12 = vadd.f32 %v4729_v6, %v8821_v54  ;;  %v4731_v15 = vpop.f32.mrb[151].mxu1 }
 0x8cf   : > { %4763 = vst [vmem:[%s6325_s11 + $0xe8] sm:$0xff] %v4728_v44  ;;  %v4732_v9 = vadd.f32 %v4731_v15, %v8823_v0 }
 0x8d0   : > { %4764 = vst [vmem:[%s6325_s11 + $0xf0] sm:$0xff] %v4730_v12 }
 0x8d1   : > { %4765 = vst [vmem:[%s6325_s11 + $0xf8] sm:$0xff] %v4732_v9 }
 0x8d2 PF: > { %s15_s22 = sadd.s32 1, %s6251_s22   ;;  %s9189_s18 = smov %s6243_s20 }
 0x8d3   : > { %p12_p8 = scmp.ge.s32.totalorder %s15_s22, 6   ;;  %s9190_s19 = smov %s6247_s21 }
 0x8d4   : > { %s9191_s20 = smov %s9194_s23  ;;  %s9192_s21 = smov %s9198_s24 }
 0x8d5   :  { %14 = sbr.rel (!%p12_p8) target bundleno = 3 (0x3), region = 75 }

</bundles_post_ra>
